<compile_context>
chip_gen: v7x
topology: tpu7x:2x2x1
jax: 0.10.0
libtpu: 0.0.40
codegen_flags: <defaults>
</compile_context>

<pallas_src>
import numpy as np

import jax
import jax.numpy as jnp
from jax import lax
from jax.experimental import pallas as pl
from jax.experimental.pallas import tpu as pltpu

NEG_SLOPE = 0.01  # torch.nn.LeakyReLU default negative_slope


# -----------------------------------------------------------------------------
# Constant 0/1 "im2col gather" matrices.
#
# For a conv (k, stride, pad) applied to a flat activation y of shape
# (Hi*Wi, C), G[t] (Ho*Wo, Hi*Wi) selects, for every output pixel, the single
# input pixel read by tap t = di*k + dj (all-zero row when that tap lands in
# the zero padding).  `G[t] @ y` is the tap's patch column and is exact in f32
# (each output row has exactly one nonzero term).  Doing the spatial gather on
# the MXU keeps the kernel free of strided VMEM access / in-kernel shuffles.
# -----------------------------------------------------------------------------
def _make_gather_mats(hi, wi, k, stride, pad):
    ho = (hi + 2 * pad - k) // stride + 1
    wo = (wi + 2 * pad - k) // stride + 1
    g = np.zeros((k * k, ho * wo, hi * wi), np.float32)
    for di in range(k):
        for dj in range(k):
            t = di * k + dj
            for oy in range(ho):
                iy = stride * oy + di - pad
                if iy < 0 or iy >= hi:
                    continue
                for ox in range(wo):
                    ix = stride * ox + dj - pad
                    if ix < 0 or ix >= wi:
                        continue
                    g[t, oy * wo + ox, iy * wi + ix] = 1.0
    return g


def _flatten_weight(w):
    """(Cout, Cin, k, k) OIHW -> (k*k*Cin, Cout); tap-major (di, dj), ci inner."""
    cout, cin, kh, kw = w.shape
    return jnp.transpose(w, (2, 3, 1, 0)).reshape(kh * kw * cin, cout)


def _flatten_weight_s2d(w):
    """(Cout, Cin, 4, 4) -> (4*4*Cin, Cout) for the space-to-depth 2x2-tap
    formulation of the stride-2 conv; row order (ti, tj, ri, rj, ci)."""
    cout, cin, kh, kw = w.shape
    assert kh == 4 and kw == 4
    wt = w.reshape(cout, cin, 2, 2, 2, 2)         # (co, ci, ti, ri, tj, rj)
    wt = jnp.transpose(wt, (2, 4, 3, 5, 1, 0))    # (ti, tj, ri, rj, ci, co)
    return wt.reshape(4 * 4 * cin, cout)


# -------------------------------- fused kernel --------------------------------
def _make_fused_kernel(ho1, wo1):
    """All four conv+LeakyReLU layers for one image; h1..h3 never leave VMEM."""

    def lrelu(a):
        return jnp.where(a >= 0.0, a, NEG_SLOPE * a)

    def conv_from_flat(y_prev, g_ref, w_ref, b_ref):
        # y_prev: (M_in, C_in) flat activation.  One gather matmul per tap,
        # lane-concat into an (M_out, taps*C_in) im2col slab, then one deep
        # MXU matmul (K = taps*C_in) + bias + LeakyReLU, all in f32.
        taps = g_ref.shape[0]
        cols = [jnp.dot(g_ref[t], y_prev, preferred_element_type=jnp.float32)
                for t in range(taps)]
        slab = jnp.concatenate(cols, axis=-1)
        acc = jnp.dot(slab, w_ref[...], preferred_element_type=jnp.float32)
        return lrelu(acc + b_ref[...])

    def kernel(x_ref, w1_ref, b1_ref, g2_ref, w2_ref, b2_ref,
               g3_ref, w3_ref, b3_ref, g4_ref, w4_ref, b4_ref,
               o1_ref, o2_ref, o3_ref, o4_ref):
        m1 = ho1 * wo1

        # Layer 1: stride-2 4x4 conv over the space-to-depth input.  The four
        # effective 2x2 taps are contiguous slices; M = Ho*Wo, K = 16*Cin.
        taps = []
        for ti in range(2):
            for tj in range(2):
                blk = x_ref[0, ti:ti + ho1, tj:tj + wo1, :]    # (Ho1, Wo1, 4Cin)
                taps.append(blk.reshape(m1, blk.shape[-1]))    # Wo1 % 8 == 0
        lhs1 = jnp.concatenate(taps, axis=-1)                  # (M1, 16*Cin)
        acc1 = jnp.dot(lhs1, w1_ref[...], preferred_element_type=jnp.float32)
        y1 = lrelu(acc1 + b1_ref[...])                         # (M1, C1)
        o1_ref[0] = y1.astype(o1_ref.dtype)

        # Layers 2..4: spatial gathers as constant-matrix matmuls, then one
        # deep matmul per layer.  Intermediates stay as in-kernel values.
        y2 = conv_from_flat(y1, g2_ref, w2_ref, b2_ref)
        o2_ref[0] = y2.astype(o2_ref.dtype)
        y3 = conv_from_flat(y2, g3_ref, w3_ref, b3_ref)
        o3_ref[0] = y3.astype(o3_ref.dtype)
        y4 = conv_from_flat(y3, g4_ref, w4_ref, b4_ref)
        o4_ref[0] = y4.astype(o4_ref.dtype)

    return kernel


# --------------------------------- forward ------------------------------------
def clevrer_encoder_forward(x, params):
    """Fused ClevrerEncoder forward.  x: (B, Cin, H, W) NCHW float32."""
    # TODO(synk): the literal PyTorch forward applies conv2/3/4 directly to `x`,
    # which is shape-inconsistent for any hidden_size > 0 (they expect h, 2h, 3h
    # input channels); implementing the only runnable interpretation: chained
    # convs x -> x1 -> x2 -> x3 -> x4.
    B, cin, H, W = x.shape
    c1 = params["w1"].shape[0]
    c2 = params["w2"].shape[0]
    c3 = params["w3"].shape[0]
    c4 = params["w4"].shape[0]

    # Output spatial sizes (convs 1-3: k=4, s=2, p=1; conv4: k=3, s=1, p=0).
    ho1, wo1 = (H + 2 - 4) // 2 + 1, (W + 2 - 4) // 2 + 1
    ho2, wo2 = (ho1 + 2 - 4) // 2 + 1, (wo1 + 2 - 4) // 2 + 1
    ho3, wo3 = (ho2 + 2 - 4) // 2 + 1, (wo2 + 2 - 4) // 2 + 1
    ho4, wo4 = ho3 - 2, wo3 - 2
    assert ho4 >= 1 and wo4 >= 1, "input too small for conv4 (3x3 valid)"
    assert H % 2 == 0 and W % 2 == 0, "space-to-depth entry assumes even H, W"
    assert wo1 % 8 == 0, "layer-1 flatten assumes Wo1 to be a multiple of 8"
    m1, m2, m3, m4 = ho1 * wo1, ho2 * wo2, ho3 * wo3, ho4 * wo4

    # Layer-1 input prep (single XLA pass, fused with the mandatory NCHW->NHWC
    # entry transpose): pad spatially by 1 and fold the 2x2 stride into channels.
    hp, wp = H + 2, W + 2
    hq, wq, ce = hp // 2, wp // 2, 4 * cin
    xh = jnp.transpose(x, (0, 2, 3, 1))
    xp = jnp.pad(xh, ((0, 0), (1, 1), (1, 1), (0, 0)))
    xs = xp.reshape(B, hq, 2, wq, 2, cin)
    xs = jnp.transpose(xs, (0, 1, 3, 2, 4, 5))
    xs2d = xs.reshape(B, hq, wq, ce)

    # Flattened weights (K = taps * Cin) and biases.
    w1f = _flatten_weight_s2d(params["w1"]).astype(jnp.float32)
    w2f = _flatten_weight(params["w2"]).astype(jnp.float32)
    w3f = _flatten_weight(params["w3"]).astype(jnp.float32)
    w4f = _flatten_weight(params["w4"]).astype(jnp.float32)
    b1r = params["b1"].reshape(1, c1).astype(jnp.float32)
    b2r = params["b2"].reshape(1, c2).astype(jnp.float32)
    b3r = params["b3"].reshape(1, c3).astype(jnp.float32)
    b4r = params["b4"].reshape(1, c4).astype(jnp.float32)

    # Constant gather matrices for layers 2..4 (compile-time constants, ~1.1 MB).
    g2 = jnp.asarray(_make_gather_mats(ho1, wo1, 4, 2, 1))    # (16, M2, M1)
    g3 = jnp.asarray(_make_gather_mats(ho2, wo2, 4, 2, 1))    # (16, M3, M2)
    g4 = jnp.asarray(_make_gather_mats(ho3, wo3, 3, 1, 0))    # (9,  M4, M3)

    def bcast2(a):
        return pl.BlockSpec(a.shape, lambda i: (0, 0))

    def bcast3(a):
        return pl.BlockSpec(a.shape, lambda i: (0, 0, 0))

    kernel = _make_fused_kernel(ho1, wo1)
    out_shape = [
        jax.ShapeDtypeStruct((B, m1, c1), x.dtype),
        jax.ShapeDtypeStruct((B, m2, c2), x.dtype),
        jax.ShapeDtypeStruct((B, m3, c3), x.dtype),
        jax.ShapeDtypeStruct((B, m4, c4), x.dtype),
    ]
    o1, o2, o3, o4 = pl.pallas_call(
        kernel,
        out_shape=out_shape,
        grid=(B,),
        in_specs=[
            pl.BlockSpec((1, hq, wq, ce), lambda i: (i, 0, 0, 0)),
            bcast2(w1f), bcast2(b1r),
            bcast3(g2), bcast2(w2f), bcast2(b2r),
            bcast3(g3), bcast2(w3f), bcast2(b3r),
            bcast3(g4), bcast2(w4f), bcast2(b4r),
        ],
        out_specs=[
            pl.BlockSpec((1, m1, c1), lambda i: (i, 0, 0)),
            pl.BlockSpec((1, m2, c2), lambda i: (i, 0, 0)),
            pl.BlockSpec((1, m3, c3), lambda i: (i, 0, 0)),
            pl.BlockSpec((1, m4, c4), lambda i: (i, 0, 0)),
        ],
        compiler_params=pltpu.CompilerParams(
            dimension_semantics=("parallel",),
            vmem_limit_bytes=32 * 1024 * 1024,
        ),
    )(xs2d, w1f, b1r, g2, w2f, b2r, g3, w3f, b3r, g4, w4f, b4r)

    # NHWC-flat -> NCHW only for the returned tensors.
    def to_nchw(o, hh, ww, cc):
        return jnp.transpose(o.reshape(B, hh, ww, cc), (0, 3, 1, 2))

    x1 = to_nchw(o1, ho1, wo1, c1)
    x2 = to_nchw(o2, ho2, wo2, c2)
    x3 = to_nchw(o3, ho3, wo3, c3)
    x4 = to_nchw(o4, ho4, wo4, c4)
    return (x4.reshape(B, -1), x1, x2, x3, x4)


# --------------------------------- params --------------------------------------
def init_params(key, input_size, hidden_size, output_size, dtype=jnp.float32):
    ks = jax.random.split(key, 8)

    def w(k, shape):
        return (0.05 * jax.random.normal(k, shape)).astype(dtype)

    return {
        "w1": w(ks[0], (hidden_size, input_size, 4, 4)),
        "b1": w(ks[1], (hidden_size,)),
        "w2": w(ks[2], (hidden_size * 2, hidden_size, 4, 4)),
        "b2": w(ks[3], (hidden_size * 2,)),
        "w3": w(ks[4], (hidden_size * 3, hidden_size * 2, 4, 4)),
        "b3": w(ks[5], (hidden_size * 3,)),
        "w4": w(ks[6], (output_size, hidden_size * 3, 3, 3)),
        "b4": w(ks[7], (output_size,)),
    }


# --------------------------------- reference ------------------------------------
def _ref_conv_lrelu(x, w, b, stride, pad):
    y = lax.conv_general_dilated(
        x, w, (stride, stride), [(pad, pad), (pad, pad)],
        dimension_numbers=("NCHW", "OIHW", "NCHW"))
    y = y + b[None, :, None, None]
    return jnp.where(y >= 0, y, NEG_SLOPE * y)


def _ref_forward(x, p):
    x1 = _ref_conv_lrelu(x, p["w1"], p["b1"], 2, 1)
    x2 = _ref_conv_lrelu(x1, p["w2"], p["b2"], 2, 1)
    x3 = _ref_conv_lrelu(x2, p["w3"], p["b3"], 2, 1)
    x4 = _ref_conv_lrelu(x3, p["w4"], p["b4"], 1, 0)
    return (x4.reshape(x.shape[0], -1), x1, x2, x3, x4)


# ----------------------------------- main ---------------------------------------
if __name__ == "__main__":
    key = jax.random.PRNGKey(0)
    k_x, k_p = jax.random.split(key)

    # Small shapes: batch=2, input channels=4, spatial=32 (so conv4's 3x3 valid
    # conv still has positive output size), hidden=8, output=16.
    B, C, H, W = 2, 4, 32, 32
    hidden, output = 8, 16

    x = jax.random.normal(k_x, (B, C, H, W), dtype=jnp.float32)
    params = init_params(k_p, C, hidden, output)

    outs = jax.jit(clevrer_encoder_forward)(x, params)
    outs = jax.block_until_ready(outs)

    refs = _ref_forward(x, params)
    names = ["flat", "x_1", "x_2", "x_3", "x_4"]
    for name, o, r in zip(names, outs, refs):
        assert o.shape == r.shape, (name, o.shape, r.shape)
        assert jnp.allclose(o, r, atol=1e-4, rtol=1e-4), name

    print("KERNEL_OK")
</pallas_src>

<mosaic_0001>
module attributes {stable_mosaic.version = 11 : i64} {
  func.func @kernel(%arg0: i32, %arg1: memref<1x17x17x16xf32, #tpu.memory_space<vmem>>, %arg2: memref<64x8xf32, #tpu.memory_space<vmem>>, %arg3: memref<1x8xf32, #tpu.memory_space<vmem>>, %arg4: memref<16x64x256xf32, #tpu.memory_space<vmem>>, %arg5: memref<128x16xf32, #tpu.memory_space<vmem>>, %arg6: memref<1x16xf32, #tpu.memory_space<vmem>>, %arg7: memref<16x16x64xf32, #tpu.memory_space<vmem>>, %arg8: memref<256x24xf32, #tpu.memory_space<vmem>>, %arg9: memref<1x24xf32, #tpu.memory_space<vmem>>, %arg10: memref<9x4x16xf32, #tpu.memory_space<vmem>>, %arg11: memref<216x16xf32, #tpu.memory_space<vmem>>, %arg12: memref<1x16xf32, #tpu.memory_space<vmem>>, %arg13: memref<1x256x8xf32, #tpu.memory_space<vmem>>, %arg14: memref<1x64x16xf32, #tpu.memory_space<vmem>>, %arg15: memref<1x16x24xf32, #tpu.memory_space<vmem>>, %arg16: memref<1x4x16xf32, #tpu.memory_space<vmem>>) attributes {dimension_semantics = [#tpu.dimension_semantics<parallel>], iteration_bounds = array<i64: 2>, scalar_prefetch = 0 : i64, scratch_operands = 0 : i64, tpu.core_type = #tpu.core_type<tc>, window_params = [{transform_indices = @transform_0, window_bounds = array<i64: 1, 17, 17, 16>}, {pipeline_mode = #tpu.pipeline_mode<synchronous>, transform_indices = @transform_1, window_bounds = array<i64: 64, 8>}, {pipeline_mode = #tpu.pipeline_mode<synchronous>, transform_indices = @transform_2, window_bounds = array<i64: 1, 8>}, {pipeline_mode = #tpu.pipeline_mode<synchronous>, transform_indices = @transform_3, window_bounds = array<i64: 16, 64, 256>}, {pipeline_mode = #tpu.pipeline_mode<synchronous>, transform_indices = @transform_4, window_bounds = array<i64: 128, 16>}, {pipeline_mode = #tpu.pipeline_mode<synchronous>, transform_indices = @transform_5, window_bounds = array<i64: 1, 16>}, {pipeline_mode = #tpu.pipeline_mode<synchronous>, transform_indices = @transform_6, window_bounds = array<i64: 16, 16, 64>}, {pipeline_mode = #tpu.pipeline_mode<synchronous>, transform_indices = @transform_7, window_bounds = array<i64: 256, 24>}, {pipeline_mode = #tpu.pipeline_mode<synchronous>, transform_indices = @transform_8, window_bounds = array<i64: 1, 24>}, {pipeline_mode = #tpu.pipeline_mode<synchronous>, transform_indices = @transform_9, window_bounds = array<i64: 9, 4, 16>}, {pipeline_mode = #tpu.pipeline_mode<synchronous>, transform_indices = @transform_10, window_bounds = array<i64: 216, 16>}, {pipeline_mode = #tpu.pipeline_mode<synchronous>, transform_indices = @transform_11, window_bounds = array<i64: 1, 16>}, {transform_indices = @transform_12, window_bounds = array<i64: 1, 256, 8>}, {transform_indices = @transform_13, window_bounds = array<i64: 1, 64, 16>}, {transform_indices = @transform_14, window_bounds = array<i64: 1, 16, 24>}, {transform_indices = @transform_15, window_bounds = array<i64: 1, 4, 16>}]} {
    %c0 = arith.constant 0 : index
    %c0_0 = arith.constant 0 : index
    %c0_1 = arith.constant 0 : index
    %c0_2 = arith.constant 0 : index
    %0 = vector.load %arg1[%c0, %c0_0, %c0_1, %c0_2] : memref<1x17x17x16xf32, #tpu.memory_space<vmem>>, vector<1x16x16x16xf32>
    %1 = vector.shape_cast %0 : vector<1x16x16x16xf32> to vector<16x16x16xf32>
    %2 = vector.shape_cast %1 : vector<16x16x16xf32> to vector<256x16xf32>
    %c0_3 = arith.constant 0 : index
    %c0_4 = arith.constant 0 : index
    %c1 = arith.constant 1 : index
    %c0_5 = arith.constant 0 : index
    %3 = vector.load %arg1[%c0_3, %c0_4, %c1, %c0_5] : memref<1x17x17x16xf32, #tpu.memory_space<vmem>>, vector<1x16x16x16xf32>
    %4 = vector.shape_cast %3 : vector<1x16x16x16xf32> to vector<16x16x16xf32>
    %5 = vector.shape_cast %4 : vector<16x16x16xf32> to vector<256x16xf32>
    %c0_6 = arith.constant 0 : index
    %c1_7 = arith.constant 1 : index
    %c0_8 = arith.constant 0 : index
    %c0_9 = arith.constant 0 : index
    %6 = vector.load %arg1[%c0_6, %c1_7, %c0_8, %c0_9] : memref<1x17x17x16xf32, #tpu.memory_space<vmem>>, vector<1x16x16x16xf32>
    %7 = vector.shape_cast %6 : vector<1x16x16x16xf32> to vector<16x16x16xf32>
    %8 = vector.shape_cast %7 : vector<16x16x16xf32> to vector<256x16xf32>
    %c0_10 = arith.constant 0 : index
    %c1_11 = arith.constant 1 : index
    %c1_12 = arith.constant 1 : index
    %c0_13 = arith.constant 0 : index
    %9 = vector.load %arg1[%c0_10, %c1_11, %c1_12, %c0_13] : memref<1x17x17x16xf32, #tpu.memory_space<vmem>>, vector<1x16x16x16xf32>
    %10 = vector.shape_cast %9 : vector<1x16x16x16xf32> to vector<16x16x16xf32>
    %11 = vector.shape_cast %10 : vector<16x16x16xf32> to vector<256x16xf32>
    %12 = tpu.concatenate %2, %5, %8, %11 in 1 : vector<256x16xf32>, vector<256x16xf32>, vector<256x16xf32>, vector<256x16xf32> -> vector<256x64xf32>
    %c0_14 = arith.constant 0 : index
    %c0_15 = arith.constant 0 : index
    %13 = vector.load %arg2[%c0_14, %c0_15] : memref<64x8xf32, #tpu.memory_space<vmem>>, vector<64x8xf32>
    %cst = arith.constant dense<0.000000e+00> : vector<256x8xf32>
    %14 = tpu.matmul %12, %13, %cst {dimension_numbers = #tpu.dot_dimension_numbers<[1], [0], [0], [1], [0, 0, 1, 1], [], []>} : vector<256x64xf32>, vector<64x8xf32>, vector<256x8xf32> -> vector<256x8xf32>
    %c0_16 = arith.constant 0 : index
    %c0_17 = arith.constant 0 : index
    %15 = vector.load %arg3[%c0_16, %c0_17] : memref<1x8xf32, #tpu.memory_space<vmem>>, vector<1x8xf32>
    %16 = vector.broadcast %15 : vector<1x8xf32> to vector<256x8xf32>
    %17 = arith.addf %14, %16 : vector<256x8xf32>
    %cst_18 = arith.constant 0.000000e+00 : f32
    %18 = vector.broadcast %cst_18 : f32 to vector<256x8xf32>
    %19 = arith.cmpf oge, %17, %18 : vector<256x8xf32>
    %cst_19 = arith.constant 0.00999999977 : f32
    %20 = vector.broadcast %cst_19 : f32 to vector<256x8xf32>
    %21 = arith.mulf %20, %17 : vector<256x8xf32>
    %22 = arith.select %19, %17, %21 : vector<256x8xi1>, vector<256x8xf32>
    %c0_20 = arith.constant 0 : index
    %c0_21 = arith.constant 0 : index
    %c0_22 = arith.constant 0 : index
    %23 = vector.load %arg13[%c0_20, %c0_21, %c0_22] : memref<1x256x8xf32, #tpu.memory_space<vmem>>, vector<1x256x8xf32>
    %24 = vector.shape_cast %23 : vector<1x256x8xf32> to vector<256x8xf32>
    %25 = vector.shape_cast %22 : vector<256x8xf32> to vector<1x256x8xf32>
    tpu.vector_store %arg13[%c0_20, %c0_21, %c0_22], %25 {strides = array<i32>} : memref<1x256x8xf32, #tpu.memory_space<vmem>>, vector<1x256x8xf32>,
    %c0_23 = arith.constant 0 : index
    %c0_24 = arith.constant 0 : index
    %c0_25 = arith.constant 0 : index
    %26 = vector.load %arg4[%c0_23, %c0_24, %c0_25] : memref<16x64x256xf32, #tpu.memory_space<vmem>>, vector<1x64x256xf32>
    %27 = vector.shape_cast %26 : vector<1x64x256xf32> to vector<64x256xf32>
    %cst_26 = arith.constant dense<0.000000e+00> : vector<64x8xf32>
    %28 = tpu.matmul %27, %22, %cst_26 {dimension_numbers = #tpu.dot_dimension_numbers<[1], [0], [0], [1], [0, 0, 1, 1], [], []>} : vector<64x256xf32>, vector<256x8xf32>, vector<64x8xf32> -> vector<64x8xf32>
    %c1_27 = arith.constant 1 : index
    %c0_28 = arith.constant 0 : index
    %c0_29 = arith.constant 0 : index
    %29 = vector.load %arg4[%c1_27, %c0_28, %c0_29] : memref<16x64x256xf32, #tpu.memory_space<vmem>>, vector<1x64x256xf32>
    %30 = vector.shape_cast %29 : vector<1x64x256xf32> to vector<64x256xf32>
    %cst_30 = arith.constant dense<0.000000e+00> : vector<64x8xf32>
    %31 = tpu.matmul %30, %22, %cst_30 {dimension_numbers = #tpu.dot_dimension_numbers<[1], [0], [0], [1], [0, 0, 1, 1], [], []>} : vector<64x256xf32>, vector<256x8xf32>, vector<64x8xf32> -> vector<64x8xf32>
    %c2 = arith.constant 2 : index
    %c0_31 = arith.constant 0 : index
    %c0_32 = arith.constant 0 : index
    %32 = vector.load %arg4[%c2, %c0_31, %c0_32] : memref<16x64x256xf32, #tpu.memory_space<vmem>>, vector<1x64x256xf32>
    %33 = vector.shape_cast %32 : vector<1x64x256xf32> to vector<64x256xf32>
    %cst_33 = arith.constant dense<0.000000e+00> : vector<64x8xf32>
    %34 = tpu.matmul %33, %22, %cst_33 {dimension_numbers = #tpu.dot_dimension_numbers<[1], [0], [0], [1], [0, 0, 1, 1], [], []>} : vector<64x256xf32>, vector<256x8xf32>, vector<64x8xf32> -> vector<64x8xf32>
    %c3 = arith.constant 3 : index
    %c0_34 = arith.constant 0 : index
    %c0_35 = arith.constant 0 : index
    %35 = vector.load %arg4[%c3, %c0_34, %c0_35] : memref<16x64x256xf32, #tpu.memory_space<vmem>>, vector<1x64x256xf32>
    %36 = vector.shape_cast %35 : vector<1x64x256xf32> to vector<64x256xf32>
    %cst_36 = arith.constant dense<0.000000e+00> : vector<64x8xf32>
    %37 = tpu.matmul %36, %22, %cst_36 {dimension_numbers = #tpu.dot_dimension_numbers<[1], [0], [0], [1], [0, 0, 1, 1], [], []>} : vector<64x256xf32>, vector<256x8xf32>, vector<64x8xf32> -> vector<64x8xf32>
    %c4 = arith.constant 4 : index
    %c0_37 = arith.constant 0 : index
    %c0_38 = arith.constant 0 : index
    %38 = vector.load %arg4[%c4, %c0_37, %c0_38] : memref<16x64x256xf32, #tpu.memory_space<vmem>>, vector<1x64x256xf32>
    %39 = vector.shape_cast %38 : vector<1x64x256xf32> to vector<64x256xf32>
    %cst_39 = arith.constant dense<0.000000e+00> : vector<64x8xf32>
    %40 = tpu.matmul %39, %22, %cst_39 {dimension_numbers = #tpu.dot_dimension_numbers<[1], [0], [0], [1], [0, 0, 1, 1], [], []>} : vector<64x256xf32>, vector<256x8xf32>, vector<64x8xf32> -> vector<64x8xf32>
    %c5 = arith.constant 5 : index
    %c0_40 = arith.constant 0 : index
    %c0_41 = arith.constant 0 : index
    %41 = vector.load %arg4[%c5, %c0_40, %c0_41] : memref<16x64x256xf32, #tpu.memory_space<vmem>>, vector<1x64x256xf32>
    %42 = vector.shape_cast %41 : vector<1x64x256xf32> to vector<64x256xf32>
    %cst_42 = arith.constant dense<0.000000e+00> : vector<64x8xf32>
    %43 = tpu.matmul %42, %22, %cst_42 {dimension_numbers = #tpu.dot_dimension_numbers<[1], [0], [0], [1], [0, 0, 1, 1], [], []>} : vector<64x256xf32>, vector<256x8xf32>, vector<64x8xf32> -> vector<64x8xf32>
    %c6 = arith.constant 6 : index
    %c0_43 = arith.constant 0 : index
    %c0_44 = arith.constant 0 : index
    %44 = vector.load %arg4[%c6, %c0_43, %c0_44] : memref<16x64x256xf32, #tpu.memory_space<vmem>>, vector<1x64x256xf32>
    %45 = vector.shape_cast %44 : vector<1x64x256xf32> to vector<64x256xf32>
    %cst_45 = arith.constant dense<0.000000e+00> : vector<64x8xf32>
    %46 = tpu.matmul %45, %22, %cst_45 {dimension_numbers = #tpu.dot_dimension_numbers<[1], [0], [0], [1], [0, 0, 1, 1], [], []>} : vector<64x256xf32>, vector<256x8xf32>, vector<64x8xf32> -> vector<64x8xf32>
    %c7 = arith.constant 7 : index
    %c0_46 = arith.constant 0 : index
    %c0_47 = arith.constant 0 : index
    %47 = vector.load %arg4[%c7, %c0_46, %c0_47] : memref<16x64x256xf32, #tpu.memory_space<vmem>>, vector<1x64x256xf32>
    %48 = vector.shape_cast %47 : vector<1x64x256xf32> to vector<64x256xf32>
    %cst_48 = arith.constant dense<0.000000e+00> : vector<64x8xf32>
    %49 = tpu.matmul %48, %22, %cst_48 {dimension_numbers = #tpu.dot_dimension_numbers<[1], [0], [0], [1], [0, 0, 1, 1], [], []>} : vector<64x256xf32>, vector<256x8xf32>, vector<64x8xf32> -> vector<64x8xf32>
    %c8 = arith.constant 8 : index
    %c0_49 = arith.constant 0 : index
    %c0_50 = arith.constant 0 : index
    %50 = vector.load %arg4[%c8, %c0_49, %c0_50] : memref<16x64x256xf32, #tpu.memory_space<vmem>>, vector<1x64x256xf32>
    %51 = vector.shape_cast %50 : vector<1x64x256xf32> to vector<64x256xf32>
    %cst_51 = arith.constant dense<0.000000e+00> : vector<64x8xf32>
    %52 = tpu.matmul %51, %22, %cst_51 {dimension_numbers = #tpu.dot_dimension_numbers<[1], [0], [0], [1], [0, 0, 1, 1], [], []>} : vector<64x256xf32>, vector<256x8xf32>, vector<64x8xf32> -> vector<64x8xf32>
    %c9 = arith.constant 9 : index
    %c0_52 = arith.constant 0 : index
    %c0_53 = arith.constant 0 : index
    %53 = vector.load %arg4[%c9, %c0_52, %c0_53] : memref<16x64x256xf32, #tpu.memory_space<vmem>>, vector<1x64x256xf32>
    %54 = vector.shape_cast %53 : vector<1x64x256xf32> to vector<64x256xf32>
    %cst_54 = arith.constant dense<0.000000e+00> : vector<64x8xf32>
    %55 = tpu.matmul %54, %22, %cst_54 {dimension_numbers = #tpu.dot_dimension_numbers<[1], [0], [0], [1], [0, 0, 1, 1], [], []>} : vector<64x256xf32>, vector<256x8xf32>, vector<64x8xf32> -> vector<64x8xf32>
    %c10 = arith.constant 10 : index
    %c0_55 = arith.constant 0 : index
    %c0_56 = arith.constant 0 : index
    %56 = vector.load %arg4[%c10, %c0_55, %c0_56] : memref<16x64x256xf32, #tpu.memory_space<vmem>>, vector<1x64x256xf32>
    %57 = vector.shape_cast %56 : vector<1x64x256xf32> to vector<64x256xf32>
    %cst_57 = arith.constant dense<0.000000e+00> : vector<64x8xf32>
    %58 = tpu.matmul %57, %22, %cst_57 {dimension_numbers = #tpu.dot_dimension_numbers<[1], [0], [0], [1], [0, 0, 1, 1], [], []>} : vector<64x256xf32>, vector<256x8xf32>, vector<64x8xf32> -> vector<64x8xf32>
    %c11 = arith.constant 11 : index
    %c0_58 = arith.constant 0 : index
    %c0_59 = arith.constant 0 : index
    %59 = vector.load %arg4[%c11, %c0_58, %c0_59] : memref<16x64x256xf32, #tpu.memory_space<vmem>>, vector<1x64x256xf32>
    %60 = vector.shape_cast %59 : vector<1x64x256xf32> to vector<64x256xf32>
    %cst_60 = arith.constant dense<0.000000e+00> : vector<64x8xf32>
    %61 = tpu.matmul %60, %22, %cst_60 {dimension_numbers = #tpu.dot_dimension_numbers<[1], [0], [0], [1], [0, 0, 1, 1], [], []>} : vector<64x256xf32>, vector<256x8xf32>, vector<64x8xf32> -> vector<64x8xf32>
    %c12 = arith.constant 12 : index
    %c0_61 = arith.constant 0 : index
    %c0_62 = arith.constant 0 : index
    %62 = vector.load %arg4[%c12, %c0_61, %c0_62] : memref<16x64x256xf32, #tpu.memory_space<vmem>>, vector<1x64x256xf32>
    %63 = vector.shape_cast %62 : vector<1x64x256xf32> to vector<64x256xf32>
    %cst_63 = arith.constant dense<0.000000e+00> : vector<64x8xf32>
    %64 = tpu.matmul %63, %22, %cst_63 {dimension_numbers = #tpu.dot_dimension_numbers<[1], [0], [0], [1], [0, 0, 1, 1], [], []>} : vector<64x256xf32>, vector<256x8xf32>, vector<64x8xf32> -> vector<64x8xf32>
    %c13 = arith.constant 13 : index
    %c0_64 = arith.constant 0 : index
    %c0_65 = arith.constant 0 : index
    %65 = vector.load %arg4[%c13, %c0_64, %c0_65] : memref<16x64x256xf32, #tpu.memory_space<vmem>>, vector<1x64x256xf32>
    %66 = vector.shape_cast %65 : vector<1x64x256xf32> to vector<64x256xf32>
    %cst_66 = arith.constant dense<0.000000e+00> : vector<64x8xf32>
    %67 = tpu.matmul %66, %22, %cst_66 {dimension_numbers = #tpu.dot_dimension_numbers<[1], [0], [0], [1], [0, 0, 1, 1], [], []>} : vector<64x256xf32>, vector<256x8xf32>, vector<64x8xf32> -> vector<64x8xf32>
    %c14 = arith.constant 14 : index
    %c0_67 = arith.constant 0 : index
    %c0_68 = arith.constant 0 : index
    %68 = vector.load %arg4[%c14, %c0_67, %c0_68] : memref<16x64x256xf32, #tpu.memory_space<vmem>>, vector<1x64x256xf32>
    %69 = vector.shape_cast %68 : vector<1x64x256xf32> to vector<64x256xf32>
    %cst_69 = arith.constant dense<0.000000e+00> : vector<64x8xf32>
    %70 = tpu.matmul %69, %22, %cst_69 {dimension_numbers = #tpu.dot_dimension_numbers<[1], [0], [0], [1], [0, 0, 1, 1], [], []>} : vector<64x256xf32>, vector<256x8xf32>, vector<64x8xf32> -> vector<64x8xf32>
    %c15 = arith.constant 15 : index
    %c0_70 = arith.constant 0 : index
    %c0_71 = arith.constant 0 : index
    %71 = vector.load %arg4[%c15, %c0_70, %c0_71] : memref<16x64x256xf32, #tpu.memory_space<vmem>>, vector<1x64x256xf32>
    %72 = vector.shape_cast %71 : vector<1x64x256xf32> to vector<64x256xf32>
    %cst_72 = arith.constant dense<0.000000e+00> : vector<64x8xf32>
    %73 = tpu.matmul %72, %22, %cst_72 {dimension_numbers = #tpu.dot_dimension_numbers<[1], [0], [0], [1], [0, 0, 1, 1], [], []>} : vector<64x256xf32>, vector<256x8xf32>, vector<64x8xf32> -> vector<64x8xf32>
    %74 = tpu.concatenate %28, %31, %34, %37, %40, %43, %46, %49, %52, %55, %58, %61, %64, %67, %70, %73 in 1 : vector<64x8xf32>, vector<64x8xf32>, vector<64x8xf32>, vector<64x8xf32>, vector<64x8xf32>, vector<64x8xf32>, vector<64x8xf32>, vector<64x8xf32>, vector<64x8xf32>, vector<64x8xf32>, vector<64x8xf32>, vector<64x8xf32>, vector<64x8xf32>, vector<64x8xf32>, vector<64x8xf32>, vector<64x8xf32> -> vector<64x128xf32>
    %c0_73 = arith.constant 0 : index
    %c0_74 = arith.constant 0 : index
    %75 = vector.load %arg5[%c0_73, %c0_74] : memref<128x16xf32, #tpu.memory_space<vmem>>, vector<128x16xf32>
    %cst_75 = arith.constant dense<0.000000e+00> : vector<64x16xf32>
    %76 = tpu.matmul %74, %75, %cst_75 {dimension_numbers = #tpu.dot_dimension_numbers<[1], [0], [0], [1], [0, 0, 1, 1], [], []>} : vector<64x128xf32>, vector<128x16xf32>, vector<64x16xf32> -> vector<64x16xf32>
    %c0_76 = arith.constant 0 : index
    %c0_77 = arith.constant 0 : index
    %77 = vector.load %arg6[%c0_76, %c0_77] : memref<1x16xf32, #tpu.memory_space<vmem>>, vector<1x16xf32>
    %78 = vector.broadcast %77 : vector<1x16xf32> to vector<64x16xf32>
    %79 = arith.addf %76, %78 : vector<64x16xf32>
    %cst_78 = arith.constant 0.000000e+00 : f32
    %80 = vector.broadcast %cst_78 : f32 to vector<64x16xf32>
    %81 = arith.cmpf oge, %79, %80 : vector<64x16xf32>
    %cst_79 = arith.constant 0.00999999977 : f32
    %82 = vector.broadcast %cst_79 : f32 to vector<64x16xf32>
    %83 = arith.mulf %82, %79 : vector<64x16xf32>
    %84 = arith.select %81, %79, %83 : vector<64x16xi1>, vector<64x16xf32>
    %c0_80 = arith.constant 0 : index
    %c0_81 = arith.constant 0 : index
    %c0_82 = arith.constant 0 : index
    %85 = vector.load %arg14[%c0_80, %c0_81, %c0_82] : memref<1x64x16xf32, #tpu.memory_space<vmem>>, vector<1x64x16xf32>
    %86 = vector.shape_cast %85 : vector<1x64x16xf32> to vector<64x16xf32>
    %87 = vector.shape_cast %84 : vector<64x16xf32> to vector<1x64x16xf32>
    tpu.vector_store %arg14[%c0_80, %c0_81, %c0_82], %87 {strides = array<i32>} : memref<1x64x16xf32, #tpu.memory_space<vmem>>, vector<1x64x16xf32>,
    %c0_83 = arith.constant 0 : index
    %c0_84 = arith.constant 0 : index
    %c0_85 = arith.constant 0 : index
    %88 = vector.load %arg7[%c0_83, %c0_84, %c0_85] : memref<16x16x64xf32, #tpu.memory_space<vmem>>, vector<1x16x64xf32>
    %89 = vector.shape_cast %88 : vector<1x16x64xf32> to vector<16x64xf32>
    %cst_86 = arith.constant dense<0.000000e+00> : vector<16x16xf32>
    %90 = tpu.matmul %89, %84, %cst_86 {dimension_numbers = #tpu.dot_dimension_numbers<[1], [0], [0], [1], [0, 0, 1, 1], [], []>} : vector<16x64xf32>, vector<64x16xf32>, vector<16x16xf32> -> vector<16x16xf32>
    %c1_87 = arith.constant 1 : index
    %c0_88 = arith.constant 0 : index
    %c0_89 = arith.constant 0 : index
    %91 = vector.load %arg7[%c1_87, %c0_88, %c0_89] : memref<16x16x64xf32, #tpu.memory_space<vmem>>, vector<1x16x64xf32>
    %92 = vector.shape_cast %91 : vector<1x16x64xf32> to vector<16x64xf32>
    %cst_90 = arith.constant dense<0.000000e+00> : vector<16x16xf32>
    %93 = tpu.matmul %92, %84, %cst_90 {dimension_numbers = #tpu.dot_dimension_numbers<[1], [0], [0], [1], [0, 0, 1, 1], [], []>} : vector<16x64xf32>, vector<64x16xf32>, vector<16x16xf32> -> vector<16x16xf32>
    %c2_91 = arith.constant 2 : index
    %c0_92 = arith.constant 0 : index
    %c0_93 = arith.constant 0 : index
    %94 = vector.load %arg7[%c2_91, %c0_92, %c0_93] : memref<16x16x64xf32, #tpu.memory_space<vmem>>, vector<1x16x64xf32>
    %95 = vector.shape_cast %94 : vector<1x16x64xf32> to vector<16x64xf32>
    %cst_94 = arith.constant dense<0.000000e+00> : vector<16x16xf32>
    %96 = tpu.matmul %95, %84, %cst_94 {dimension_numbers = #tpu.dot_dimension_numbers<[1], [0], [0], [1], [0, 0, 1, 1], [], []>} : vector<16x64xf32>, vector<64x16xf32>, vector<16x16xf32> -> vector<16x16xf32>
    %c3_95 = arith.constant 3 : index
    %c0_96 = arith.constant 0 : index
    %c0_97 = arith.constant 0 : index
    %97 = vector.load %arg7[%c3_95, %c0_96, %c0_97] : memref<16x16x64xf32, #tpu.memory_space<vmem>>, vector<1x16x64xf32>
    %98 = vector.shape_cast %97 : vector<1x16x64xf32> to vector<16x64xf32>
    %cst_98 = arith.constant dense<0.000000e+00> : vector<16x16xf32>
    %99 = tpu.matmul %98, %84, %cst_98 {dimension_numbers = #tpu.dot_dimension_numbers<[1], [0], [0], [1], [0, 0, 1, 1], [], []>} : vector<16x64xf32>, vector<64x16xf32>, vector<16x16xf32> -> vector<16x16xf32>
    %c4_99 = arith.constant 4 : index
    %c0_100 = arith.constant 0 : index
    %c0_101 = arith.constant 0 : index
    %100 = vector.load %arg7[%c4_99, %c0_100, %c0_101] : memref<16x16x64xf32, #tpu.memory_space<vmem>>, vector<1x16x64xf32>
    %101 = vector.shape_cast %100 : vector<1x16x64xf32> to vector<16x64xf32>
    %cst_102 = arith.constant dense<0.000000e+00> : vector<16x16xf32>
    %102 = tpu.matmul %101, %84, %cst_102 {dimension_numbers = #tpu.dot_dimension_numbers<[1], [0], [0], [1], [0, 0, 1, 1], [], []>} : vector<16x64xf32>, vector<64x16xf32>, vector<16x16xf32> -> vector<16x16xf32>
    %c5_103 = arith.constant 5 : index
    %c0_104 = arith.constant 0 : index
    %c0_105 = arith.constant 0 : index
    %103 = vector.load %arg7[%c5_103, %c0_104, %c0_105] : memref<16x16x64xf32, #tpu.memory_space<vmem>>, vector<1x16x64xf32>
    %104 = vector.shape_cast %103 : vector<1x16x64xf32> to vector<16x64xf32>
    %cst_106 = arith.constant dense<0.000000e+00> : vector<16x16xf32>
    %105 = tpu.matmul %104, %84, %cst_106 {dimension_numbers = #tpu.dot_dimension_numbers<[1], [0], [0], [1], [0, 0, 1, 1], [], []>} : vector<16x64xf32>, vector<64x16xf32>, vector<16x16xf32> -> vector<16x16xf32>
    %c6_107 = arith.constant 6 : index
    %c0_108 = arith.constant 0 : index
    %c0_109 = arith.constant 0 : index
    %106 = vector.load %arg7[%c6_107, %c0_108, %c0_109] : memref<16x16x64xf32, #tpu.memory_space<vmem>>, vector<1x16x64xf32>
    %107 = vector.shape_cast %106 : vector<1x16x64xf32> to vector<16x64xf32>
    %cst_110 = arith.constant dense<0.000000e+00> : vector<16x16xf32>
    %108 = tpu.matmul %107, %84, %cst_110 {dimension_numbers = #tpu.dot_dimension_numbers<[1], [0], [0], [1], [0, 0, 1, 1], [], []>} : vector<16x64xf32>, vector<64x16xf32>, vector<16x16xf32> -> vector<16x16xf32>
    %c7_111 = arith.constant 7 : index
    %c0_112 = arith.constant 0 : index
    %c0_113 = arith.constant 0 : index
    %109 = vector.load %arg7[%c7_111, %c0_112, %c0_113] : memref<16x16x64xf32, #tpu.memory_space<vmem>>, vector<1x16x64xf32>
    %110 = vector.shape_cast %109 : vector<1x16x64xf32> to vector<16x64xf32>
    %cst_114 = arith.constant dense<0.000000e+00> : vector<16x16xf32>
    %111 = tpu.matmul %110, %84, %cst_114 {dimension_numbers = #tpu.dot_dimension_numbers<[1], [0], [0], [1], [0, 0, 1, 1], [], []>} : vector<16x64xf32>, vector<64x16xf32>, vector<16x16xf32> -> vector<16x16xf32>
    %c8_115 = arith.constant 8 : index
    %c0_116 = arith.constant 0 : index
    %c0_117 = arith.constant 0 : index
    %112 = vector.load %arg7[%c8_115, %c0_116, %c0_117] : memref<16x16x64xf32, #tpu.memory_space<vmem>>, vector<1x16x64xf32>
    %113 = vector.shape_cast %112 : vector<1x16x64xf32> to vector<16x64xf32>
    %cst_118 = arith.constant dense<0.000000e+00> : vector<16x16xf32>
    %114 = tpu.matmul %113, %84, %cst_118 {dimension_numbers = #tpu.dot_dimension_numbers<[1], [0], [0], [1], [0, 0, 1, 1], [], []>} : vector<16x64xf32>, vector<64x16xf32>, vector<16x16xf32> -> vector<16x16xf32>
    %c9_119 = arith.constant 9 : index
    %c0_120 = arith.constant 0 : index
    %c0_121 = arith.constant 0 : index
    %115 = vector.load %arg7[%c9_119, %c0_120, %c0_121] : memref<16x16x64xf32, #tpu.memory_space<vmem>>, vector<1x16x64xf32>
    %116 = vector.shape_cast %115 : vector<1x16x64xf32> to vector<16x64xf32>
    %cst_122 = arith.constant dense<0.000000e+00> : vector<16x16xf32>
    %117 = tpu.matmul %116, %84, %cst_122 {dimension_numbers = #tpu.dot_dimension_numbers<[1], [0], [0], [1], [0, 0, 1, 1], [], []>} : vector<16x64xf32>, vector<64x16xf32>, vector<16x16xf32> -> vector<16x16xf32>
    %c10_123 = arith.constant 10 : index
    %c0_124 = arith.constant 0 : index
    %c0_125 = arith.constant 0 : index
    %118 = vector.load %arg7[%c10_123, %c0_124, %c0_125] : memref<16x16x64xf32, #tpu.memory_space<vmem>>, vector<1x16x64xf32>
    %119 = vector.shape_cast %118 : vector<1x16x64xf32> to vector<16x64xf32>
    %cst_126 = arith.constant dense<0.000000e+00> : vector<16x16xf32>
    %120 = tpu.matmul %119, %84, %cst_126 {dimension_numbers = #tpu.dot_dimension_numbers<[1], [0], [0], [1], [0, 0, 1, 1], [], []>} : vector<16x64xf32>, vector<64x16xf32>, vector<16x16xf32> -> vector<16x16xf32>
    %c11_127 = arith.constant 11 : index
    %c0_128 = arith.constant 0 : index
    %c0_129 = arith.constant 0 : index
    %121 = vector.load %arg7[%c11_127, %c0_128, %c0_129] : memref<16x16x64xf32, #tpu.memory_space<vmem>>, vector<1x16x64xf32>
    %122 = vector.shape_cast %121 : vector<1x16x64xf32> to vector<16x64xf32>
    %cst_130 = arith.constant dense<0.000000e+00> : vector<16x16xf32>
    %123 = tpu.matmul %122, %84, %cst_130 {dimension_numbers = #tpu.dot_dimension_numbers<[1], [0], [0], [1], [0, 0, 1, 1], [], []>} : vector<16x64xf32>, vector<64x16xf32>, vector<16x16xf32> -> vector<16x16xf32>
    %c12_131 = arith.constant 12 : index
    %c0_132 = arith.constant 0 : index
    %c0_133 = arith.constant 0 : index
    %124 = vector.load %arg7[%c12_131, %c0_132, %c0_133] : memref<16x16x64xf32, #tpu.memory_space<vmem>>, vector<1x16x64xf32>
    %125 = vector.shape_cast %124 : vector<1x16x64xf32> to vector<16x64xf32>
    %cst_134 = arith.constant dense<0.000000e+00> : vector<16x16xf32>
    %126 = tpu.matmul %125, %84, %cst_134 {dimension_numbers = #tpu.dot_dimension_numbers<[1], [0], [0], [1], [0, 0, 1, 1], [], []>} : vector<16x64xf32>, vector<64x16xf32>, vector<16x16xf32> -> vector<16x16xf32>
    %c13_135 = arith.constant 13 : index
    %c0_136 = arith.constant 0 : index
    %c0_137 = arith.constant 0 : index
    %127 = vector.load %arg7[%c13_135, %c0_136, %c0_137] : memref<16x16x64xf32, #tpu.memory_space<vmem>>, vector<1x16x64xf32>
    %128 = vector.shape_cast %127 : vector<1x16x64xf32> to vector<16x64xf32>
    %cst_138 = arith.constant dense<0.000000e+00> : vector<16x16xf32>
    %129 = tpu.matmul %128, %84, %cst_138 {dimension_numbers = #tpu.dot_dimension_numbers<[1], [0], [0], [1], [0, 0, 1, 1], [], []>} : vector<16x64xf32>, vector<64x16xf32>, vector<16x16xf32> -> vector<16x16xf32>
    %c14_139 = arith.constant 14 : index
    %c0_140 = arith.constant 0 : index
    %c0_141 = arith.constant 0 : index
    %130 = vector.load %arg7[%c14_139, %c0_140, %c0_141] : memref<16x16x64xf32, #tpu.memory_space<vmem>>, vector<1x16x64xf32>
    %131 = vector.shape_cast %130 : vector<1x16x64xf32> to vector<16x64xf32>
    %cst_142 = arith.constant dense<0.000000e+00> : vector<16x16xf32>
    %132 = tpu.matmul %131, %84, %cst_142 {dimension_numbers = #tpu.dot_dimension_numbers<[1], [0], [0], [1], [0, 0, 1, 1], [], []>} : vector<16x64xf32>, vector<64x16xf32>, vector<16x16xf32> -> vector<16x16xf32>
    %c15_143 = arith.constant 15 : index
    %c0_144 = arith.constant 0 : index
    %c0_145 = arith.constant 0 : index
    %133 = vector.load %arg7[%c15_143, %c0_144, %c0_145] : memref<16x16x64xf32, #tpu.memory_space<vmem>>, vector<1x16x64xf32>
    %134 = vector.shape_cast %133 : vector<1x16x64xf32> to vector<16x64xf32>
    %cst_146 = arith.constant dense<0.000000e+00> : vector<16x16xf32>
    %135 = tpu.matmul %134, %84, %cst_146 {dimension_numbers = #tpu.dot_dimension_numbers<[1], [0], [0], [1], [0, 0, 1, 1], [], []>} : vector<16x64xf32>, vector<64x16xf32>, vector<16x16xf32> -> vector<16x16xf32>
    %136 = tpu.concatenate %90, %93, %96, %99, %102, %105, %108, %111, %114, %117, %120, %123, %126, %129, %132, %135 in 1 : vector<16x16xf32>, vector<16x16xf32>, vector<16x16xf32>, vector<16x16xf32>, vector<16x16xf32>, vector<16x16xf32>, vector<16x16xf32>, vector<16x16xf32>, vector<16x16xf32>, vector<16x16xf32>, vector<16x16xf32>, vector<16x16xf32>, vector<16x16xf32>, vector<16x16xf32>, vector<16x16xf32>, vector<16x16xf32> -> vector<16x256xf32>
    %c0_147 = arith.constant 0 : index
    %c0_148 = arith.constant 0 : index
    %137 = vector.load %arg8[%c0_147, %c0_148] : memref<256x24xf32, #tpu.memory_space<vmem>>, vector<256x24xf32>
    %cst_149 = arith.constant dense<0.000000e+00> : vector<16x24xf32>
    %138 = tpu.matmul %136, %137, %cst_149 {dimension_numbers = #tpu.dot_dimension_numbers<[1], [0], [0], [1], [0, 0, 1, 1], [], []>} : vector<16x256xf32>, vector<256x24xf32>, vector<16x24xf32> -> vector<16x24xf32>
    %c0_150 = arith.constant 0 : index
    %c0_151 = arith.constant 0 : index
    %139 = vector.load %arg9[%c0_150, %c0_151] : memref<1x24xf32, #tpu.memory_space<vmem>>, vector<1x24xf32>
    %140 = vector.broadcast %139 : vector<1x24xf32> to vector<16x24xf32>
    %141 = arith.addf %138, %140 : vector<16x24xf32>
    %cst_152 = arith.constant 0.000000e+00 : f32
    %142 = vector.broadcast %cst_152 : f32 to vector<16x24xf32>
    %143 = arith.cmpf oge, %141, %142 : vector<16x24xf32>
    %cst_153 = arith.constant 0.00999999977 : f32
    %144 = vector.broadcast %cst_153 : f32 to vector<16x24xf32>
    %145 = arith.mulf %144, %141 : vector<16x24xf32>
    %146 = arith.select %143, %141, %145 : vector<16x24xi1>, vector<16x24xf32>
    %c0_154 = arith.constant 0 : index
    %c0_155 = arith.constant 0 : index
    %c0_156 = arith.constant 0 : index
    %147 = vector.load %arg15[%c0_154, %c0_155, %c0_156] : memref<1x16x24xf32, #tpu.memory_space<vmem>>, vector<1x16x24xf32>
    %148 = vector.shape_cast %147 : vector<1x16x24xf32> to vector<16x24xf32>
    %149 = vector.shape_cast %146 : vector<16x24xf32> to vector<1x16x24xf32>
    tpu.vector_store %arg15[%c0_154, %c0_155, %c0_156], %149 {strides = array<i32>} : memref<1x16x24xf32, #tpu.memory_space<vmem>>, vector<1x16x24xf32>,
    %c0_157 = arith.constant 0 : index
    %c0_158 = arith.constant 0 : index
    %c0_159 = arith.constant 0 : index
    %150 = vector.load %arg10[%c0_157, %c0_158, %c0_159] : memref<9x4x16xf32, #tpu.memory_space<vmem>>, vector<1x4x16xf32>
    %151 = vector.shape_cast %150 : vector<1x4x16xf32> to vector<4x16xf32>
    %cst_160 = arith.constant dense<0.000000e+00> : vector<4x24xf32>
    %152 = tpu.matmul %151, %146, %cst_160 {dimension_numbers = #tpu.dot_dimension_numbers<[1], [0], [0], [1], [0, 0, 1, 1], [], []>} : vector<4x16xf32>, vector<16x24xf32>, vector<4x24xf32> -> vector<4x24xf32>
    %c1_161 = arith.constant 1 : index
    %c0_162 = arith.constant 0 : index
    %c0_163 = arith.constant 0 : index
    %153 = vector.load %arg10[%c1_161, %c0_162, %c0_163] : memref<9x4x16xf32, #tpu.memory_space<vmem>>, vector<1x4x16xf32>
    %154 = vector.shape_cast %153 : vector<1x4x16xf32> to vector<4x16xf32>
    %cst_164 = arith.constant dense<0.000000e+00> : vector<4x24xf32>
    %155 = tpu.matmul %154, %146, %cst_164 {dimension_numbers = #tpu.dot_dimension_numbers<[1], [0], [0], [1], [0, 0, 1, 1], [], []>} : vector<4x16xf32>, vector<16x24xf32>, vector<4x24xf32> -> vector<4x24xf32>
    %c2_165 = arith.constant 2 : index
    %c0_166 = arith.constant 0 : index
    %c0_167 = arith.constant 0 : index
    %156 = vector.load %arg10[%c2_165, %c0_166, %c0_167] : memref<9x4x16xf32, #tpu.memory_space<vmem>>, vector<1x4x16xf32>
    %157 = vector.shape_cast %156 : vector<1x4x16xf32> to vector<4x16xf32>
    %cst_168 = arith.constant dense<0.000000e+00> : vector<4x24xf32>
    %158 = tpu.matmul %157, %146, %cst_168 {dimension_numbers = #tpu.dot_dimension_numbers<[1], [0], [0], [1], [0, 0, 1, 1], [], []>} : vector<4x16xf32>, vector<16x24xf32>, vector<4x24xf32> -> vector<4x24xf32>
    %c3_169 = arith.constant 3 : index
    %c0_170 = arith.constant 0 : index
    %c0_171 = arith.constant 0 : index
    %159 = vector.load %arg10[%c3_169, %c0_170, %c0_171] : memref<9x4x16xf32, #tpu.memory_space<vmem>>, vector<1x4x16xf32>
    %160 = vector.shape_cast %159 : vector<1x4x16xf32> to vector<4x16xf32>
    %cst_172 = arith.constant dense<0.000000e+00> : vector<4x24xf32>
    %161 = tpu.matmul %160, %146, %cst_172 {dimension_numbers = #tpu.dot_dimension_numbers<[1], [0], [0], [1], [0, 0, 1, 1], [], []>} : vector<4x16xf32>, vector<16x24xf32>, vector<4x24xf32> -> vector<4x24xf32>
    %c4_173 = arith.constant 4 : index
    %c0_174 = arith.constant 0 : index
    %c0_175 = arith.constant 0 : index
    %162 = vector.load %arg10[%c4_173, %c0_174, %c0_175] : memref<9x4x16xf32, #tpu.memory_space<vmem>>, vector<1x4x16xf32>
    %163 = vector.shape_cast %162 : vector<1x4x16xf32> to vector<4x16xf32>
    %cst_176 = arith.constant dense<0.000000e+00> : vector<4x24xf32>
    %164 = tpu.matmul %163, %146, %cst_176 {dimension_numbers = #tpu.dot_dimension_numbers<[1], [0], [0], [1], [0, 0, 1, 1], [], []>} : vector<4x16xf32>, vector<16x24xf32>, vector<4x24xf32> -> vector<4x24xf32>
    %c5_177 = arith.constant 5 : index
    %c0_178 = arith.constant 0 : index
    %c0_179 = arith.constant 0 : index
    %165 = vector.load %arg10[%c5_177, %c0_178, %c0_179] : memref<9x4x16xf32, #tpu.memory_space<vmem>>, vector<1x4x16xf32>
    %166 = vector.shape_cast %165 : vector<1x4x16xf32> to vector<4x16xf32>
    %cst_180 = arith.constant dense<0.000000e+00> : vector<4x24xf32>
    %167 = tpu.matmul %166, %146, %cst_180 {dimension_numbers = #tpu.dot_dimension_numbers<[1], [0], [0], [1], [0, 0, 1, 1], [], []>} : vector<4x16xf32>, vector<16x24xf32>, vector<4x24xf32> -> vector<4x24xf32>
    %c6_181 = arith.constant 6 : index
    %c0_182 = arith.constant 0 : index
    %c0_183 = arith.constant 0 : index
    %168 = vector.load %arg10[%c6_181, %c0_182, %c0_183] : memref<9x4x16xf32, #tpu.memory_space<vmem>>, vector<1x4x16xf32>
    %169 = vector.shape_cast %168 : vector<1x4x16xf32> to vector<4x16xf32>
    %cst_184 = arith.constant dense<0.000000e+00> : vector<4x24xf32>
    %170 = tpu.matmul %169, %146, %cst_184 {dimension_numbers = #tpu.dot_dimension_numbers<[1], [0], [0], [1], [0, 0, 1, 1], [], []>} : vector<4x16xf32>, vector<16x24xf32>, vector<4x24xf32> -> vector<4x24xf32>
    %c7_185 = arith.constant 7 : index
    %c0_186 = arith.constant 0 : index
    %c0_187 = arith.constant 0 : index
    %171 = vector.load %arg10[%c7_185, %c0_186, %c0_187] : memref<9x4x16xf32, #tpu.memory_space<vmem>>, vector<1x4x16xf32>
    %172 = vector.shape_cast %171 : vector<1x4x16xf32> to vector<4x16xf32>
    %cst_188 = arith.constant dense<0.000000e+00> : vector<4x24xf32>
    %173 = tpu.matmul %172, %146, %cst_188 {dimension_numbers = #tpu.dot_dimension_numbers<[1], [0], [0], [1], [0, 0, 1, 1], [], []>} : vector<4x16xf32>, vector<16x24xf32>, vector<4x24xf32> -> vector<4x24xf32>
    %c8_189 = arith.constant 8 : index
    %c0_190 = arith.constant 0 : index
    %c0_191 = arith.constant 0 : index
    %174 = vector.load %arg10[%c8_189, %c0_190, %c0_191] : memref<9x4x16xf32, #tpu.memory_space<vmem>>, vector<1x4x16xf32>
    %175 = vector.shape_cast %174 : vector<1x4x16xf32> to vector<4x16xf32>
    %cst_192 = arith.constant dense<0.000000e+00> : vector<4x24xf32>
    %176 = tpu.matmul %175, %146, %cst_192 {dimension_numbers = #tpu.dot_dimension_numbers<[1], [0], [0], [1], [0, 0, 1, 1], [], []>} : vector<4x16xf32>, vector<16x24xf32>, vector<4x24xf32> -> vector<4x24xf32>
    %177 = tpu.concatenate %152, %155, %158, %161, %164, %167, %170, %173, %176 in 1 : vector<4x24xf32>, vector<4x24xf32>, vector<4x24xf32>, vector<4x24xf32>, vector<4x24xf32>, vector<4x24xf32>, vector<4x24xf32>, vector<4x24xf32>, vector<4x24xf32> -> vector<4x216xf32>
    %c0_193 = arith.constant 0 : index
    %c0_194 = arith.constant 0 : index
    %178 = vector.load %arg11[%c0_193, %c0_194] : memref<216x16xf32, #tpu.memory_space<vmem>>, vector<216x16xf32>
    %cst_195 = arith.constant dense<0.000000e+00> : vector<4x16xf32>
    %179 = tpu.matmul %177, %178, %cst_195 {dimension_numbers = #tpu.dot_dimension_numbers<[1], [0], [0], [1], [0, 0, 1, 1], [], []>} : vector<4x216xf32>, vector<216x16xf32>, vector<4x16xf32> -> vector<4x16xf32>
    %c0_196 = arith.constant 0 : index
    %c0_197 = arith.constant 0 : index
    %180 = vector.load %arg12[%c0_196, %c0_197] : memref<1x16xf32, #tpu.memory_space<vmem>>, vector<1x16xf32>
    %181 = vector.broadcast %180 : vector<1x16xf32> to vector<4x16xf32>
    %182 = arith.addf %179, %181 : vector<4x16xf32>
    %cst_198 = arith.constant 0.000000e+00 : f32
    %183 = vector.broadcast %cst_198 : f32 to vector<4x16xf32>
    %184 = arith.cmpf oge, %182, %183 : vector<4x16xf32>
    %cst_199 = arith.constant 0.00999999977 : f32
    %185 = vector.broadcast %cst_199 : f32 to vector<4x16xf32>
    %186 = arith.mulf %185, %182 : vector<4x16xf32>
    %187 = arith.select %184, %182, %186 : vector<4x16xi1>, vector<4x16xf32>
    %c0_200 = arith.constant 0 : index
    %c0_201 = arith.constant 0 : index
    %c0_202 = arith.constant 0 : index
    %188 = vector.load %arg16[%c0_200, %c0_201, %c0_202] : memref<1x4x16xf32, #tpu.memory_space<vmem>>, vector<1x4x16xf32>
    %189 = vector.shape_cast %188 : vector<1x4x16xf32> to vector<4x16xf32>
    %190 = vector.shape_cast %187 : vector<4x16xf32> to vector<1x4x16xf32>
    tpu.vector_store %arg16[%c0_200, %c0_201, %c0_202], %190 {strides = array<i32>} : memref<1x4x16xf32, #tpu.memory_space<vmem>>, vector<1x4x16xf32>,
    return
  }
  func.func @transform_0(%arg0: i32) -> (i32, i32, i32, i32) {
    %c0_i32 = arith.constant 0 : i32
    %c0_i32_0 = arith.constant 0 : i32
    %c0_i32_1 = arith.constant 0 : i32
    %c0_i32_2 = arith.constant 0 : i32
    return %arg0, %c0_i32, %c0_i32_0, %c0_i32_1 : i32, i32, i32, i32
  }
  func.func @transform_1(%arg0: i32) -> (i32, i32) {
    %c0_i32 = arith.constant 0 : i32
    %c0_i32_0 = arith.constant 0 : i32
    %c0_i32_1 = arith.constant 0 : i32
    return %c0_i32, %c0_i32_0 : i32, i32
  }
  func.func @transform_2(%arg0: i32) -> (i32, i32) {
    %c0_i32 = arith.constant 0 : i32
    %c0_i32_0 = arith.constant 0 : i32
    %c0_i32_1 = arith.constant 0 : i32
    return %c0_i32, %c0_i32_0 : i32, i32
  }
  func.func @transform_3(%arg0: i32) -> (i32, i32, i32) {
    %c0_i32 = arith.constant 0 : i32
    %c0_i32_0 = arith.constant 0 : i32
    %c0_i32_1 = arith.constant 0 : i32
    %c0_i32_2 = arith.constant 0 : i32
    return %c0_i32, %c0_i32_0, %c0_i32_1 : i32, i32, i32
  }
  func.func @transform_4(%arg0: i32) -> (i32, i32) {
    %c0_i32 = arith.constant 0 : i32
    %c0_i32_0 = arith.constant 0 : i32
    %c0_i32_1 = arith.constant 0 : i32
    return %c0_i32, %c0_i32_0 : i32, i32
  }
  func.func @transform_5(%arg0: i32) -> (i32, i32) {
    %c0_i32 = arith.constant 0 : i32
    %c0_i32_0 = arith.constant 0 : i32
    %c0_i32_1 = arith.constant 0 : i32
    return %c0_i32, %c0_i32_0 : i32, i32
  }
  func.func @transform_6(%arg0: i32) -> (i32, i32, i32) {
    %c0_i32 = arith.constant 0 : i32
    %c0_i32_0 = arith.constant 0 : i32
    %c0_i32_1 = arith.constant 0 : i32
    %c0_i32_2 = arith.constant 0 : i32
    return %c0_i32, %c0_i32_0, %c0_i32_1 : i32, i32, i32
  }
  func.func @transform_7(%arg0: i32) -> (i32, i32) {
    %c0_i32 = arith.constant 0 : i32
    %c0_i32_0 = arith.constant 0 : i32
    %c0_i32_1 = arith.constant 0 : i32
    return %c0_i32, %c0_i32_0 : i32, i32
  }
  func.func @transform_8(%arg0: i32) -> (i32, i32) {
    %c0_i32 = arith.constant 0 : i32
    %c0_i32_0 = arith.constant 0 : i32
    %c0_i32_1 = arith.constant 0 : i32
    return %c0_i32, %c0_i32_0 : i32, i32
  }
  func.func @transform_9(%arg0: i32) -> (i32, i32, i32) {
    %c0_i32 = arith.constant 0 : i32
    %c0_i32_0 = arith.constant 0 : i32
    %c0_i32_1 = arith.constant 0 : i32
    %c0_i32_2 = arith.constant 0 : i32
    return %c0_i32, %c0_i32_0, %c0_i32_1 : i32, i32, i32
  }
  func.func @transform_10(%arg0: i32) -> (i32, i32) {
    %c0_i32 = arith.constant 0 : i32
    %c0_i32_0 = arith.constant 0 : i32
    %c0_i32_1 = arith.constant 0 : i32
    return %c0_i32, %c0_i32_0 : i32, i32
  }
  func.func @transform_11(%arg0: i32) -> (i32, i32) {
    %c0_i32 = arith.constant 0 : i32
    %c0_i32_0 = arith.constant 0 : i32
    %c0_i32_1 = arith.constant 0 : i32
    return %c0_i32, %c0_i32_0 : i32, i32
  }
  func.func @transform_12(%arg0: i32) -> (i32, i32, i32) {
    %c0_i32 = arith.constant 0 : i32
    %c0_i32_0 = arith.constant 0 : i32
    %c0_i32_1 = arith.constant 0 : i32
    return %arg0, %c0_i32, %c0_i32_0 : i32, i32, i32
  }
  func.func @transform_13(%arg0: i32) -> (i32, i32, i32) {
    %c0_i32 = arith.constant 0 : i32
    %c0_i32_0 = arith.constant 0 : i32
    %c0_i32_1 = arith.constant 0 : i32
    return %arg0, %c0_i32, %c0_i32_0 : i32, i32, i32
  }
  func.func @transform_14(%arg0: i32) -> (i32, i32, i32) {
    %c0_i32 = arith.constant 0 : i32
    %c0_i32_0 = arith.constant 0 : i32
    %c0_i32_1 = arith.constant 0 : i32
    return %arg0, %c0_i32, %c0_i32_0 : i32, i32, i32
  }
  func.func @transform_15(%arg0: i32) -> (i32, i32, i32) {
    %c0_i32 = arith.constant 0 : i32
    %c0_i32_0 = arith.constant 0 : i32
    %c0_i32_1 = arith.constant 0 : i32
    return %arg0, %c0_i32, %c0_i32_0 : i32, i32, i32
  }
}

</mosaic_0001>

<bundles_post_ra>
// kernel: clevrer_encoder_forward.1
= control target key start
LH: loop header
LB: loop body
LE: loop exit
PB: predicated region body
PF: predicated region fallthrough
CT: control target
= control target key end

     0   :  { %s13468_s0 = inlined_call_operand.vmem [shape: f32[2,17,17,16], index: 0, kind: input, shape index: {}]   ;;  %s13469_s1 = inlined_call_operand.vmem [shape: f32[64,8], index: 1, kind: input, shape index: {}]   ;;  %s13470_s2 = inlined_call_operand.vmem [shape: f32[1,8], index: 2, kind: input, shape index: {}]   ;;  %s13471_s3 = inlined_call_operand.vmem [shape: f32[16,64,256], index: 3, kind: input, shape index: {}]   ;;  %s13472_s4 = inlined_call_operand.vmem [shape: f32[128,16], index: 4, kind: input, shape index: {}]   ;;  %s13473_s5 = inlined_call_operand.vmem [shape: f32[1,16], index: 5, kind: input, shape index: {}]   ;;  %s13474_s6 = inlined_call_operand.vmem [shape: f32[16,16,64], index: 6, kind: input, shape index: {}]   ;;  %s13475_s7 = inlined_call_operand.vmem [shape: f32[256,24], index: 7, kind: input, shape index: {}]   ;;  %s13476_s8 = inlined_call_operand.vmem [shape: f32[1,24], index: 8, kind: input, shape index: {}]   ;;  %s13477_s9 = inlined_call_operand.vmem [shape: f32[9,4,16], index: 9, kind: input, shape index: {}]   ;;  %s13478_s10 = inlined_call_operand.vmem [shape: f32[216,16], index: 10, kind: input, shape index: {}]   ;;  %s13479_s11 = inlined_call_operand.vmem [shape: f32[1,16], index: 11, kind: input, shape index: {}]   ;;  %s13480_s12 = inlined_call_operand.vmem [shape: f32[2,256,8], index: 12, kind: output, shape index: {0}]   ;;  %s13481_s13 = inlined_call_operand.hbm [shape: f32[2,64,16], index: 13, kind: output, shape index: {1}]   ;;  %s13482_s14 = inlined_call_operand.hbm [shape: f32[2,16,24], index: 14, kind: output, shape index: {2}]   ;;  %s13483_s15 = inlined_call_operand.vmem [shape: f32[2,4,16], index: 15, kind: output, shape index: {3}]  }
   0x1   :  { %13510 = sst [smem:[#allocation12_spill]] %s13468_s0 }
   0x2   :  { %13511 = sst [smem:[#allocation13_spill]] %s13469_s1 }
   0x3   :  { %13512 = sst [smem:[#allocation14_spill]] %s13470_s2 }
   0x4   :  { %13513 = sst [smem:[#allocation15_spill]] %s13471_s3 }
   0x5   :  { %13514 = sst [smem:[#allocation16_spill]] %s13472_s4 }
   0x6   :  { %13515 = sst [smem:[#allocation17_spill]] %s13473_s5 }
   0x7   :  { %13516 = sst [smem:[#allocation18_spill]] %s13474_s6 }
   0x8   :  { %13517 = sst [smem:[#allocation19_spill]] %s13475_s7 }
   0x9   :  { %13518 = sst [smem:[#allocation20_spill]] %s13480_s12 }
   0xa   :  { %21 = vsyncpa [#allocation3], 0 }
   0xb   :  { %23 = vsyncpa [#allocation3 + $0x1], 0 }
   0xc   :  { %24 = vsyncpa [#allocation5], 0 }
   0xd   :  { %26 = vsyncpa [#allocation5 + $0x1], 0  ;;  %s10603_s18 = smov 0   ;;  %s10605_s19 = smov 0  }
   0xe   :  { %s10607_s20 = smov 0   ;;  %s10609_s21 = smov 0  }
   0xf LB: > { %13519 = sst [smem:[#allocation8_spill]] %s10492_s19  ;;  %s10624_s22 = sadd.s32 4294967295, %s10500_s21   ;;  %s10500_s21 = sphi %s10609_s21, %s13547_s21   ;;  %s10496_s20 = sphi %s10607_s20, %s13550_s20   ;;  %s10492_s19 = sphi %s10605_s19, %s13549_s19   ;;  %s10488_s18 = sphi %s10603_s18, %s13548_s18  }
  0x10   : > { %13520 = sst [smem:[#allocation9_spill]] %s10496_s20  ;;  %s6949_s23 = sadd.s32 4294967294, %s10500_s21  }
  0x11   : > { %s10628_s24 = sadd.s32 1, %s10500_s21   ;;  %s322_s25 = sadd.s32 1, %s10496_s20 }
  0x12   : > { %13521 = sst [smem:[#allocation10_spill]] %s10628_s24  ;;  %s319_s26 = ssub.s32 %s10500_s21, %s10628_s24 }
  0x13   : > { %p332_p0 = scmp.ne.s32.totalorder %s10496_s20, %s10492_s19  ;;  %p320_p1 = scmp.eq.s32.totalorder %s319_s26, 0 }
  0x14   : > { %p333_p2 = scmp.eq.s32.totalorder %s10624_s22, 1  ;;  %p338_p3 = scmp.ne.s32.totalorder %s10492_s19, %s10488_s18 }
  0x15   : > { %p339_p4 = scmp.eq.s32.totalorder %s6949_s23, 1  ;;  %p6952_p7 = scmp.ge.s32.totalorder %s10500_s21, 1 }
  0x16   : > { %s10639_s27 = scalar_select %p320_p1, %s10496_s20, %s322_s25  }
  0x17   : > { %p10641_p5 = por %p333_p2, %p332_p0  ;;  %p10645_p6 = por %p339_p4, %p338_p3 }
  0x18   : > { %13522 = sst [smem:[#allocation11_spill]] %s10639_s27  ;;  %p450_p8 = scmp.lt.s32.totalorder %s10500_s21, 3 }
  0x1a   : > { %p451_p9 = pnand %p6952_p7, %p450_p8 }
  0x1b   : > { %p512_p10 = scmp.lt.s32.totalorder (!%p451_p9), %s10624_s22, 1  ;;  %s13525_s1 = sld [smem:[#allocation13_spill]] (!%p451_p9)  ;;  %vm1039_vm0 = vcmask (!%p451_p9), 130048   ;;  %vm1072_vm1 = vcmask (!%p451_p9), 261120   ;;  %vm1105_vm2 = vcmask (!%p451_p9), 392192   ;;  %vm1153_vm3 = vcmask (!%p451_p9), 523264  }
  0x1c   : > { %454 = sbr.rel (%p451_p9) target bundleno = 2671 (0xa6f), region = 68  ;;  %s13526_s0 = sld [smem:[#allocation12_spill]] (!%p451_p9)  ;;  %vm1571_vm5 = vcmask (!%p451_p9), 64512  }
  0x1d   : > { %s13491_s16 = smov (!%p451_p9), 16   ;;  %s13487_s17 = smov (!%p451_p9), 48  }
  0x1e   : > { %s13527_s2 = sld [smem:[#allocation14_spill]] (!%p451_p9)  ;;  %s13528_s12 = sld [smem:[#allocation20_spill]] (!%p451_p9) }
  0x1f   : > { %s13529_s3 = sld [smem:[#allocation15_spill]] (!%p451_p9)  ;;  %s13530_s23 = smov (!%p451_p9), 16  }
  0x20   : > { %s13531_s27 = smov (!%p451_p9), 32   ;;  %s13500_s20 = smov (!%p451_p9), 64  }
  0x21   : > { %v1138_v0 = vld [vmem:[%s13525_s1] sm:$0xff] (!%p451_p9)  ;;  %v1139_v1 = vld [vmem:[%s13525_s1 + $0x8] sm:$0xff] (!%p451_p9)  ;;  %v1140_v3 = vld [vmem:[%s13525_s1 + $0x10] sm:$0xff] (!%p451_p9)  ;;  %s13534_s4 = sld [smem:[#allocation16_spill]] (!%p451_p9)  ;;  %s13537_s6 = sld [smem:[#allocation18_spill]] (!%p451_p9) }
  0x22   : > { %v9050_v2 = vpack.c.bf16 (!%p451_p9), %v1139_v1, %v1138_v0  ;;  %v1141_v4 = vld [vmem:[%s13525_s1 + $0x18] sm:$0xff] (!%p451_p9)  ;;  %v1142_v6 = vld [vmem:[%s13525_s1 + $0x20] sm:$0xff] (!%p451_p9)  ;;  %v1143_v7 = vld [vmem:[%s13525_s1 + $0x28] sm:$0xff] (!%p451_p9)  ;;  %s13538_s5 = sld [smem:[#allocation17_spill]] (!%p451_p9)  ;;  %s13539_s7 = sld [smem:[#allocation19_spill]] (!%p451_p9) }
  0x23   : > { %s10665_s24 = scalar_select %p512_p10, %s10624_s22, 1  ;;  %v9054_v5 = vpack.c.bf16 %v1141_v4, %v1140_v3  ;;  %v9058_v8 = vpack.c.bf16 %v1143_v7, %v1142_v6  ;;  %v1144_v20 = vld [vmem:[%s13525_s1 + $0x30] sm:$0xff]  ;;  %v1145_v21 = vld [vmem:[%s13525_s1 + $0x38] sm:$0xff] }
  0x24   : > { %9964 = vmatprep.subr.bf16.mxu1 %v9050_v2  ;;  %9051 = vmatprep.subr.bf16.mxu0 %v9050_v2  ;;  %v9062_v22 = vpack.c.bf16 %v1145_v21, %v1144_v20  ;;  %s13506_s1 = smov 104  }
  0x25   : > { %s9972_s30 = smul.u32 408, %s10665_s24  ;;  %9968 = vmatpush3.bf16.msra.mxu1 %v9050_v2  ;;  %9053 = vmatpush3.bf16.msra.mxu0 %v9050_v2  ;;  %s7387_s25 = sshll.u32 %s10665_s24, 8 }
  0x26   : > { %9965 = vmatprep.subr.bf16.mxu1 %v9054_v5  ;;  %9055 = vmatprep.subr.bf16.mxu0 %v9054_v5 }
  0x27   : > { %s10677_s26 = scalar_lea.vmem %s13526_s0, %s9972_s30  ;;  %s13489_s30 = smov 32  }
  0x28   : > { %v10680_v9 = vld [vmem:[%s10677_s26 + $0xc9] sm:$0xff]  ;;  %v10683_v10 = vld [vmem:[%s10677_s26 + $0xc1] sm:$0xff]  ;;  %v10690_v11 = vld [vmem:[%s10677_s26 + $0xd8] sm:$0xff]  ;;  %s13495_s0 = smov 40  }
  0x29   : > { %721 = vrot.lane.b32.xlu1 %v10680_v9, %s13491_s16  ;;  %719 = vrot.lane.b32.xlu0 %v10683_v10, %s13491_s16  ;;  %v558_v12 = vld [vmem:[%s10677_s26 + $0x1] sm:$0xff]  ;;  %v10697_v13 = vld [vmem:[%s10677_s26 + $0x18] sm:$0xff] }
  0x2a   : > { %9969 = vmatpush3.bf16.msra.mxu1 %v9054_v5  ;;  %9057 = vmatpush3.bf16.msra.mxu0 %v9054_v5  ;;  %v559_v14 = vld [vmem:[%s10677_s26 + $0x9] sm:$0xff]  ;;  %v7007_v15 = vld [vmem:[%s10677_s26 + $0xd9] sm:$0xff]  ;;  %v7008_v19 = vld [vmem:[%s10677_s26 + $0xe1] sm:$0xff] }
  0x2b   : > { %9966 = vmatprep.subr.bf16.mxu1 %v9058_v8  ;;  %9059 = vmatprep.subr.bf16.mxu0 %v9058_v8  ;;  %v10705_v16 = vld [vmem:[%s10677_s26 + $0xe0] sm:$0xff]  ;;  %v10730_v24 = vld [vmem:[%s10677_s26 + $0xf0] sm:$0xff]  ;;  %v10743_v27 = vld [vmem:[%s10677_s26 + $0xf8] sm:$0xff] }
  0x2c   : > { %v6991_v17 = vld [vmem:[%s10677_s26 + $0x19] sm:$0xff]  ;;  %v6992_v23 = vld [vmem:[%s10677_s26 + $0x21] sm:$0xff]  ;;  %v10736_v25 = vld [vmem:[%s10677_s26 + $0x30] sm:$0xff] }
  0x2d   : > { %847 = vrot.lane.b32.xlu1 %v10690_v11, %s13489_s30  ;;  %687 = vrot.lane.b32.xlu0 %v558_v12, %s13491_s16  ;;  %v10712_v18 = vld [vmem:[%s10677_s26 + $0x20] sm:$0xff]  ;;  %v7009_v26 = vld [vmem:[%s10677_s26 + $0xf1] sm:$0xff] }
  0x2e   : > { %9970 = vmatpush3.bf16.msra.mxu1 %v9058_v8  ;;  %9061 = vmatpush3.bf16.msra.mxu0 %v9058_v8  ;;  %v6993_v28 = vld [vmem:[%s10677_s26 + $0x31] sm:$0xff]  ;;  %v7010_v30 = vld [vmem:[%s10677_s26 + $0xf9] sm:$0xff]  ;;  %v10762_v32 = vld [vmem:[%s10677_s26 + $0x108] sm:$0xff] }
  0x2f   : > { %9967 = vmatprep.subr.bf16.mxu1 %v9062_v22  ;;  %9063 = vmatprep.subr.bf16.mxu0 %v9062_v22  ;;  %v10750_v29 = vld [vmem:[%s10677_s26 + $0x38] sm:$0xff]  ;;  %v10768_v33 = vld [vmem:[%s10677_s26 + $0x48] sm:$0xff]  ;;  %v10775_v35 = vld [vmem:[%s10677_s26 + $0x110] sm:$0xff] }
  0x30   : > { %v6994_v31 = vld [vmem:[%s10677_s26 + $0x39] sm:$0xff]  ;;  %v7011_v34 = vld [vmem:[%s10677_s26 + $0x109] sm:$0xff]  ;;  %v7012_v38 = vld [vmem:[%s10677_s26 + $0x111] sm:$0xff] }
  0x31   : > { %815 = vrot.lane.b32.xlu1 %v10697_v13, %s13489_s30  ;;  %689 = vrot.lane.b32.xlu0 %v559_v14, %s13491_s16  ;;  %v6995_v36 = vld [vmem:[%s10677_s26 + $0x49] sm:$0xff]  ;;  %v6996_v39 = vld [vmem:[%s10677_s26 + $0x51] sm:$0xff] }
  0x32   : > { %9971 = vmatpush3.bf16.msra.mxu1 %v9062_v22  ;;  %9065 = vmatpush3.bf16.msra.mxu0 %v9062_v22  ;;  %v10782_v37 = vld [vmem:[%s10677_s26 + $0x50] sm:$0xff]  ;;  %v10794_v40 = vld [vmem:[%s10677_s26 + $0x120] sm:$0xff]  ;;  %v10807_v43 = vld [vmem:[%s10677_s26 + $0x128] sm:$0xff] }
  0x33   : > { %v10800_v41 = vld [vmem:[%s10677_s26 + $0x60] sm:$0xff]  ;;  %v10814_v45 = vld [vmem:[%s10677_s26 + $0x68] sm:$0xff]  ;;  %v10826_v48 = vld [vmem:[%s10677_s26 + $0x138] sm:$0xff] }
  0x34   : > { %v7013_v42 = vld [vmem:[%s10677_s26 + $0x121] sm:$0xff]  ;;  %v7014_v46 = vld [vmem:[%s10677_s26 + $0x129] sm:$0xff]  ;;  %v10832_v49 = vld [vmem:[%s10677_s26 + $0x78] sm:$0xff] }
  0x35   : > { %975 = vrot.lane.b32.xlu1 %v7007_v15, %s13487_s17  ;;  %849 = vrot.lane.b32.xlu0 %v10705_v16, %s13489_s30  ;;  %v6997_v44 = vld [vmem:[%s10677_s26 + $0x61] sm:$0xff]  ;;  %v6998_v47 = vld [vmem:[%s10677_s26 + $0x69] sm:$0xff] }
  0x36   : > { %v7015_v50 = vld [vmem:[%s10677_s26 + $0x139] sm:$0xff]  ;;  %v7016_v54 = vld [vmem:[%s10677_s26 + $0x141] sm:$0xff]  ;;  %v10858_v60 = vld [vmem:[%s10677_s26 + $0x150] sm:$0xff] }
  0x37   : > { %v10839_v51 = vld [vmem:[%s10677_s26 + $0x140] sm:$0xff]  ;;  %v10869_v1 = vld [vmem:[%s10677_s26 + $0x90] sm:$0xff]  ;;  %v10881_v12 = vld [vmem:[%s10677_s26 + $0x158] sm:$0xff] }
  0x38   : > { %v6999_v52 = vld [vmem:[%s10677_s26 + $0x79] sm:$0xff]  ;;  %v7000_v57 = vld [vmem:[%s10677_s26 + $0x81] sm:$0xff]  ;;  %v7017_v8 = vld [vmem:[%s10677_s26 + $0x151] sm:$0xff] }
  0x39   : > { %943 = vrot.lane.b32.xlu1 %v6991_v17, %s13487_s17  ;;  %817 = vrot.lane.b32.xlu0 %v10712_v18, %s13489_s30  ;;  %v10846_v53 = vld [vmem:[%s10677_s26 + $0x80] sm:$0xff]  ;;  %v10884_v14 = vld [vmem:[%s10677_s26 + $0xc8] sm:$0xff] }
  0x3a   : > { %v10861_v61 = vld [vmem:[%s10677_s26 + $0xc0] sm:$0xff]  ;;  %v7001_v22 = vld [vmem:[%s10677_s26 + $0x91] sm:$0xff] }
  0x3b   : > { %v526_v3 = vld [vmem:[%s10677_s26] sm:$0xff] }
  0x3d   : > { %723 = vrot.lane.b32.xlu1 %v7007_v15, %s13491_s16  ;;  %977 = vrot.lane.b32.xlu0 %v7008_v19, %s13487_s17 }
  0x41   : > { %691 = vrot.lane.b32.xlu1 %v6991_v17, %s13491_s16  ;;  %945 = vrot.lane.b32.xlu0 %v6992_v23, %s13487_s17 }
  0x45   : > { %851 = vrot.lane.b32.xlu1 %v10730_v24, %s13489_s30  ;;  %725 = vrot.lane.b32.xlu0 %v7008_v19, %s13491_s16 }
  0x49   : > { %819 = vrot.lane.b32.xlu1 %v10736_v25, %s13489_s30  ;;  %693 = vrot.lane.b32.xlu0 %v6992_v23, %s13491_s16  ;;  %v10896_v23 = vld [vmem:[%s10677_s26 + $0x98] sm:$0xff] }
  0x4d   : > { %979 = vrot.lane.b32.xlu1 %v7009_v26, %s13487_s17  ;;  %853 = vrot.lane.b32.xlu0 %v10743_v27, %s13489_s30 }
  0x51   : > { %947 = vrot.lane.b32.xlu1 %v6993_v28, %s13487_s17  ;;  %821 = vrot.lane.b32.xlu0 %v10750_v29, %s13489_s30 }
  0x55   : > { %727 = vrot.lane.b32.xlu1 %v7009_v26, %s13491_s16  ;;  %981 = vrot.lane.b32.xlu0 %v7010_v30, %s13487_s17  ;;  %v527_v26 = vld [vmem:[%s10677_s26 + $0x8] sm:$0xff] }
  0x59   : > { %695 = vrot.lane.b32.xlu1 %v6993_v28, %s13491_s16  ;;  %949 = vrot.lane.b32.xlu0 %v6994_v31, %s13487_s17 }
  0x5d   : > { %855 = vrot.lane.b32.xlu1 %v10762_v32, %s13489_s30  ;;  %729 = vrot.lane.b32.xlu0 %v7010_v30, %s13491_s16 }
  0x61   : > { %823 = vrot.lane.b32.xlu1 %v10768_v33, %s13489_s30  ;;  %697 = vrot.lane.b32.xlu0 %v6994_v31, %s13491_s16 }
  0x65   : > { %983 = vrot.lane.b32.xlu1 %v7011_v34, %s13487_s17  ;;  %857 = vrot.lane.b32.xlu0 %v10775_v35, %s13489_s30 }
  0x69   : > { %951 = vrot.lane.b32.xlu1 %v6995_v36, %s13487_s17  ;;  %825 = vrot.lane.b32.xlu0 %v10782_v37, %s13489_s30 }
  0x6d   : > { %731 = vrot.lane.b32.xlu1 %v7011_v34, %s13491_s16  ;;  %985 = vrot.lane.b32.xlu0 %v7012_v38, %s13487_s17 }
  0x71   : > { %699 = vrot.lane.b32.xlu1 %v6995_v36, %s13491_s16  ;;  %953 = vrot.lane.b32.xlu0 %v6996_v39, %s13487_s17 }
  0x75   : > { %859 = vrot.lane.b32.xlu1 %v10794_v40, %s13489_s30  ;;  %733 = vrot.lane.b32.xlu0 %v7012_v38, %s13491_s16  ;;  %v7018_v38 = vld [vmem:[%s10677_s26 + $0x159] sm:$0xff] }
  0x79   : > { %827 = vrot.lane.b32.xlu1 %v10800_v41, %s13489_s30  ;;  %701 = vrot.lane.b32.xlu0 %v6996_v39, %s13491_s16 }
  0x7d   : > { %987 = vrot.lane.b32.xlu1 %v7013_v42, %s13487_s17  ;;  %861 = vrot.lane.b32.xlu0 %v10807_v43, %s13489_s30 }
  0x81   : > { %955 = vrot.lane.b32.xlu1 %v6997_v44, %s13487_s17  ;;  %829 = vrot.lane.b32.xlu0 %v10814_v45, %s13489_s30 }
  0x85   : > { %735 = vrot.lane.b32.xlu1 %v7013_v42, %s13491_s16  ;;  %989 = vrot.lane.b32.xlu0 %v7014_v46, %s13487_s17 }
  0x89   : > { %703 = vrot.lane.b32.xlu1 %v6997_v44, %s13491_s16  ;;  %957 = vrot.lane.b32.xlu0 %v6998_v47, %s13487_s17 }
  0x8d   : > { %863 = vrot.lane.b32.xlu1 %v10826_v48, %s13489_s30  ;;  %737 = vrot.lane.b32.xlu0 %v7014_v46, %s13491_s16 }
  0x91   : > { %831 = vrot.lane.b32.xlu1 %v10832_v49, %s13489_s30  ;;  %705 = vrot.lane.b32.xlu0 %v6998_v47, %s13491_s16  ;;  %v7002_v47 = vld [vmem:[%s10677_s26 + $0x99] sm:$0xff] }
  0x95   : > { %991 = vrot.lane.b32.xlu1 %v7015_v50, %s13487_s17  ;;  %865 = vrot.lane.b32.xlu0 %v10839_v51, %s13489_s30 }
  0x99   : > { %959 = vrot.lane.b32.xlu1 %v6999_v52, %s13487_s17  ;;  %833 = vrot.lane.b32.xlu0 %v10846_v53, %s13489_s30 }
  0x9b   : > { %v722_v55 = vpop.permute.xlu1 %721  ;;  %v720_v56 = vpop.permute.xlu0 %719 }
  0x9c   : > { %v1056_v0 = vsel %vm1039_vm0, %v10861_v61, %v720_v56  ;;  %v1057_v21 = vsel %vm1039_vm0, %v10884_v14, %v722_v55 }
  0x9d   : > { %739 = vrot.lane.b32.xlu1 %v7015_v50, %s13491_s16  ;;  %993 = vrot.lane.b32.xlu0 %v7016_v54, %s13487_s17 }
  0x9f   : > { %v848_v58 = vpop.permute.xlu1 %847  ;;  %v688_v59 = vpop.permute.xlu0 %687 }
  0xa0   : > { %v1089_v2 = vsel %vm1072_vm1, %v1056_v0, %v848_v58  ;;  %v1040_v7 = vsel %vm1039_vm0, %v526_v3, %v688_v59  ;;  %v10924_v58 = vld [vmem:[%s10677_s26 + $0xa8] sm:$0xff]  ;;  %v10936_v3 = vld [vmem:[%s10677_s26 + $0x170] sm:$0xff] }
  0xa1   : > { %707 = vrot.lane.b32.xlu1 %v6999_v52, %s13491_s16  ;;  %961 = vrot.lane.b32.xlu0 %v7000_v57, %s13487_s17 }
  0xa3   : > { %v816_v62 = vpop.permute.xlu1 %815  ;;  %v690_v63 = vpop.permute.xlu0 %689 }
  0xa4   : > { %v1073_v15 = vsel %vm1072_vm1, %v1040_v7, %v816_v62  ;;  %v1041_v36 = vsel %vm1039_vm0, %v527_v26, %v690_v63 }
  0xa5   : > { %867 = vrot.lane.b32.xlu1 %v10858_v60, %s13489_s30  ;;  %741 = vrot.lane.b32.xlu0 %v7016_v54, %s13491_s16  ;;  %v10916_v54 = vld [vmem:[%s10677_s26 + $0x168] sm:$0xff] }
  0xa7   : > { %v976_v4 = vpop.permute.xlu1 %975  ;;  %v850_v5 = vpop.permute.xlu0 %849 }
  0xa8   : > { %v1122_v6 = vsel %vm1105_vm2, %v1089_v2, %v976_v4  ;;  %v1090_v28 = vsel %vm1072_vm1, %v1057_v21, %v850_v5 }
  0xa9   : > { %835 = vrot.lane.b32.xlu1 %v10869_v1, %s13489_s30  ;;  %709 = vrot.lane.b32.xlu0 %v7000_v57, %s13491_s16 }
  0xaa   : > { %8615 = vmatprep.mubr.msk.f32.mxu1 %vm1153_vm3, %v1122_v6 }
  0xab   : > { %v944_v17 = vpop.permute.xlu1 %943  ;;  %v818_v19 = vpop.permute.xlu0 %817 }
  0xac   : > { %v1106_v20 = vsel %vm1105_vm2, %v1073_v15, %v944_v17  ;;  %v1074_v39 = vsel %vm1072_vm1, %v1041_v36, %v818_v19  ;;  %v10948_v15 = vld [vmem:[%s10677_s26 + $0xb0] sm:$0xff] }
  0xad   : > { %995 = vrot.lane.b32.xlu1 %v7017_v8, %s13487_s17  ;;  %869 = vrot.lane.b32.xlu0 %v10881_v12, %s13489_s30 }
  0xae   : > { %8591 = vmatprep.mubr.msk.f32.mxu0 %vm1153_vm3, %v1106_v20 }
  0xaf   : > { %v724_v30 = vpop.permute.xlu1 %723  ;;  %v978_v31 = vpop.permute.xlu0 %977 }
  0xb0   : > { %v1123_v34 = vsel %vm1105_vm2, %v1090_v28, %v978_v31  ;;  %v1058_v57 = vsel %vm1039_vm0, %v10690_v11, %v724_v30  ;;  %v7019_v11 = vld [vmem:[%s10677_s26 + $0x169] sm:$0xff] }
  0xb1   : > { %963 = vrot.lane.b32.xlu1 %v7001_v22, %s13487_s17  ;;  %837 = vrot.lane.b32.xlu0 %v10896_v23, %s13489_s30 }
  0xb2   : > { %8616 = vmatmul.mubr.msk.f32.vlgmr.msra.gmra.mrb[0].mxu1 %vm1153_vm3, %v1123_v34  ;;  %v7004_v34 = vld [vmem:[%s10677_s26 + $0xb1] sm:$0xff] }
  0xb3   : > { %v692_v42 = vpop.permute.xlu1 %691  ;;  %v946_v44 = vpop.permute.xlu0 %945 }
  0xb4   : > { %v1107_v46 = vsel %vm1105_vm2, %v1074_v39, %v946_v44  ;;  %v1042_v2 = vsel %vm1039_vm0, %v10697_v13, %v692_v42 }
  0xb5   : > { %743 = vrot.lane.b32.xlu1 %v7017_v8, %s13491_s16  ;;  %997 = vrot.lane.b32.xlu0 %v7018_v38, %s13487_s17  ;;  %v7003_v8 = vld [vmem:[%s10677_s26 + $0xa9] sm:$0xff] }
  0xb6   : > { %8592 = vmatmul.mubr.msk.f32.vlgmr.msra.gmra.mrb[0].mxu0 %vm1153_vm3, %v1107_v46 }
  0xb7   : > { %v852_v50 = vpop.permute.xlu1 %851  ;;  %v726_v52 = vpop.permute.xlu0 %725 }
  0xb8   : > { %v1091_v59 = vsel %vm1072_vm1, %v1058_v57, %v852_v50  ;;  %v1059_v13 = vsel %vm1039_vm0, %v10705_v16, %v726_v52  ;;  %v6990_v57 = vld [vmem:[%s10677_s26 + $0x188] sm:$0xff] }
  0xb9   : > { %711 = vrot.lane.b32.xlu1 %v7001_v22, %s13491_s16  ;;  %965 = vrot.lane.b32.xlu0 %v7002_v47, %s13487_s17  ;;  %v7020_v22 = vld [vmem:[%s10677_s26 + $0x171] sm:$0xff] }
  0xbb   : > { %v820_v55 = vpop.permute.xlu1 %819  ;;  %v694_v56 = vpop.permute.xlu0 %693 }
  0xbc   : > { %v1075_v4 = vsel %vm1072_vm1, %v1042_v2, %v820_v55  ;;  %v1043_v16 = vsel %vm1039_vm0, %v10712_v18, %v694_v56  ;;  %v6989_v18 = vld [vmem:[%s10677_s26 + $0x180] sm:$0xff] }
  0xbd   : > { %871 = vrot.lane.b32.xlu1 %v10916_v54, %s13489_s30  ;;  %745 = vrot.lane.b32.xlu0 %v7018_v38, %s13491_s16  ;;  %v7021_v56 = vld [vmem:[%s10677_s26 + $0x181] sm:$0xff] }
  0xbf   : > { %v980_v62 = vpop.permute.xlu1 %979  ;;  %v854_v63 = vpop.permute.xlu0 %853 }
  0xc0   : > { %v1124_v0 = vsel %vm1105_vm2, %v1091_v59, %v980_v62  ;;  %v1092_v17 = vsel %vm1072_vm1, %v1059_v13, %v854_v63 }
  0xc1   : > { %839 = vrot.lane.b32.xlu1 %v10924_v58, %s13489_s30  ;;  %713 = vrot.lane.b32.xlu0 %v7002_v47, %s13491_s16 }
  0xc2   : > { %8618 = vmatprep.mubr.msk.f32.mxu1 %vm1153_vm3, %v1124_v0 }
  0xc3   : > { %v948_v5 = vpop.permute.xlu1 %947  ;;  %v822_v6 = vpop.permute.xlu0 %821 }
  0xc4   : > { %v1108_v7 = vsel %vm1105_vm2, %v1075_v4, %v948_v5  ;;  %v1076_v26 = vsel %vm1072_vm1, %v1043_v16, %v822_v6 }
  0xc5   : > { %999 = vrot.lane.b32.xlu1 %v7019_v11, %s13487_s17  ;;  %873 = vrot.lane.b32.xlu0 %v10936_v3, %s13489_s30 }
  0xc6   : > { %8594 = vmatprep.mubr.msk.f32.mxu0 %vm1153_vm3, %v1108_v7 }
  0xc7   : > { %v728_v19 = vpop.permute.xlu1 %727  ;;  %v982_v20 = vpop.permute.xlu0 %981 }
  0xc8   : > { %v1125_v21 = vsel %vm1105_vm2, %v1092_v17, %v982_v20  ;;  %v1060_v44 = vsel %vm1039_vm0, %v10730_v24, %v728_v19 }
  0xc9   : > { %967 = vrot.lane.b32.xlu1 %v7003_v8, %s13487_s17  ;;  %841 = vrot.lane.b32.xlu0 %v10948_v15, %s13489_s30 }
  0xca   : > { %8619 = vmatmul.mubr.msk.f32.gmra.mrb[2].mxu1 %vm1153_vm3, %v1125_v21 }
  0xcb   : > { %v696_v28 = vpop.permute.xlu1 %695  ;;  %v950_v30 = vpop.permute.xlu0 %949 }
  0xcc   : > { %v1109_v31 = vsel %vm1105_vm2, %v1076_v26, %v950_v30  ;;  %v1044_v55 = vsel %vm1039_vm0, %v10736_v25, %v696_v28 }
  0xcd   : > { %747 = vrot.lane.b32.xlu1 %v7019_v11, %s13491_s16  ;;  %1001 = vrot.lane.b32.xlu0 %v7020_v22, %s13487_s17 }
  0xce   : > { %8595 = vmatmul.mubr.msk.f32.gmra.mrb[2].mxu0 %vm1153_vm3, %v1109_v31 }
  0xcf   : > { %v856_v36 = vpop.permute.xlu1 %855  ;;  %v730_v38 = vpop.permute.xlu0 %729 }
  0xd0   : > { %v1093_v46 = vsel %vm1072_vm1, %v1060_v44, %v856_v36 }
  0xd1   : > { %715 = vrot.lane.b32.xlu1 %v7003_v8, %s13491_s16  ;;  %969 = vrot.lane.b32.xlu0 %v7004_v34, %s13487_s17 }
  0xd3   : > { %v824_v39 = vpop.permute.xlu1 %823  ;;  %v698_v42 = vpop.permute.xlu0 %697 }
  0xd4   : > { %v1077_v24 = vsel %vm1072_vm1, %v1044_v55, %v824_v39  ;;  %v1045_v4 = vsel %vm1039_vm0, %v10750_v29, %v698_v42 }
  0xd5   : > { %875 = vrot.lane.b32.xlu1 %v6989_v18, %s13489_s30  ;;  %749 = vrot.lane.b32.xlu0 %v7020_v22, %s13491_s16 }
  0xd7   : > { %v984_v47 = vpop.permute.xlu1 %983  ;;  %v858_v50 = vpop.permute.xlu0 %857 }
  0xd8   : > { %v1126_v52 = vsel %vm1105_vm2, %v1093_v46, %v984_v47 }
  0xd9   : > { %843 = vrot.lane.b32.xlu1 %v10861_v61, %s13489_s30  ;;  %717 = vrot.lane.b32.xlu0 %v7004_v34, %s13491_s16  ;;  %v1061_v61 = vsel %vm1039_vm0, %v10743_v27, %v730_v38  ;;  %v7022_v27 = vld [vmem:[%s10677_s26 + $0x189] sm:$0xff]  ;;  %s13497_s16 = smov 24   ;;  %s13502_s26 = smov 80  }
  0xda   : > { %8621 = vmatprep.mubr.msk.f32.mxu1 %vm1153_vm3, %v1126_v52  ;;  %v1094_v25 = vsel %vm1072_vm1, %v1061_v61, %v858_v50 }
  0xdb   : > { %v952_v59 = vpop.permute.xlu1 %951  ;;  %v826_v62 = vpop.permute.xlu0 %825 }
  0xdc   : > { %v1110_v63 = vsel %vm1105_vm2, %v1077_v24, %v952_v59  ;;  %v1078_v5 = vsel %vm1072_vm1, %v1045_v4, %v826_v62 }
  0xdd   : > { %1003 = vrot.lane.b32.xlu1 %v7021_v56, %s13487_s17  ;;  %877 = vrot.lane.b32.xlu0 %v6990_v57, %s13489_s30 }
  0xde   : > { %8597 = vmatprep.mubr.msk.f32.mxu0 %vm1153_vm3, %v1110_v63 }
  0xdf   : > { %v732_v0 = vpop.permute.xlu1 %731  ;;  %v986_v2 = vpop.permute.xlu0 %985 }
  0xe0   : > { %v1127_v11 = vsel %vm1105_vm2, %v1094_v25, %v986_v2  ;;  %v1062_v17 = vsel %vm1039_vm0, %v10762_v32, %v732_v0 }
  0xe1   : > { %971 = vrot.lane.b32.xlu1 %v10683_v10, %s13487_s17  ;;  %845 = vrot.lane.b32.xlu0 %v10884_v14, %s13489_s30  ;;  %s13533_s30 = smov 48  }
  0xe2   : > { %8622 = vmatmul.mubr.msk.f32.gmra.mrb[4].mxu1 %vm1153_vm3, %v1127_v11 }
  0xe3   : > { %v700_v6 = vpop.permute.xlu1 %699  ;;  %v954_v7 = vpop.permute.xlu0 %953 }
  0xe4   : > { %v1111_v13 = vsel %vm1105_vm2, %v1078_v5, %v954_v7 }
  0xe5   : > { %973 = vrot.lane.b32.xlu1 %v10680_v9, %s13487_s17  ;;  %1005 = vrot.lane.b32.xlu0 %v7022_v27, %s13487_s17  ;;  %v1046_v9 = vsel %vm1039_vm0, %v10768_v33, %v700_v6  ;;  %s11116_s17 = scalar_lea.vmem %s13528_s12, %s7387_s25  ;;  %s13493_s25 = smov 8  }
  0xe6   : > { %8598 = vmatmul.mubr.msk.f32.gmra.mrb[4].mxu0 %vm1153_vm3, %v1111_v13  ;;  %s13536_s12 = smov 104  }
  0xe7   : > { %v860_v10 = vpop.permute.xlu1 %859  ;;  %v734_v14 = vpop.permute.xlu0 %733 }
  0xe8   : > { %v1095_v19 = vsel %vm1072_vm1, %v1062_v17, %v860_v10  ;;  %v1063_v32 = vsel %vm1039_vm0, %v10775_v35, %v734_v14 }
  0xeb   : > { %v828_v8 = vpop.permute.xlu1 %827  ;;  %v702_v29 = vpop.permute.xlu0 %701 }
  0xec   : > { %v1079_v22 = vsel %vm1072_vm1, %v1046_v9, %v828_v8  ;;  %v1047_v33 = vsel %vm1039_vm0, %v10782_v37, %v702_v29 }
  0xef   : > { %v988_v20 = vpop.permute.xlu1 %987  ;;  %v862_v21 = vpop.permute.xlu0 %861 }
  0xf0   : > { %v1128_v16 = vsel %vm1105_vm2, %v1095_v19, %v988_v20  ;;  %v1096_v31 = vsel %vm1072_vm1, %v1063_v32, %v862_v21 }
  0xf1   : > { %8624 = vmatprep.mubr.msk.f32.mxu1 %vm1153_vm3, %v1128_v16 }
  0xf3   : > { %v956_v26 = vpop.permute.xlu1 %955  ;;  %v830_v28 = vpop.permute.xlu0 %829 }
  0xf4   : > { %v1112_v30 = vsel %vm1105_vm2, %v1079_v22, %v956_v26  ;;  %v1080_v18 = vsel %vm1072_vm1, %v1047_v33, %v830_v28 }
  0xf5   : > { %8600 = vmatprep.mubr.msk.f32.mxu0 %vm1153_vm3, %v1112_v30 }
  0xf7   : > { %v736_v34 = vpop.permute.xlu1 %735  ;;  %v990_v36 = vpop.permute.xlu0 %989 }
  0xf8   : > { %v1129_v38 = vsel %vm1105_vm2, %v1096_v31, %v990_v36  ;;  %v1064_v52 = vsel %vm1039_vm0, %v10794_v40, %v736_v34 }
  0xf9   : > { %8625 = vmatmul.mubr.msk.f32.gmra.mrb[6].mxu1 %vm1153_vm3, %v1129_v38 }
  0xfb   : > { %v704_v39 = vpop.permute.xlu1 %703  ;;  %v958_v42 = vpop.permute.xlu0 %957 }
  0xfc   : > { %v1113_v44 = vsel %vm1105_vm2, %v1080_v18, %v958_v42  ;;  %v1048_v24 = vsel %vm1039_vm0, %v10800_v41, %v704_v39 }
  0xfd   : > { %8601 = vmatmul.mubr.msk.f32.gmra.mrb[6].mxu0 %vm1153_vm3, %v1113_v44 }
  0xff   : > { %v864_v35 = vpop.permute.xlu1 %863  ;;  %v738_v46 = vpop.permute.xlu0 %737 }
 0x100   : > { %v1097_v55 = vsel %vm1072_vm1, %v1064_v52, %v864_v35  ;;  %v1065_v40 = vsel %vm1039_vm0, %v10807_v43, %v738_v46 }
 0x103   : > { %v832_v47 = vpop.permute.xlu1 %831  ;;  %v706_v50 = vpop.permute.xlu0 %705 }
 0x104   : > { %v1081_v59 = vsel %vm1072_vm1, %v1048_v24, %v832_v47  ;;  %v1049_v41 = vsel %vm1039_vm0, %v10814_v45, %v706_v50 }
 0x107   : > { %v992_v56 = vpop.permute.xlu1 %991  ;;  %v866_v57 = vpop.permute.xlu0 %865 }
 0x108   : > { %v1130_v37 = vsel %vm1105_vm2, %v1097_v55, %v992_v56  ;;  %v1098_v25 = vsel %vm1072_vm1, %v1065_v40, %v866_v57 }
 0x109   : > { %8627 = vmatprep.mubr.msk.f32.mxu1 %vm1153_vm3, %v1130_v37 }
 0x10b   : > { %v960_v62 = vpop.permute.xlu1 %959  ;;  %v834_v63 = vpop.permute.xlu0 %833 }
 0x10c   : > { %v1114_v61 = vsel %vm1105_vm2, %v1081_v59, %v960_v62  ;;  %v1082_v4 = vsel %vm1072_vm1, %v1049_v41, %v834_v63 }
 0x10d   : > { %8603 = vmatprep.mubr.msk.f32.mxu0 %vm1153_vm3, %v1114_v61 }
 0x10f   : > { %v740_v0 = vpop.permute.xlu1 %739  ;;  %v994_v2 = vpop.permute.xlu0 %993 }
 0x110   : > { %v1131_v11 = vsel %vm1105_vm2, %v1098_v25, %v994_v2  ;;  %v1066_v14 = vsel %vm1039_vm0, %v10826_v48, %v740_v0 }
 0x111   : > { %8628 = vmatmul.mubr.msk.f32.gmra.mrb[8].mxu1 %vm1153_vm3, %v1131_v11 }
 0x113   : > { %v708_v27 = vpop.permute.xlu1 %707  ;;  %v962_v5 = vpop.permute.xlu0 %961 }
 0x114   : > { %v1115_v6 = vsel %vm1105_vm2, %v1082_v4, %v962_v5  ;;  %v1050_v19 = vsel %vm1039_vm0, %v10832_v49, %v708_v27 }
 0x115   : > { %8604 = vmatmul.mubr.msk.f32.gmra.mrb[8].mxu0 %vm1153_vm3, %v1115_v6 }
 0x117   : > { %v868_v43 = vpop.permute.xlu1 %867  ;;  %v742_v7 = vpop.permute.xlu0 %741 }
 0x118   : > { %v1099_v8 = vsel %vm1072_vm1, %v1066_v14, %v868_v43  ;;  %v1067_v48 = vsel %vm1039_vm0, %v10839_v51, %v742_v7 }
 0x11b   : > { %v836_v13 = vpop.permute.xlu1 %835  ;;  %v710_v10 = vpop.permute.xlu0 %709 }
 0x11c   : > { %v1083_v20 = vsel %vm1072_vm1, %v1050_v19, %v836_v13  ;;  %v1051_v49 = vsel %vm1039_vm0, %v10846_v53, %v710_v10 }
 0x11f   : > { %v996_v29 = vpop.permute.xlu1 %995  ;;  %v870_v17 = vpop.permute.xlu0 %869 }
 0x120   : > { %v1132_v45 = vsel %vm1105_vm2, %v1099_v8, %v996_v29  ;;  %v1100_v22 = vsel %vm1072_vm1, %v1067_v48, %v870_v17 }
 0x121   : > { %8630 = vmatprep.mubr.msk.f32.mxu1 %vm1153_vm3, %v1132_v45 }
 0x123   : > { %v964_v21 = vpop.permute.xlu1 %963  ;;  %v838_v16 = vpop.permute.xlu0 %837 }
 0x124   : > { %v1116_v9 = vsel %vm1105_vm2, %v1083_v20, %v964_v21  ;;  %v1084_v32 = vsel %vm1072_vm1, %v1051_v49, %v838_v16 }
 0x125   : > { %8606 = vmatprep.mubr.msk.f32.mxu0 %vm1153_vm3, %v1116_v9 }
 0x127   : > { %v744_v26 = vpop.permute.xlu1 %743  ;;  %v998_v28 = vpop.permute.xlu0 %997 }
 0x128   : > { %v1133_v30 = vsel %vm1105_vm2, %v1100_v22, %v998_v28  ;;  %v1068_v39 = vsel %vm1039_vm0, %v10858_v60, %v744_v26 }
 0x129   : > { %8631 = vmatmul.mubr.msk.f32.gmra.mrb[10].mxu1 %vm1153_vm3, %v1133_v30 }
 0x12b   : > { %v712_v31 = vpop.permute.xlu1 %711  ;;  %v966_v34 = vpop.permute.xlu0 %965 }
 0x12c   : > { %v1117_v36 = vsel %vm1105_vm2, %v1084_v32, %v966_v34  ;;  %v1052_v46 = vsel %vm1039_vm0, %v10869_v1, %v712_v31 }
 0x12d   : > { %8607 = vmatmul.mubr.msk.f32.gmra.mrb[10].mxu0 %vm1153_vm3, %v1117_v36 }
 0x12f   : > { %v872_v51 = vpop.permute.xlu1 %871  ;;  %v746_v38 = vpop.permute.xlu0 %745 }
 0x130   : > { %v1101_v42 = vsel %vm1072_vm1, %v1068_v39, %v872_v51  ;;  %v1069_v60 = vsel %vm1039_vm0, %v10881_v12, %v746_v38 }
 0x133   : > { %v840_v33 = vpop.permute.xlu1 %839  ;;  %v714_v18 = vpop.permute.xlu0 %713 }
 0x134   : > { %v1085_v47 = vsel %vm1072_vm1, %v1052_v46, %v840_v33  ;;  %v1053_v1 = vsel %vm1039_vm0, %v10896_v23, %v714_v18 }
 0x137   : > { %v1000_v44 = vpop.permute.xlu1 %999  ;;  %v874_v35 = vpop.permute.xlu0 %873 }
 0x138   : > { %v1134_v53 = vsel %vm1105_vm2, %v1101_v42, %v1000_v44  ;;  %v1102_v56 = vsel %vm1072_vm1, %v1069_v60, %v874_v35 }
 0x139   : > { %8633 = vmatprep.mubr.msk.f32.mxu1 %vm1153_vm3, %v1134_v53 }
 0x13b   : > { %v968_v50 = vpop.permute.xlu1 %967  ;;  %v842_v52 = vpop.permute.xlu0 %841 }
 0x13c   : > { %v1118_v55 = vsel %vm1105_vm2, %v1085_v47, %v968_v50  ;;  %v1086_v59 = vsel %vm1072_vm1, %v1053_v1, %v842_v52 }
 0x13d   : > { %8609 = vmatprep.mubr.msk.f32.mxu0 %vm1153_vm3, %v1118_v55 }
 0x13f   : > { %v748_v57 = vpop.permute.xlu1 %747  ;;  %v1002_v37 = vpop.permute.xlu0 %1001 }
 0x140   : > { %v1135_v24 = vsel %vm1105_vm2, %v1102_v56, %v1002_v37  ;;  %v1070_v2 = vsel %vm1039_vm0, %v10916_v54, %v748_v57 }
 0x141   : > { %8634 = vmatmul.mubr.msk.f32.gmra.mrb[12].mxu1 %vm1153_vm3, %v1135_v24 }
 0x143   : > { %v716_v62 = vpop.permute.xlu1 %715  ;;  %v970_v63 = vpop.permute.xlu0 %969 }
 0x144   : > { %v1119_v61 = vsel %vm1105_vm2, %v1086_v59, %v970_v63  ;;  %v1054_v27 = vsel %vm1039_vm0, %v10924_v58, %v716_v62 }
 0x145   : > { %8610 = vmatmul.mubr.msk.f32.gmra.mrb[12].mxu0 %vm1153_vm3, %v1119_v61  ;;  %v1605_v61 = vld [vmem:[%s13529_s3 + $0x8] sm:$0xff] }
 0x147   : > { %v876_v12 = vpop.permute.xlu1 %875  ;;  %v750_v40 = vpop.permute.xlu0 %749 }
 0x148   : > { %v1103_v11 = vsel %vm1072_vm1, %v1070_v2, %v876_v12  ;;  %v1071_v54 = vsel %vm1039_vm0, %v10936_v3, %v750_v40  ;;  %v11108_v3 = vld [vmem:[%s13527_s2] ss:$0 sm:$0xff] }
 0x14b   : > { %v844_v25 = vpop.permute.xlu1 %843  ;;  %v718_v0 = vpop.permute.xlu0 %717 }
 0x14c   : > { %v1087_v5 = vsel %vm1072_vm1, %v1054_v27, %v844_v25  ;;  %v1055_v13 = vsel %vm1039_vm0, %v10948_v15, %v718_v0  ;;  %v7073_v0 = vld [vmem:[%s13529_s3 + $0x108] sm:$0xff] }
 0x14f   : > { %v1004_v41 = vpop.permute.xlu1 %1003  ;;  %v878_v4 = vpop.permute.xlu0 %877 }
 0x150   : > { %v1136_v23 = vsel %vm1105_vm2, %v1103_v11, %v1004_v41  ;;  %v1104_v10 = vsel %vm1072_vm1, %v1071_v54, %v878_v4 }
 0x151   : > { %8636 = vmatprep.mubr.msk.f32.mxu1 %vm1153_vm3, %v1136_v23 }
 0x153   : > { %v972_v6 = vpop.permute.xlu1 %971  ;;  %v846_v43 = vpop.permute.xlu0 %845 }
 0x154   : > { %v1120_v7 = vsel %vm1105_vm2, %v1087_v5, %v972_v6  ;;  %v1088_v14 = vsel %vm1072_vm1, %v1055_v13, %v846_v43 }
 0x155   : > { %8612 = vmatprep.mubr.msk.f32.mxu0 %vm1153_vm3, %v1120_v7 }
 0x157   : > { %v974_v58 = vpop.permute.xlu1 %973  ;;  %v1006_v8 = vpop.permute.xlu0 %1005 }
 0x158   : > { %v1121_v29 = vsel %vm1105_vm2, %v1088_v14, %v974_v58  ;;  %v1137_v17 = vsel %vm1105_vm2, %v1104_v10, %v1006_v8 }
 0x159   : > { %8613 = vmatmul.mubr.msk.f32.gmra.mrb[14].mxu0 %vm1153_vm3, %v1121_v29  ;;  %8637 = vmatmul.mubr.msk.f32.gmra.mrb[14].mxu1 %vm1153_vm3, %v1137_v17 }
 0x15a   : > { %1684 = vmatprep.mubr.f32.mxu1 %v1605_v61  ;;  %1928 = vmatprep.mubr.f32.mxu0 %v7073_v0 }
 0x185   : > { %v8617_v15 = vpop.f32.mrb[0].mxu1 }
 0x186   : > { %v1402_v45 = vadd.f32 %v8617_v15, %v11108_v3  ;;  %v1396_v19 = vpop.f32.mrb[1].mxu1 }
 0x187   : > { %v1397_v20 = vadd.f32 %v11108_v3, %v1396_v19 }
 0x188   : > { %vm1492_vm4 = vcmp.ge.f32.partialorder %v1402_v45, 0.0  ;;  %v1524_v21 = vmul.f32 0.01, %v1402_v45 }
 0x189   : > { %vm1491_vm6 = vcmp.ge.f32.partialorder %v1397_v20, 0.0  ;;  %v1523_v16 = vmul.f32 0.01, %v1397_v20  ;;  %v8593_v9 = vpop.f32.mrb[0].mxu0 }
 0x18a   : > { %v1556_v48 = vsel %vm1492_vm4, %v1402_v45, %v1524_v21  ;;  %v1322_v22 = vadd.f32 %v8593_v9, %v11108_v3  ;;  %v1316_v26 = vpop.f32.mrb[1].mxu0 }
 0x18b   : > { %1589 = vst.msk [vmem:[%s11116_s17 + $0x88] sm:$0xff] %vm1571_vm5, %v1556_v48  ;;  %v1555_v28 = vsel %vm1491_vm6, %v1397_v20, %v1523_v16  ;;  %v1317_v30 = vadd.f32 %v11108_v3, %v1316_v26 }
 0x18c   : > { %1588 = vst.msk [vmem:[%s11116_s17 + $0x80] sm:$0xff] %vm1571_vm5, %v1555_v28  ;;  %v11124_v49 = vpack.c.bf16 %v1556_v48, %v1555_v28  ;;  %vm1476_vm7 = vcmp.ge.f32.partialorder %v1322_v22, 0.0  ;;  %v1508_v32 = vmul.f32 0.01, %v1322_v22 }
 0x18d   : > { %vm1475_vm8 = vcmp.ge.f32.partialorder %v1317_v30, 0.0  ;;  %v1507_v31 = vmul.f32 0.01, %v1317_v30 }
 0x18e   : > { %v1540_v34 = vsel %vm1476_vm7, %v1322_v22, %v1508_v32  ;;  %9067 = vmatprep.subr.bf16.mxu1 %v11124_v49  ;;  %9131 = vmatprep.subr.bf16.mxu0 %v11124_v49 }
 0x18f   : > { %1573 = vst.msk [vmem:[%s11116_s17 + $0x8] sm:$0xff] %vm1571_vm5, %v1540_v34  ;;  %v1539_v36 = vsel %vm1475_vm8, %v1317_v30, %v1507_v31 }
 0x190   : > { %1572 = vst.msk [vmem:[%s11116_s17] sm:$0xff] %vm1571_vm5, %v1539_v36  ;;  %v11132_v51 = vpack.c.bf16 %v1540_v34, %v1539_v36 }
 0x192   : > { %9069 = vmatpush3.bf16.msra.mxu1 %v11132_v51  ;;  %9133 = vmatpush3.bf16.msra.mxu0 %v11132_v51 }
 0x19d   : > { %v8620_v38 = vpop.f32.mrb[2].mxu1 }
 0x19e   : > { %v1412_v33 = vadd.f32 %v8620_v38, %v11108_v3  ;;  %v1406_v18 = vpop.f32.mrb[3].mxu1 }
 0x19f   : > { %v1407_v39 = vadd.f32 %v11108_v3, %v1406_v18 }
 0x1a0   : > { %vm1494_vm9 = vcmp.ge.f32.partialorder %v1412_v33, 0.0  ;;  %v1526_v42 = vmul.f32 0.01, %v1412_v33 }
 0x1a1   : > { %vm1493_vm10 = vcmp.ge.f32.partialorder %v1407_v39, 0.0  ;;  %v1525_v44 = vmul.f32 0.01, %v1407_v39  ;;  %v8596_v35 = vpop.f32.mrb[2].mxu0 }
 0x1a2   : > { %v1558_v53 = vsel %vm1494_vm9, %v1412_v33, %v1526_v42  ;;  %v1332_v46 = vadd.f32 %v8596_v35, %v11108_v3  ;;  %v1326_v47 = vpop.f32.mrb[3].mxu0 }
 0x1a3   : > { %1591 = vst.msk [vmem:[%s11116_s17 + $0x98] sm:$0xff] %vm1571_vm5, %v1558_v53  ;;  %v1557_v50 = vsel %vm1493_vm10, %v1407_v39, %v1525_v44  ;;  %v1327_v52 = vadd.f32 %v11108_v3, %v1326_v47 }
 0x1a4   : > { %1590 = vst.msk [vmem:[%s11116_s17 + $0x90] sm:$0xff] %vm1571_vm5, %v1557_v50  ;;  %v11144_v55 = vpack.c.bf16 %v1558_v53, %v1557_v50  ;;  %vm1478_vm11 = vcmp.ge.f32.partialorder %v1332_v46, 0.0  ;;  %v1510_v60 = vmul.f32 0.01, %v1332_v46 }
 0x1a5   : > { %vm1477_vm12 = vcmp.ge.f32.partialorder %v1327_v52, 0.0  ;;  %v1509_v56 = vmul.f32 0.01, %v1327_v52 }
 0x1a6   : > { %v1542_v57 = vsel %vm1478_vm11, %v1332_v46, %v1510_v60  ;;  %9071 = vmatprep.subr.bf16.mxu1 %v11144_v55  ;;  %9135 = vmatprep.subr.bf16.mxu0 %v11144_v55 }
 0x1a7   : > { %1575 = vst.msk [vmem:[%s11116_s17 + $0x18] sm:$0xff] %vm1571_vm5, %v1542_v57  ;;  %v1541_v37 = vsel %vm1477_vm12, %v1327_v52, %v1509_v56 }
 0x1a8   : > { %1574 = vst.msk [vmem:[%s11116_s17 + $0x10] sm:$0xff] %vm1571_vm5, %v1541_v37  ;;  %v11152_v24 = vpack.c.bf16 %v1542_v57, %v1541_v37 }
 0x1aa   : > { %9073 = vmatpush3.bf16.msra.mxu1 %v11152_v24  ;;  %9137 = vmatpush3.bf16.msra.mxu0 %v11152_v24 }
 0x1b5   : > { %v8623_v1 = vpop.f32.mrb[4].mxu1 }
 0x1b6   : > { %v1422_v59 = vadd.f32 %v8623_v1, %v11108_v3  ;;  %v1416_v62 = vpop.f32.mrb[5].mxu1 }
 0x1b7   : > { %v1417_v63 = vadd.f32 %v11108_v3, %v1416_v62 }
 0x1b8   : > { %vm1496_vm13 = vcmp.ge.f32.partialorder %v1422_v59, 0.0  ;;  %v1528_v12 = vmul.f32 0.01, %v1422_v59 }
 0x1b9   : > { %vm1495_vm14 = vcmp.ge.f32.partialorder %v1417_v63, 0.0  ;;  %v1527_v40 = vmul.f32 0.01, %v1417_v63  ;;  %v8599_v25 = vpop.f32.mrb[4].mxu0 }
 0x1ba   : > { %v1560_v2 = vsel %vm1496_vm13, %v1422_v59, %v1528_v12  ;;  %v1342_v11 = vadd.f32 %v8599_v25, %v11108_v3  ;;  %v1336_v41 = vpop.f32.mrb[5].mxu0 }
 0x1bb   : > { %1593 = vst.msk [vmem:[%s11116_s17 + $0xa8] sm:$0xff] %vm1571_vm5, %v1560_v2  ;;  %v1559_v4 = vsel %vm1495_vm14, %v1417_v63, %v1527_v40  ;;  %v1337_v23 = vadd.f32 %v11108_v3, %v1336_v41 }
 0x1bc   : > { %1592 = vst.msk [vmem:[%s11116_s17 + $0xa0] sm:$0xff] %vm1571_vm5, %v1559_v4  ;;  %v11170_v27 = vpack.c.bf16 %v1560_v2, %v1559_v4  ;;  %vm1480_vm15 = vcmp.ge.f32.partialorder %v1342_v11, 0.0  ;;  %v1512_v5 = vmul.f32 0.01, %v1342_v11 }
 0x1bd   : > { %vm1479_vm4 = vcmp.ge.f32.partialorder %v1337_v23, 0.0  ;;  %v1511_v6 = vmul.f32 0.01, %v1337_v23 }
 0x1be   : > { %v1544_v43 = vsel %vm1480_vm15, %v1342_v11, %v1512_v5  ;;  %9075 = vmatprep.subr.bf16.mxu1 %v11170_v27  ;;  %9139 = vmatprep.subr.bf16.mxu0 %v11170_v27 }
 0x1bf   : > { %1577 = vst.msk [vmem:[%s11116_s17 + $0x28] sm:$0xff] %vm1571_vm5, %v1544_v43  ;;  %v1543_v7 = vsel %vm1479_vm4, %v1337_v23, %v1511_v6 }
 0x1c0   : > { %1576 = vst.msk [vmem:[%s11116_s17 + $0x20] sm:$0xff] %vm1571_vm5, %v1543_v7  ;;  %v11178_v54 = vpack.c.bf16 %v1544_v43, %v1543_v7 }
 0x1c2   : > { %9077 = vmatpush3.bf16.msra.mxu1 %v11178_v54  ;;  %9141 = vmatpush3.bf16.msra.mxu0 %v11178_v54 }
 0x1cc   : > { %v8626_v13 = vpop.f32.mrb[6].mxu1 }
 0x1cd   : > { %v1432_v10 = vadd.f32 %v8626_v13, %v11108_v3  ;;  %v1426_v14 = vpop.f32.mrb[7].mxu1 }
 0x1ce   : > { %v1427_v58 = vadd.f32 %v11108_v3, %v1426_v14 }
 0x1cf   : > { %vm1498_vm6 = vcmp.ge.f32.partialorder %v1432_v10, 0.0  ;;  %v1530_v8 = vmul.f32 0.01, %v1432_v10 }
 0x1d0   : > { %vm1497_vm7 = vcmp.ge.f32.partialorder %v1427_v58, 0.0  ;;  %v1529_v29 = vmul.f32 0.01, %v1427_v58  ;;  %v8602_v17 = vpop.f32.mrb[6].mxu0 }
 0x1d1   : > { %v1562_v15 = vsel %vm1498_vm6, %v1432_v10, %v1530_v8  ;;  %v1352_v45 = vadd.f32 %v8602_v17, %v11108_v3  ;;  %v1346_v19 = vpop.f32.mrb[7].mxu0 }
 0x1d2   : > { %1595 = vst.msk [vmem:[%s11116_s17 + $0xb8] sm:$0xff] %vm1571_vm5, %v1562_v15  ;;  %v1561_v20 = vsel %vm1497_vm7, %v1427_v58, %v1529_v29  ;;  %v1347_v21 = vadd.f32 %v11108_v3, %v1346_v19 }
 0x1d3   : > { %1594 = vst.msk [vmem:[%s11116_s17 + $0xb0] sm:$0xff] %vm1571_vm5, %v1561_v20  ;;  %v11190_v16 = vpack.c.bf16 %v1562_v15, %v1561_v20  ;;  %vm1482_vm8 = vcmp.ge.f32.partialorder %v1352_v45, 0.0  ;;  %v1514_v9 = vmul.f32 0.01, %v1352_v45 }
 0x1d4   : > { %vm1481_vm9 = vcmp.ge.f32.partialorder %v1347_v21, 0.0  ;;  %v1513_v48 = vmul.f32 0.01, %v1347_v21 }
 0x1d5   : > { %v1546_v22 = vsel %vm1482_vm8, %v1352_v45, %v1514_v9  ;;  %9079 = vmatprep.subr.bf16.mxu1 %v11190_v16  ;;  %9143 = vmatprep.subr.bf16.mxu0 %v11190_v16 }
 0x1d6   : > { %1579 = vst.msk [vmem:[%s11116_s17 + $0x38] sm:$0xff] %vm1571_vm5, %v1546_v22  ;;  %v1545_v26 = vsel %vm1481_vm9, %v1347_v21, %v1513_v48 }
 0x1d7   : > { %1578 = vst.msk [vmem:[%s11116_s17 + $0x30] sm:$0xff] %vm1571_vm5, %v1545_v26  ;;  %v11198_v28 = vpack.c.bf16 %v1546_v22, %v1545_v26 }
 0x1d9   : > { %9081 = vmatpush3.bf16.msra.mxu1 %v11198_v28  ;;  %9145 = vmatpush3.bf16.msra.mxu0 %v11198_v28 }
 0x1e4   : > { %v8629_v30 = vpop.f32.mrb[8].mxu1 }
 0x1e5   : > { %v1442_v32 = vadd.f32 %v8629_v30, %v11108_v3  ;;  %v1436_v31 = vpop.f32.mrb[9].mxu1 }
 0x1e6   : > { %v1437_v34 = vadd.f32 %v11108_v3, %v1436_v31 }
 0x1e7   : > { %vm1500_vm10 = vcmp.ge.f32.partialorder %v1442_v32, 0.0  ;;  %v1532_v36 = vmul.f32 0.01, %v1442_v32 }
 0x1e8   : > { %vm1499_vm11 = vcmp.ge.f32.partialorder %v1437_v34, 0.0  ;;  %v1531_v38 = vmul.f32 0.01, %v1437_v34  ;;  %v8605_v33 = vpop.f32.mrb[8].mxu0 }
 0x1e9   : > { %v1564_v18 = vsel %vm1500_vm10, %v1442_v32, %v1532_v36  ;;  %v1362_v39 = vadd.f32 %v8605_v33, %v11108_v3  ;;  %v1356_v42 = vpop.f32.mrb[9].mxu0 }
 0x1ea   : > { %1597 = vst.msk [vmem:[%s11116_s17 + $0xc8] sm:$0xff] %vm1571_vm5, %v1564_v18  ;;  %v1563_v44 = vsel %vm1499_vm11, %v1437_v34, %v1531_v38  ;;  %v1357_v35 = vadd.f32 %v11108_v3, %v1356_v42 }
 0x1eb   : > { %1596 = vst.msk [vmem:[%s11116_s17 + $0xc0] sm:$0xff] %vm1571_vm5, %v1563_v44  ;;  %v11210_v53 = vpack.c.bf16 %v1564_v18, %v1563_v44  ;;  %vm1484_vm12 = vcmp.ge.f32.partialorder %v1362_v39, 0.0  ;;  %v1516_v46 = vmul.f32 0.01, %v1362_v39 }
 0x1ec   : > { %vm1483_vm13 = vcmp.ge.f32.partialorder %v1357_v35, 0.0  ;;  %v1515_v47 = vmul.f32 0.01, %v1357_v35 }
 0x1ed   : > { %v1548_v50 = vsel %vm1484_vm12, %v1362_v39, %v1516_v46  ;;  %9083 = vmatprep.subr.bf16.mxu1 %v11210_v53  ;;  %9147 = vmatprep.subr.bf16.mxu0 %v11210_v53 }
 0x1ee   : > { %1581 = vst.msk [vmem:[%s11116_s17 + $0x48] sm:$0xff] %vm1571_vm5, %v1548_v50  ;;  %v1547_v52 = vsel %vm1483_vm13, %v1357_v35, %v1515_v47 }
 0x1ef   : > { %1580 = vst.msk [vmem:[%s11116_s17 + $0x40] sm:$0xff] %vm1571_vm5, %v1547_v52  ;;  %v11218_v60 = vpack.c.bf16 %v1548_v50, %v1547_v52 }
 0x1f1   : > { %9085 = vmatpush3.bf16.msra.mxu1 %v11218_v60  ;;  %9149 = vmatpush3.bf16.msra.mxu0 %v11218_v60 }
 0x1fc   : > { %v8632_v56 = vpop.f32.mrb[10].mxu1 }
 0x1fd   : > { %v1452_v57 = vadd.f32 %v8632_v56, %v11108_v3  ;;  %v1446_v37 = vpop.f32.mrb[11].mxu1  ;;  %v1604_v56 = vld [vmem:[%s13529_s3] sm:$0xff] }
 0x1fe   : > { %v1447_v1 = vadd.f32 %v11108_v3, %v1446_v37  ;;  %v1607_v37 = vld [vmem:[%s13529_s3 + $0x18] sm:$0xff] }
 0x1ff   : > { %vm1502_vm14 = vcmp.ge.f32.partialorder %v1452_v57, 0.0  ;;  %v1534_v59 = vmul.f32 0.01, %v1452_v57 }
 0x200   : > { %vm1501_vm15 = vcmp.ge.f32.partialorder %v1447_v1, 0.0  ;;  %v1533_v62 = vmul.f32 0.01, %v1447_v1  ;;  %v8608_v63 = vpop.f32.mrb[10].mxu0 }
 0x201   : > { %v1566_v61 = vsel %vm1502_vm14, %v1452_v57, %v1534_v59  ;;  %v1372_v12 = vadd.f32 %v8608_v63, %v11108_v3  ;;  %v1366_v40 = vpop.f32.mrb[11].mxu0  ;;  %v7072_v57 = vld [vmem:[%s13529_s3 + $0x100] sm:$0xff]  ;;  %v1606_v59 = vld [vmem:[%s13529_s3 + $0x10] sm:$0xff]  ;;  %v1609_v63 = vld [vmem:[%s13529_s3 + $0x28] sm:$0xff] }
 0x202   : > { %1599 = vst.msk [vmem:[%s11116_s17 + $0xd8] sm:$0xff] %vm1571_vm5, %v1566_v61  ;;  %v1565_v25 = vsel %vm1501_vm15, %v1447_v1, %v1533_v62  ;;  %v1367_v0 = vadd.f32 %v11108_v3, %v1366_v40  ;;  %v7075_v1 = vld [vmem:[%s13529_s3 + $0x118] sm:$0xff]  ;;  %v7074_v62 = vld [vmem:[%s13529_s3 + $0x110] sm:$0xff]  ;;  %v7076_v40 = vld [vmem:[%s13529_s3 + $0x120] sm:$0xff]  ;;  %vm4068_vm15 = vcmask 326656  }
 0x203   : > { %1598 = vst.msk [vmem:[%s11116_s17 + $0xd0] sm:$0xff] %vm1571_vm5, %v1565_v25  ;;  %v11230_v2 = vpack.c.bf16 %v1566_v61, %v1565_v25  ;;  %vm1486_vm4 = vcmp.ge.f32.partialorder %v1372_v12, 0.0  ;;  %v1518_v11 = vmul.f32 0.01, %v1372_v12  ;;  %v7077_v61 = vld [vmem:[%s13529_s3 + $0x128] sm:$0xff]  ;;  %v1611_v25 = vld [vmem:[%s13529_s3 + $0x38] sm:$0xff] }
 0x204   : > { %vm1485_vm6 = vcmp.ge.f32.partialorder %v1367_v0, 0.0  ;;  %v1517_v41 = vmul.f32 0.01, %v1367_v0 }
 0x205   : > { %v1550_v4 = vsel %vm1486_vm4, %v1372_v12, %v1518_v11  ;;  %9087 = vmatprep.subr.bf16.mxu1 %v11230_v2  ;;  %9151 = vmatprep.subr.bf16.mxu0 %v11230_v2  ;;  %v1608_v12 = vld [vmem:[%s13529_s3 + $0x20] sm:$0xff]  ;;  %v1610_v11 = vld [vmem:[%s13529_s3 + $0x30] sm:$0xff]  ;;  %vm4085_vm4 = vcmask 457728  }
 0x206   : > { %1583 = vst.msk [vmem:[%s11116_s17 + $0x58] sm:$0xff] %vm1571_vm5, %v1550_v4  ;;  %v1549_v23 = vsel %vm1485_vm6, %v1367_v0, %v1517_v41  ;;  %v7079_v0 = vld [vmem:[%s13529_s3 + $0x138] sm:$0xff]  ;;  %v7078_v41 = vld [vmem:[%s13529_s3 + $0x130] sm:$0xff]  ;;  %vm4102_vm6 = vcmask 588800  }
 0x207   : > { %1582 = vst.msk [vmem:[%s11116_s17 + $0x50] sm:$0xff] %vm1571_vm5, %v1549_v23  ;;  %v11238_v5 = vpack.c.bf16 %v1550_v4, %v1549_v23  ;;  %v1613_v4 = vld [vmem:[%s13529_s3 + $0x48] sm:$0xff] }
 0x208   : > { %v7081_v23 = vld [vmem:[%s13529_s3 + $0x148] sm:$0xff] }
 0x209   : > { %9089 = vmatpush3.bf16.msra.mxu1 %v11238_v5  ;;  %9153 = vmatpush3.bf16.msra.mxu0 %v11238_v5 }
 0x214   : > { %v8635_v6 = vpop.f32.mrb[12].mxu1 }
 0x215   : > { %v1462_v43 = vadd.f32 %v8635_v6, %v11108_v3  ;;  %v1456_v7 = vpop.f32.mrb[13].mxu1  ;;  %v1612_v6 = vld [vmem:[%s13529_s3 + $0x40] sm:$0xff] }
 0x216   : > { %v1457_v13 = vadd.f32 %v11108_v3, %v1456_v7  ;;  %v1615_v7 = vld [vmem:[%s13529_s3 + $0x58] sm:$0xff] }
 0x217   : > { %vm1504_vm7 = vcmp.ge.f32.partialorder %v1462_v43, 0.0  ;;  %v1536_v10 = vmul.f32 0.01, %v1462_v43 }
 0x218   : > { %vm1503_vm8 = vcmp.ge.f32.partialorder %v1457_v13, 0.0  ;;  %v1535_v14 = vmul.f32 0.01, %v1457_v13  ;;  %v8611_v58 = vpop.f32.mrb[12].mxu0 }
 0x219   : > { %v1568_v8 = vsel %vm1504_vm7, %v1462_v43, %v1536_v10  ;;  %v1382_v29 = vadd.f32 %v8611_v58, %v11108_v3  ;;  %v1376_v17 = vpop.f32.mrb[13].mxu0  ;;  %v7080_v43 = vld [vmem:[%s13529_s3 + $0x140] sm:$0xff]  ;;  %v1614_v10 = vld [vmem:[%s13529_s3 + $0x50] sm:$0xff]  ;;  %v1617_v58 = vld [vmem:[%s13529_s3 + $0x68] sm:$0xff]  ;;  %vm4111_vm7 = vcmask 654336  }
 0x21a   : > { %1601 = vst.msk [vmem:[%s11116_s17 + $0xe8] sm:$0xff] %vm1571_vm5, %v1568_v8  ;;  %v1567_v15 = vsel %vm1503_vm8, %v1457_v13, %v1535_v14  ;;  %v1377_v45 = vadd.f32 %v11108_v3, %v1376_v17  ;;  %v7083_v13 = vld [vmem:[%s13529_s3 + $0x158] sm:$0xff]  ;;  %v7082_v14 = vld [vmem:[%s13529_s3 + $0x150] sm:$0xff]  ;;  %v7084_v17 = vld [vmem:[%s13529_s3 + $0x160] sm:$0xff]  ;;  %vm4120_vm8 = vcmask 719872  }
 0x21b   : > { %1600 = vst.msk [vmem:[%s11116_s17 + $0xe0] sm:$0xff] %vm1571_vm5, %v1567_v15  ;;  %v11250_v19 = vpack.c.bf16 %v1568_v8, %v1567_v15  ;;  %vm1488_vm9 = vcmp.ge.f32.partialorder %v1382_v29, 0.0  ;;  %v1520_v20 = vmul.f32 0.01, %v1382_v29  ;;  %v7085_v8 = vld [vmem:[%s13529_s3 + $0x168] sm:$0xff]  ;;  %v1619_v15 = vld [vmem:[%s13529_s3 + $0x78] sm:$0xff] }
 0x21c   : > { %vm1487_vm10 = vcmp.ge.f32.partialorder %v1377_v45, 0.0  ;;  %v1519_v21 = vmul.f32 0.01, %v1377_v45 }
 0x21d   : > { %v1552_v9 = vsel %vm1488_vm9, %v1382_v29, %v1520_v20  ;;  %9091 = vmatprep.subr.bf16.mxu1 %v11250_v19  ;;  %9155 = vmatprep.subr.bf16.mxu0 %v11250_v19  ;;  %v1616_v29 = vld [vmem:[%s13529_s3 + $0x60] sm:$0xff]  ;;  %v1618_v20 = vld [vmem:[%s13529_s3 + $0x70] sm:$0xff]  ;;  %vm4129_vm9 = vcmask 785408  }
 0x21e   : > { %1585 = vst.msk [vmem:[%s11116_s17 + $0x68] sm:$0xff] %vm1571_vm5, %v1552_v9  ;;  %v1551_v48 = vsel %vm1487_vm10, %v1377_v45, %v1519_v21  ;;  %v7087_v45 = vld [vmem:[%s13529_s3 + $0x178] sm:$0xff]  ;;  %v7086_v21 = vld [vmem:[%s13529_s3 + $0x170] sm:$0xff]  ;;  %vm4138_vm10 = vcmask 850944  }
 0x21f   : > { %1584 = vst.msk [vmem:[%s11116_s17 + $0x60] sm:$0xff] %vm1571_vm5, %v1551_v48  ;;  %v11258_v22 = vpack.c.bf16 %v1552_v9, %v1551_v48  ;;  %v7057_v9 = vld [vmem:[%s13529_s3 + $0x88] sm:$0xff] }
 0x220   : > { %v7105_v48 = vld [vmem:[%s13529_s3 + $0x208] sm:$0xff] }
 0x221   : > { %9093 = vmatpush3.bf16.msra.mxu1 %v11258_v22  ;;  %9157 = vmatpush3.bf16.msra.mxu0 %v11258_v22 }
 0x22c   : > { %v8614_v26 = vpop.f32.mrb[14].mxu0  ;;  %v8638_v30 = vpop.f32.mrb[14].mxu1 }
 0x22d   : > { %v1392_v32 = vadd.f32 %v8614_v26, %v11108_v3  ;;  %v1472_v31 = vadd.f32 %v8638_v30, %v11108_v3  ;;  %v1386_v34 = vpop.f32.mrb[15].mxu0  ;;  %v1466_v36 = vpop.f32.mrb[15].mxu1  ;;  %v7056_v26 = vld [vmem:[%s13529_s3 + $0x80] sm:$0xff] }
 0x22e   : > { %v1387_v38 = vadd.f32 %v11108_v3, %v1386_v34  ;;  %v1467_v33 = vadd.f32 %v11108_v3, %v1466_v36  ;;  %v7104_v30 = vld [vmem:[%s13529_s3 + $0x200] sm:$0xff]  ;;  %v7058_v34 = vld [vmem:[%s13529_s3 + $0x90] sm:$0xff] }
 0x22f   : > { %vm1490_vm11 = vcmp.ge.f32.partialorder %v1392_v32, 0.0  ;;  %v1522_v18 = vmul.f32 0.01, %v1392_v32  ;;  %vm1506_vm12 = vcmp.ge.f32.partialorder %v1472_v31, 0.0  ;;  %v1538_v39 = vmul.f32 0.01, %v1472_v31 }
 0x230   : > { %vm1489_vm13 = vcmp.ge.f32.partialorder %v1387_v38, 0.0  ;;  %v1521_v42 = vmul.f32 0.01, %v1387_v38  ;;  %vm1505_vm14 = vcmp.ge.f32.partialorder %v1467_v33, 0.0  ;;  %v1537_v44 = vmul.f32 0.01, %v1467_v33 }
 0x231   : > { %v1554_v35 = vsel %vm1490_vm11, %v1392_v32, %v1522_v18  ;;  %v1570_v46 = vsel %vm1506_vm12, %v1472_v31, %v1538_v39  ;;  %v7059_v32 = vld [vmem:[%s13529_s3 + $0x98] sm:$0xff]  ;;  %v7106_v36 = vld [vmem:[%s13529_s3 + $0x210] sm:$0xff]  ;;  %v7060_v18 = vld [vmem:[%s13529_s3 + $0xa0] sm:$0xff]  ;;  %vm4147_vm11 = vcmask 916480   ;;  %vm4156_vm12 = vcmask 982016  }
 0x232   : > { %1587 = vst.msk [vmem:[%s11116_s17 + $0x78] sm:$0xff] %vm1571_vm5, %v1554_v35  ;;  %1603 = vst.msk [vmem:[%s11116_s17 + $0xf8] sm:$0xff] %vm1571_vm5, %v1570_v46  ;;  %v1553_v47 = vsel %vm1489_vm13, %v1387_v38, %v1521_v42  ;;  %v1569_v50 = vsel %vm1505_vm14, %v1467_v33, %v1537_v44  ;;  %v7107_v31 = vld [vmem:[%s13529_s3 + $0x218] sm:$0xff]  ;;  %v7061_v38 = vld [vmem:[%s13529_s3 + $0xa8] sm:$0xff] }
 0x233   : > { %1586 = vst.msk [vmem:[%s11116_s17 + $0x70] sm:$0xff] %vm1571_vm5, %v1553_v47  ;;  %v11272_v3 = vpack.c.bf16 %v1554_v35, %v1553_v47  ;;  %1602 = vst.msk [vmem:[%s11116_s17 + $0xf0] sm:$0xff] %vm1571_vm5, %v1569_v50  ;;  %v11276_v52 = vpack.c.bf16 %v1570_v46, %v1569_v50  ;;  %v7109_v33 = vld [vmem:[%s13529_s3 + $0x228] sm:$0xff]  ;;  %v7108_v39 = vld [vmem:[%s13529_s3 + $0x220] sm:$0xff]  ;;  %s13532_s17 = smov 8  }
 0x234   : > { %v7063_v42 = vld [vmem:[%s13529_s3 + $0xb8] sm:$0xff]  ;;  %v7062_v35 = vld [vmem:[%s13529_s3 + $0xb0] sm:$0xff]  ;;  %v7065_v47 = vld [vmem:[%s13529_s3 + $0xc8] sm:$0xff] }
 0x235   : > { %9095 = vmatprep.subr.bf16.mxu1 %v11276_v52  ;;  %9159 = vmatprep.subr.bf16.mxu0 %v11276_v52  ;;  %v7111_v44 = vld [vmem:[%s13529_s3 + $0x238] sm:$0xff]  ;;  %v7110_v46 = vld [vmem:[%s13529_s3 + $0x230] sm:$0xff]  ;;  %v7113_v50 = vld [vmem:[%s13529_s3 + $0x248] sm:$0xff] }
 0x236   : > { %9097 = vmatpush3.bf16.msra.mxu1 %v11272_v3  ;;  %9161 = vmatpush3.bf16.msra.mxu0 %v11272_v3 }
 0x237   : > { %9099 = vmatprep.subr.bf16.mxu1 %v11124_v49  ;;  %9195 = vmatprep.subr.bf16.mxu0 %v11124_v49 }
 0x239   : > { %1685 = vmatmul.mubr.f32.vlgmr.msra.gmra.mrb[16].mxu1 %v1604_v56  ;;  %1929 = vmatmul.mubr.f32.vlgmr.msra.gmra.mrb[16].mxu0 %v7072_v57  ;;  %v7064_v56 = vld [vmem:[%s13529_s3 + $0xc0] sm:$0xff] }
 0x23a   : > { %9101 = vmatpush3.bf16.msra.mxu1 %v11132_v51  ;;  %9197 = vmatpush3.bf16.msra.mxu0 %v11132_v51  ;;  %v7112_v57 = vld [vmem:[%s13529_s3 + $0x240] sm:$0xff] }
 0x23b   : > { %9103 = vmatprep.subr.bf16.mxu1 %v11144_v55  ;;  %9199 = vmatprep.subr.bf16.mxu0 %v11144_v55 }
 0x23c   : > { %1689 = vmatprep.mubr.f32.mxu1 %v1607_v37  ;;  %1933 = vmatprep.mubr.f32.mxu0 %v7075_v1  ;;  %v7067_v37 = vld [vmem:[%s13529_s3 + $0xd8] sm:$0xff] }
 0x23d   : > { %1690 = vmatmul.mubr.f32.gmra.mrb[18].mxu1 %v1606_v59  ;;  %1934 = vmatmul.mubr.f32.gmra.mrb[18].mxu0 %v7074_v62  ;;  %v7115_v1 = vld [vmem:[%s13529_s3 + $0x258] sm:$0xff]  ;;  %v7066_v59 = vld [vmem:[%s13529_s3 + $0xd0] sm:$0xff] }
 0x23e   : > { %9105 = vmatpush3.bf16.msra.mxu1 %v11152_v24  ;;  %9201 = vmatpush3.bf16.msra.mxu0 %v11152_v24  ;;  %v7114_v62 = vld [vmem:[%s13529_s3 + $0x250] sm:$0xff] }
 0x23f   : > { %9107 = vmatprep.subr.bf16.mxu1 %v11170_v27  ;;  %9203 = vmatprep.subr.bf16.mxu0 %v11170_v27 }
 0x240   : > { %1694 = vmatprep.mubr.f32.mxu1 %v1609_v63  ;;  %1938 = vmatprep.mubr.f32.mxu0 %v7077_v61  ;;  %v7069_v63 = vld [vmem:[%s13529_s3 + $0xe8] sm:$0xff] }
 0x241   : > { %1695 = vmatmul.mubr.f32.gmra.mrb[20].mxu1 %v1608_v12  ;;  %1939 = vmatmul.mubr.f32.gmra.mrb[20].mxu0 %v7076_v40  ;;  %v7117_v61 = vld [vmem:[%s13529_s3 + $0x268] sm:$0xff]  ;;  %v7068_v12 = vld [vmem:[%s13529_s3 + $0xe0] sm:$0xff] }
 0x242   : > { %9109 = vmatpush3.bf16.msra.mxu1 %v11178_v54  ;;  %9205 = vmatpush3.bf16.msra.mxu0 %v11178_v54  ;;  %v7116_v40 = vld [vmem:[%s13529_s3 + $0x260] sm:$0xff] }
 0x243   : > { %9111 = vmatprep.subr.bf16.mxu1 %v11190_v16  ;;  %9207 = vmatprep.subr.bf16.mxu0 %v11190_v16 }
 0x244   : > { %1699 = vmatprep.mubr.f32.mxu1 %v1611_v25  ;;  %1943 = vmatprep.mubr.f32.mxu0 %v7079_v0  ;;  %v7071_v25 = vld [vmem:[%s13529_s3 + $0xf8] sm:$0xff] }
 0x245   : > { %1700 = vmatmul.mubr.f32.gmra.mrb[22].mxu1 %v1610_v11  ;;  %1944 = vmatmul.mubr.f32.gmra.mrb[22].mxu0 %v7078_v41  ;;  %v7119_v0 = vld [vmem:[%s13529_s3 + $0x278] sm:$0xff]  ;;  %v7070_v11 = vld [vmem:[%s13529_s3 + $0xf0] sm:$0xff] }
 0x246   : > { %9113 = vmatpush3.bf16.msra.mxu1 %v11198_v28  ;;  %9209 = vmatpush3.bf16.msra.mxu0 %v11198_v28  ;;  %v7118_v41 = vld [vmem:[%s13529_s3 + $0x270] sm:$0xff] }
 0x247   : > { %9115 = vmatprep.subr.bf16.mxu1 %v11210_v53  ;;  %9211 = vmatprep.subr.bf16.mxu0 %v11210_v53 }
 0x248   : > { %1704 = vmatprep.mubr.f32.mxu1 %v1613_v4  ;;  %1948 = vmatprep.mubr.f32.mxu0 %v7081_v23  ;;  %v7089_v4 = vld [vmem:[%s13529_s3 + $0x188] sm:$0xff] }
 0x249   : > { %1705 = vmatmul.mubr.f32.gmra.mrb[24].mxu1 %v1612_v6  ;;  %1949 = vmatmul.mubr.f32.gmra.mrb[24].mxu0 %v7080_v43  ;;  %v7137_v23 = vld [vmem:[%s13529_s3 + $0x308] sm:$0xff]  ;;  %v7088_v6 = vld [vmem:[%s13529_s3 + $0x180] sm:$0xff] }
 0x24a   : > { %9117 = vmatpush3.bf16.msra.mxu1 %v11218_v60  ;;  %9213 = vmatpush3.bf16.msra.mxu0 %v11218_v60  ;;  %v7136_v43 = vld [vmem:[%s13529_s3 + $0x300] sm:$0xff] }
 0x24b   : > { %9119 = vmatprep.subr.bf16.mxu1 %v11230_v2  ;;  %9215 = vmatprep.subr.bf16.mxu0 %v11230_v2 }
 0x24c   : > { %1709 = vmatprep.mubr.f32.mxu1 %v1615_v7  ;;  %1953 = vmatprep.mubr.f32.mxu0 %v7083_v13  ;;  %v7091_v7 = vld [vmem:[%s13529_s3 + $0x198] sm:$0xff] }
 0x24d   : > { %1710 = vmatmul.mubr.f32.gmra.mrb[26].mxu1 %v1614_v10  ;;  %1954 = vmatmul.mubr.f32.gmra.mrb[26].mxu0 %v7082_v14  ;;  %v7139_v13 = vld [vmem:[%s13529_s3 + $0x318] sm:$0xff]  ;;  %v7090_v10 = vld [vmem:[%s13529_s3 + $0x190] sm:$0xff] }
 0x24e   : > { %9121 = vmatpush3.bf16.msra.mxu1 %v11238_v5  ;;  %9217 = vmatpush3.bf16.msra.mxu0 %v11238_v5  ;;  %v7138_v14 = vld [vmem:[%s13529_s3 + $0x310] sm:$0xff] }
 0x24f   : > { %9123 = vmatprep.subr.bf16.mxu1 %v11250_v19  ;;  %9219 = vmatprep.subr.bf16.mxu0 %v11250_v19 }
 0x250   : > { %1714 = vmatprep.mubr.f32.mxu1 %v1617_v58  ;;  %1958 = vmatprep.mubr.f32.mxu0 %v7085_v8  ;;  %v7093_v58 = vld [vmem:[%s13529_s3 + $0x1a8] sm:$0xff] }
 0x251   : > { %1715 = vmatmul.mubr.f32.gmra.mrb[28].mxu1 %v1616_v29  ;;  %1959 = vmatmul.mubr.f32.gmra.mrb[28].mxu0 %v7084_v17  ;;  %v7141_v8 = vld [vmem:[%s13529_s3 + $0x328] sm:$0xff]  ;;  %v7092_v29 = vld [vmem:[%s13529_s3 + $0x1a0] sm:$0xff] }
 0x252   : > { %9125 = vmatpush3.bf16.msra.mxu1 %v11258_v22  ;;  %9221 = vmatpush3.bf16.msra.mxu0 %v11258_v22  ;;  %v7140_v17 = vld [vmem:[%s13529_s3 + $0x320] sm:$0xff] }
 0x253   : > { %9127 = vmatprep.subr.bf16.mxu1 %v11276_v52  ;;  %9223 = vmatprep.subr.bf16.mxu0 %v11276_v52 }
 0x254   : > { %1719 = vmatprep.mubr.f32.mxu1 %v1619_v15  ;;  %1963 = vmatprep.mubr.f32.mxu0 %v7087_v45  ;;  %v7095_v15 = vld [vmem:[%s13529_s3 + $0x1b8] sm:$0xff] }
 0x255   : > { %1720 = vmatmul.mubr.f32.gmra.mrb[30].mxu1 %v1618_v20  ;;  %1964 = vmatmul.mubr.f32.gmra.mrb[30].mxu0 %v7086_v21  ;;  %v7143_v45 = vld [vmem:[%s13529_s3 + $0x338] sm:$0xff]  ;;  %v7094_v20 = vld [vmem:[%s13529_s3 + $0x1b0] sm:$0xff] }
 0x256   : > { %9129 = vmatpush3.bf16.msra.mxu1 %v11272_v3  ;;  %9225 = vmatpush3.bf16.msra.mxu0 %v11272_v3  ;;  %v7142_v21 = vld [vmem:[%s13529_s3 + $0x330] sm:$0xff] }
 0x257   : > { %9163 = vmatprep.subr.bf16.mxu1 %v11124_v49  ;;  %9259 = vmatprep.subr.bf16.mxu0 %v11124_v49 }
 0x258   : > { %1806 = vmatprep.mubr.f32.mxu1 %v7057_v9  ;;  %2172 = vmatprep.mubr.f32.mxu0 %v7105_v48  ;;  %v7097_v9 = vld [vmem:[%s13529_s3 + $0x1c8] sm:$0xff] }
 0x259   : > { %1807 = vmatmul.mubr.f32.vlgmr.msra.gmra.mrb[32].mxu1 %v7056_v26  ;;  %2173 = vmatmul.mubr.f32.vlgmr.msra.gmra.mrb[32].mxu0 %v7104_v30  ;;  %v7145_v48 = vld [vmem:[%s13529_s3 + $0x348] sm:$0xff]  ;;  %v7096_v26 = vld [vmem:[%s13529_s3 + $0x1c0] sm:$0xff] }
 0x25a   : > { %9165 = vmatpush3.bf16.msra.mxu1 %v11132_v51  ;;  %9261 = vmatpush3.bf16.msra.mxu0 %v11132_v51  ;;  %v7144_v30 = vld [vmem:[%s13529_s3 + $0x340] sm:$0xff] }
 0x25b   : > { %9167 = vmatprep.subr.bf16.mxu1 %v11144_v55  ;;  %9263 = vmatprep.subr.bf16.mxu0 %v11144_v55 }
 0x25c   : > { %1811 = vmatprep.mubr.f32.mxu1 %v7059_v32  ;;  %2177 = vmatprep.mubr.f32.mxu0 %v7107_v31  ;;  %v7099_v32 = vld [vmem:[%s13529_s3 + $0x1d8] sm:$0xff] }
 0x25d   : > { %1812 = vmatmul.mubr.f32.gmra.mrb[34].mxu1 %v7058_v34  ;;  %2178 = vmatmul.mubr.f32.gmra.mrb[34].mxu0 %v7106_v36  ;;  %v7147_v31 = vld [vmem:[%s13529_s3 + $0x358] sm:$0xff]  ;;  %v7098_v34 = vld [vmem:[%s13529_s3 + $0x1d0] sm:$0xff] }
 0x25e   : > { %9169 = vmatpush3.bf16.msra.mxu1 %v11152_v24  ;;  %9265 = vmatpush3.bf16.msra.mxu0 %v11152_v24  ;;  %v7146_v36 = vld [vmem:[%s13529_s3 + $0x350] sm:$0xff] }
 0x25f   : > { %9171 = vmatprep.subr.bf16.mxu1 %v11170_v27  ;;  %9267 = vmatprep.subr.bf16.mxu0 %v11170_v27 }
 0x260   : > { %1816 = vmatprep.mubr.f32.mxu1 %v7061_v38  ;;  %2182 = vmatprep.mubr.f32.mxu0 %v7109_v33  ;;  %v7101_v38 = vld [vmem:[%s13529_s3 + $0x1e8] sm:$0xff] }
 0x261   : > { %1817 = vmatmul.mubr.f32.gmra.mrb[36].mxu1 %v7060_v18  ;;  %2183 = vmatmul.mubr.f32.gmra.mrb[36].mxu0 %v7108_v39  ;;  %v7149_v33 = vld [vmem:[%s13529_s3 + $0x368] sm:$0xff]  ;;  %v7100_v18 = vld [vmem:[%s13529_s3 + $0x1e0] sm:$0xff] }
 0x262   : > { %9173 = vmatpush3.bf16.msra.mxu1 %v11178_v54  ;;  %9269 = vmatpush3.bf16.msra.mxu0 %v11178_v54  ;;  %v7148_v39 = vld [vmem:[%s13529_s3 + $0x360] sm:$0xff] }
 0x263   : > { %9175 = vmatprep.subr.bf16.mxu1 %v11190_v16  ;;  %9271 = vmatprep.subr.bf16.mxu0 %v11190_v16 }
 0x264   : > { %1821 = vmatprep.mubr.f32.mxu1 %v7063_v42  ;;  %2187 = vmatprep.mubr.f32.mxu0 %v7111_v44  ;;  %v7103_v42 = vld [vmem:[%s13529_s3 + $0x1f8] sm:$0xff] }
 0x265   : > { %1822 = vmatmul.mubr.f32.gmra.mrb[38].mxu1 %v7062_v35  ;;  %2188 = vmatmul.mubr.f32.gmra.mrb[38].mxu0 %v7110_v46  ;;  %v7151_v44 = vld [vmem:[%s13529_s3 + $0x378] sm:$0xff]  ;;  %v7102_v35 = vld [vmem:[%s13529_s3 + $0x1f0] sm:$0xff] }
 0x266   : > { %9177 = vmatpush3.bf16.msra.mxu1 %v11198_v28  ;;  %9273 = vmatpush3.bf16.msra.mxu0 %v11198_v28  ;;  %v7150_v46 = vld [vmem:[%s13529_s3 + $0x370] sm:$0xff] }
 0x267   : > { %9179 = vmatprep.subr.bf16.mxu1 %v11210_v53  ;;  %9275 = vmatprep.subr.bf16.mxu0 %v11210_v53 }
 0x268   : > { %1826 = vmatprep.mubr.f32.mxu1 %v7065_v47  ;;  %2192 = vmatprep.mubr.f32.mxu0 %v7113_v50  ;;  %v7121_v47 = vld [vmem:[%s13529_s3 + $0x288] sm:$0xff] }
 0x269   : > { %1827 = vmatmul.mubr.f32.gmra.mrb[40].mxu1 %v7064_v56  ;;  %2193 = vmatmul.mubr.f32.gmra.mrb[40].mxu0 %v7112_v57  ;;  %v7169_v50 = vld [vmem:[%s13529_s3 + $0x408] sm:$0xff]  ;;  %v7120_v56 = vld [vmem:[%s13529_s3 + $0x280] sm:$0xff] }
 0x26a   : > { %9181 = vmatpush3.bf16.msra.mxu1 %v11218_v60  ;;  %9277 = vmatpush3.bf16.msra.mxu0 %v11218_v60  ;;  %v7168_v57 = vld [vmem:[%s13529_s3 + $0x400] sm:$0xff] }
 0x26b   : > { %9183 = vmatprep.subr.bf16.mxu1 %v11230_v2  ;;  %9279 = vmatprep.subr.bf16.mxu0 %v11230_v2 }
 0x26c   : > { %1831 = vmatprep.mubr.f32.mxu1 %v7067_v37  ;;  %2197 = vmatprep.mubr.f32.mxu0 %v7115_v1  ;;  %v7123_v37 = vld [vmem:[%s13529_s3 + $0x298] sm:$0xff] }
 0x26d   : > { %1832 = vmatmul.mubr.f32.gmra.mrb[42].mxu1 %v7066_v59  ;;  %2198 = vmatmul.mubr.f32.gmra.mrb[42].mxu0 %v7114_v62  ;;  %v7171_v1 = vld [vmem:[%s13529_s3 + $0x418] sm:$0xff]  ;;  %v7122_v59 = vld [vmem:[%s13529_s3 + $0x290] sm:$0xff] }
 0x26e   : > { %9185 = vmatpush3.bf16.msra.mxu1 %v11238_v5  ;;  %9281 = vmatpush3.bf16.msra.mxu0 %v11238_v5  ;;  %v7170_v62 = vld [vmem:[%s13529_s3 + $0x410] sm:$0xff] }
 0x26f   : > { %9187 = vmatprep.subr.bf16.mxu1 %v11250_v19  ;;  %9283 = vmatprep.subr.bf16.mxu0 %v11250_v19 }
 0x270   : > { %1836 = vmatprep.mubr.f32.mxu1 %v7069_v63  ;;  %2202 = vmatprep.mubr.f32.mxu0 %v7117_v61  ;;  %v7125_v63 = vld [vmem:[%s13529_s3 + $0x2a8] sm:$0xff] }
 0x271   : > { %1837 = vmatmul.mubr.f32.gmra.mrb[44].mxu1 %v7068_v12  ;;  %2203 = vmatmul.mubr.f32.gmra.mrb[44].mxu0 %v7116_v40  ;;  %v7173_v61 = vld [vmem:[%s13529_s3 + $0x428] sm:$0xff]  ;;  %v7124_v12 = vld [vmem:[%s13529_s3 + $0x2a0] sm:$0xff] }
 0x272   : > { %9189 = vmatpush3.bf16.msra.mxu1 %v11258_v22  ;;  %9285 = vmatpush3.bf16.msra.mxu0 %v11258_v22  ;;  %v7172_v40 = vld [vmem:[%s13529_s3 + $0x420] sm:$0xff] }
 0x273   : > { %9191 = vmatprep.subr.bf16.mxu1 %v11276_v52  ;;  %9287 = vmatprep.subr.bf16.mxu0 %v11276_v52 }
 0x274   : > { %1841 = vmatprep.mubr.f32.mxu1 %v7071_v25  ;;  %2207 = vmatprep.mubr.f32.mxu0 %v7119_v0  ;;  %v7127_v25 = vld [vmem:[%s13529_s3 + $0x2b8] sm:$0xff] }
 0x275   : > { %1842 = vmatmul.mubr.f32.gmra.mrb[46].mxu1 %v7070_v11  ;;  %2208 = vmatmul.mubr.f32.gmra.mrb[46].mxu0 %v7118_v41  ;;  %v7175_v0 = vld [vmem:[%s13529_s3 + $0x438] sm:$0xff]  ;;  %v7126_v11 = vld [vmem:[%s13529_s3 + $0x2b0] sm:$0xff] }
 0x276   : > { %9193 = vmatpush3.bf16.msra.mxu1 %v11272_v3  ;;  %9289 = vmatpush3.bf16.msra.mxu0 %v11272_v3  ;;  %v7174_v41 = vld [vmem:[%s13529_s3 + $0x430] sm:$0xff] }
 0x277   : > { %9227 = vmatprep.subr.bf16.mxu1 %v11124_v49  ;;  %9323 = vmatprep.subr.bf16.mxu0 %v11124_v49 }
 0x278   : > { %2050 = vmatprep.mubr.f32.mxu1 %v7089_v4  ;;  %2416 = vmatprep.mubr.f32.mxu0 %v7137_v23  ;;  %v7129_v4 = vld [vmem:[%s13529_s3 + $0x2c8] sm:$0xff] }
 0x279   : > { %2051 = vmatmul.mubr.f32.vlgmr.msra.gmra.mrb[48].mxu1 %v7088_v6  ;;  %2417 = vmatmul.mubr.f32.vlgmr.msra.gmra.mrb[48].mxu0 %v7136_v43  ;;  %v7177_v23 = vld [vmem:[%s13529_s3 + $0x448] sm:$0xff]  ;;  %v7128_v6 = vld [vmem:[%s13529_s3 + $0x2c0] sm:$0xff] }
 0x27a   : > { %9229 = vmatpush3.bf16.msra.mxu1 %v11132_v51  ;;  %9325 = vmatpush3.bf16.msra.mxu0 %v11132_v51  ;;  %v7176_v43 = vld [vmem:[%s13529_s3 + $0x440] sm:$0xff] }
 0x27b   : > { %9231 = vmatprep.subr.bf16.mxu1 %v11144_v55  ;;  %9327 = vmatprep.subr.bf16.mxu0 %v11144_v55 }
 0x27c   : > { %2055 = vmatprep.mubr.f32.mxu1 %v7091_v7  ;;  %2421 = vmatprep.mubr.f32.mxu0 %v7139_v13  ;;  %v7131_v7 = vld [vmem:[%s13529_s3 + $0x2d8] sm:$0xff] }
 0x27d   : > { %2056 = vmatmul.mubr.f32.gmra.mrb[50].mxu1 %v7090_v10  ;;  %2422 = vmatmul.mubr.f32.gmra.mrb[50].mxu0 %v7138_v14  ;;  %v7179_v13 = vld [vmem:[%s13529_s3 + $0x458] sm:$0xff]  ;;  %v7130_v10 = vld [vmem:[%s13529_s3 + $0x2d0] sm:$0xff] }
 0x27e   : > { %9233 = vmatpush3.bf16.msra.mxu1 %v11152_v24  ;;  %9329 = vmatpush3.bf16.msra.mxu0 %v11152_v24  ;;  %v7178_v14 = vld [vmem:[%s13529_s3 + $0x450] sm:$0xff] }
 0x27f   : > { %9235 = vmatprep.subr.bf16.mxu1 %v11170_v27  ;;  %9331 = vmatprep.subr.bf16.mxu0 %v11170_v27 }
 0x280   : > { %2060 = vmatprep.mubr.f32.mxu1 %v7093_v58  ;;  %2426 = vmatprep.mubr.f32.mxu0 %v7141_v8  ;;  %v7133_v58 = vld [vmem:[%s13529_s3 + $0x2e8] sm:$0xff] }
 0x281   : > { %2061 = vmatmul.mubr.f32.gmra.mrb[52].mxu1 %v7092_v29  ;;  %2427 = vmatmul.mubr.f32.gmra.mrb[52].mxu0 %v7140_v17  ;;  %v7181_v8 = vld [vmem:[%s13529_s3 + $0x468] sm:$0xff]  ;;  %v7132_v29 = vld [vmem:[%s13529_s3 + $0x2e0] sm:$0xff] }
 0x282   : > { %9237 = vmatpush3.bf16.msra.mxu1 %v11178_v54  ;;  %9333 = vmatpush3.bf16.msra.mxu0 %v11178_v54  ;;  %v7180_v17 = vld [vmem:[%s13529_s3 + $0x460] sm:$0xff] }
 0x283   : > { %9239 = vmatprep.subr.bf16.mxu1 %v11190_v16  ;;  %9335 = vmatprep.subr.bf16.mxu0 %v11190_v16 }
 0x284   : > { %2065 = vmatprep.mubr.f32.mxu1 %v7095_v15  ;;  %2431 = vmatprep.mubr.f32.mxu0 %v7143_v45  ;;  %v7135_v15 = vld [vmem:[%s13529_s3 + $0x2f8] sm:$0xff] }
 0x285   : > { %2066 = vmatmul.mubr.f32.gmra.mrb[54].mxu1 %v7094_v20  ;;  %2432 = vmatmul.mubr.f32.gmra.mrb[54].mxu0 %v7142_v21  ;;  %v7183_v45 = vld [vmem:[%s13529_s3 + $0x478] sm:$0xff]  ;;  %v7134_v20 = vld [vmem:[%s13529_s3 + $0x2f0] sm:$0xff] }
 0x286   : > { %9241 = vmatpush3.bf16.msra.mxu1 %v11198_v28  ;;  %9337 = vmatpush3.bf16.msra.mxu0 %v11198_v28  ;;  %v7182_v21 = vld [vmem:[%s13529_s3 + $0x470] sm:$0xff] }
 0x287   : > { %9243 = vmatprep.subr.bf16.mxu1 %v11210_v53  ;;  %9339 = vmatprep.subr.bf16.mxu0 %v11210_v53 }
 0x288   : > { %2070 = vmatprep.mubr.f32.mxu1 %v7097_v9  ;;  %2436 = vmatprep.mubr.f32.mxu0 %v7145_v48  ;;  %v7153_v9 = vld [vmem:[%s13529_s3 + $0x388] sm:$0xff] }
 0x289   : > { %2071 = vmatmul.mubr.f32.gmra.mrb[56].mxu1 %v7096_v26  ;;  %2437 = vmatmul.mubr.f32.gmra.mrb[56].mxu0 %v7144_v30  ;;  %v7201_v48 = vld [vmem:[%s13529_s3 + $0x508] sm:$0xff]  ;;  %v7152_v26 = vld [vmem:[%s13529_s3 + $0x380] sm:$0xff] }
 0x28a   : > { %9245 = vmatpush3.bf16.msra.mxu1 %v11218_v60  ;;  %9341 = vmatpush3.bf16.msra.mxu0 %v11218_v60  ;;  %v7200_v30 = vld [vmem:[%s13529_s3 + $0x500] sm:$0xff] }
 0x28b   : > { %9247 = vmatprep.subr.bf16.mxu1 %v11230_v2  ;;  %9343 = vmatprep.subr.bf16.mxu0 %v11230_v2 }
 0x28c   : > { %2075 = vmatprep.mubr.f32.mxu1 %v7099_v32  ;;  %2441 = vmatprep.mubr.f32.mxu0 %v7147_v31  ;;  %v7155_v32 = vld [vmem:[%s13529_s3 + $0x398] sm:$0xff] }
 0x28d   : > { %2076 = vmatmul.mubr.f32.gmra.mrb[58].mxu1 %v7098_v34  ;;  %2442 = vmatmul.mubr.f32.gmra.mrb[58].mxu0 %v7146_v36  ;;  %v7203_v31 = vld [vmem:[%s13529_s3 + $0x518] sm:$0xff]  ;;  %v7154_v34 = vld [vmem:[%s13529_s3 + $0x390] sm:$0xff] }
 0x28e   : > { %9249 = vmatpush3.bf16.msra.mxu1 %v11238_v5  ;;  %9345 = vmatpush3.bf16.msra.mxu0 %v11238_v5  ;;  %v7202_v36 = vld [vmem:[%s13529_s3 + $0x510] sm:$0xff] }
 0x28f   : > { %9251 = vmatprep.subr.bf16.mxu1 %v11250_v19  ;;  %9347 = vmatprep.subr.bf16.mxu0 %v11250_v19 }
 0x290   : > { %2080 = vmatprep.mubr.f32.mxu1 %v7101_v38  ;;  %2446 = vmatprep.mubr.f32.mxu0 %v7149_v33  ;;  %v7157_v38 = vld [vmem:[%s13529_s3 + $0x3a8] sm:$0xff] }
 0x291   : > { %2081 = vmatmul.mubr.f32.gmra.mrb[60].mxu1 %v7100_v18  ;;  %2447 = vmatmul.mubr.f32.gmra.mrb[60].mxu0 %v7148_v39  ;;  %v7205_v33 = vld [vmem:[%s13529_s3 + $0x528] sm:$0xff]  ;;  %v7156_v18 = vld [vmem:[%s13529_s3 + $0x3a0] sm:$0xff] }
 0x292   : > { %9253 = vmatpush3.bf16.msra.mxu1 %v11258_v22  ;;  %9349 = vmatpush3.bf16.msra.mxu0 %v11258_v22  ;;  %v7204_v39 = vld [vmem:[%s13529_s3 + $0x520] sm:$0xff] }
 0x293   : > { %9255 = vmatprep.subr.bf16.mxu1 %v11276_v52  ;;  %9351 = vmatprep.subr.bf16.mxu0 %v11276_v52 }
 0x294   : > { %2085 = vmatprep.mubr.f32.mxu1 %v7103_v42  ;;  %2451 = vmatprep.mubr.f32.mxu0 %v7151_v44  ;;  %v7159_v42 = vld [vmem:[%s13529_s3 + $0x3b8] sm:$0xff] }
 0x295   : > { %2086 = vmatmul.mubr.f32.gmra.mrb[62].mxu1 %v7102_v35  ;;  %2452 = vmatmul.mubr.f32.gmra.mrb[62].mxu0 %v7150_v46  ;;  %v7207_v44 = vld [vmem:[%s13529_s3 + $0x538] sm:$0xff]  ;;  %v7158_v35 = vld [vmem:[%s13529_s3 + $0x3b0] sm:$0xff] }
 0x296   : > { %9257 = vmatpush3.bf16.msra.mxu1 %v11272_v3  ;;  %9353 = vmatpush3.bf16.msra.mxu0 %v11272_v3  ;;  %v7206_v46 = vld [vmem:[%s13529_s3 + $0x530] sm:$0xff] }
 0x297   : > { %9291 = vmatprep.subr.bf16.mxu1 %v11124_v49  ;;  %9387 = vmatprep.subr.bf16.mxu0 %v11124_v49 }
 0x298   : > { %2294 = vmatprep.mubr.f32.mxu1 %v7121_v47  ;;  %2660 = vmatprep.mubr.f32.mxu0 %v7169_v50  ;;  %v7161_v47 = vld [vmem:[%s13529_s3 + $0x3c8] sm:$0xff] }
 0x299   : > { %2295 = vmatmul.mubr.f32.vlgmr.msra.gmra.mrb[64].mxu1 %v7120_v56  ;;  %2661 = vmatmul.mubr.f32.vlgmr.msra.gmra.mrb[64].mxu0 %v7168_v57  ;;  %v7209_v50 = vld [vmem:[%s13529_s3 + $0x548] sm:$0xff]  ;;  %v7160_v56 = vld [vmem:[%s13529_s3 + $0x3c0] sm:$0xff] }
 0x29a   : > { %9293 = vmatpush3.bf16.msra.mxu1 %v11132_v51  ;;  %9389 = vmatpush3.bf16.msra.mxu0 %v11132_v51  ;;  %v7208_v57 = vld [vmem:[%s13529_s3 + $0x540] sm:$0xff] }
 0x29b   : > { %9295 = vmatprep.subr.bf16.mxu1 %v11144_v55  ;;  %9391 = vmatprep.subr.bf16.mxu0 %v11144_v55 }
 0x29c   : > { %2299 = vmatprep.mubr.f32.mxu1 %v7123_v37  ;;  %2665 = vmatprep.mubr.f32.mxu0 %v7171_v1  ;;  %v7163_v37 = vld [vmem:[%s13529_s3 + $0x3d8] sm:$0xff] }
 0x29d   : > { %2300 = vmatmul.mubr.f32.gmra.mrb[66].mxu1 %v7122_v59  ;;  %2666 = vmatmul.mubr.f32.gmra.mrb[66].mxu0 %v7170_v62  ;;  %v7211_v1 = vld [vmem:[%s13529_s3 + $0x558] sm:$0xff]  ;;  %v7162_v59 = vld [vmem:[%s13529_s3 + $0x3d0] sm:$0xff] }
 0x29e   : > { %9297 = vmatpush3.bf16.msra.mxu1 %v11152_v24  ;;  %9393 = vmatpush3.bf16.msra.mxu0 %v11152_v24  ;;  %v7210_v62 = vld [vmem:[%s13529_s3 + $0x550] sm:$0xff] }
 0x29f   : > { %9299 = vmatprep.subr.bf16.mxu1 %v11170_v27  ;;  %9395 = vmatprep.subr.bf16.mxu0 %v11170_v27 }
 0x2a0   : > { %2304 = vmatprep.mubr.f32.mxu1 %v7125_v63  ;;  %2670 = vmatprep.mubr.f32.mxu0 %v7173_v61  ;;  %v7165_v63 = vld [vmem:[%s13529_s3 + $0x3e8] sm:$0xff] }
 0x2a1   : > { %2305 = vmatmul.mubr.f32.gmra.mrb[68].mxu1 %v7124_v12  ;;  %2671 = vmatmul.mubr.f32.gmra.mrb[68].mxu0 %v7172_v40  ;;  %v7213_v61 = vld [vmem:[%s13529_s3 + $0x568] sm:$0xff]  ;;  %v7164_v12 = vld [vmem:[%s13529_s3 + $0x3e0] sm:$0xff] }
 0x2a2   : > { %9301 = vmatpush3.bf16.msra.mxu1 %v11178_v54  ;;  %9397 = vmatpush3.bf16.msra.mxu0 %v11178_v54  ;;  %v7212_v40 = vld [vmem:[%s13529_s3 + $0x560] sm:$0xff] }
 0x2a3   : > { %9303 = vmatprep.subr.bf16.mxu1 %v11190_v16  ;;  %9399 = vmatprep.subr.bf16.mxu0 %v11190_v16 }
 0x2a4   : > { %2309 = vmatprep.mubr.f32.mxu1 %v7127_v25  ;;  %2675 = vmatprep.mubr.f32.mxu0 %v7175_v0  ;;  %v7167_v25 = vld [vmem:[%s13529_s3 + $0x3f8] sm:$0xff] }
 0x2a5   : > { %2310 = vmatmul.mubr.f32.gmra.mrb[70].mxu1 %v7126_v11  ;;  %2676 = vmatmul.mubr.f32.gmra.mrb[70].mxu0 %v7174_v41  ;;  %v7215_v0 = vld [vmem:[%s13529_s3 + $0x578] sm:$0xff]  ;;  %v7166_v11 = vld [vmem:[%s13529_s3 + $0x3f0] sm:$0xff] }
 0x2a6   : > { %9305 = vmatpush3.bf16.msra.mxu1 %v11198_v28  ;;  %9401 = vmatpush3.bf16.msra.mxu0 %v11198_v28  ;;  %v7214_v41 = vld [vmem:[%s13529_s3 + $0x570] sm:$0xff] }
 0x2a7   : > { %9307 = vmatprep.subr.bf16.mxu1 %v11210_v53  ;;  %9403 = vmatprep.subr.bf16.mxu0 %v11210_v53 }
 0x2a8   : > { %2314 = vmatprep.mubr.f32.mxu1 %v7129_v4  ;;  %2680 = vmatprep.mubr.f32.mxu0 %v7177_v23  ;;  %v7185_v4 = vld [vmem:[%s13529_s3 + $0x488] sm:$0xff] }
 0x2a9   : > { %2315 = vmatmul.mubr.f32.gmra.mrb[72].mxu1 %v7128_v6  ;;  %2681 = vmatmul.mubr.f32.gmra.mrb[72].mxu0 %v7176_v43  ;;  %v7233_v23 = vld [vmem:[%s13529_s3 + $0x608] sm:$0xff]  ;;  %v7184_v6 = vld [vmem:[%s13529_s3 + $0x480] sm:$0xff] }
 0x2aa   : > { %9309 = vmatpush3.bf16.msra.mxu1 %v11218_v60  ;;  %9405 = vmatpush3.bf16.msra.mxu0 %v11218_v60  ;;  %v7232_v43 = vld [vmem:[%s13529_s3 + $0x600] sm:$0xff] }
 0x2ab   : > { %9311 = vmatprep.subr.bf16.mxu1 %v11230_v2  ;;  %9407 = vmatprep.subr.bf16.mxu0 %v11230_v2 }
 0x2ac   : > { %2319 = vmatprep.mubr.f32.mxu1 %v7131_v7  ;;  %2685 = vmatprep.mubr.f32.mxu0 %v7179_v13  ;;  %v7187_v7 = vld [vmem:[%s13529_s3 + $0x498] sm:$0xff] }
 0x2ad   : > { %2320 = vmatmul.mubr.f32.gmra.mrb[74].mxu1 %v7130_v10  ;;  %2686 = vmatmul.mubr.f32.gmra.mrb[74].mxu0 %v7178_v14  ;;  %v7235_v13 = vld [vmem:[%s13529_s3 + $0x618] sm:$0xff]  ;;  %v7186_v10 = vld [vmem:[%s13529_s3 + $0x490] sm:$0xff] }
 0x2ae   : > { %9313 = vmatpush3.bf16.msra.mxu1 %v11238_v5  ;;  %9409 = vmatpush3.bf16.msra.mxu0 %v11238_v5  ;;  %v7234_v14 = vld [vmem:[%s13529_s3 + $0x610] sm:$0xff] }
 0x2af   : > { %9315 = vmatprep.subr.bf16.mxu1 %v11250_v19  ;;  %9411 = vmatprep.subr.bf16.mxu0 %v11250_v19 }
 0x2b0   : > { %2324 = vmatprep.mubr.f32.mxu1 %v7133_v58  ;;  %2690 = vmatprep.mubr.f32.mxu0 %v7181_v8  ;;  %v7189_v58 = vld [vmem:[%s13529_s3 + $0x4a8] sm:$0xff] }
 0x2b1   : > { %2325 = vmatmul.mubr.f32.gmra.mrb[76].mxu1 %v7132_v29  ;;  %2691 = vmatmul.mubr.f32.gmra.mrb[76].mxu0 %v7180_v17  ;;  %v7237_v8 = vld [vmem:[%s13529_s3 + $0x628] sm:$0xff]  ;;  %v7188_v29 = vld [vmem:[%s13529_s3 + $0x4a0] sm:$0xff] }
 0x2b2   : > { %9317 = vmatpush3.bf16.msra.mxu1 %v11258_v22  ;;  %9413 = vmatpush3.bf16.msra.mxu0 %v11258_v22  ;;  %v7236_v17 = vld [vmem:[%s13529_s3 + $0x620] sm:$0xff] }
 0x2b3   : > { %9319 = vmatprep.subr.bf16.mxu1 %v11276_v52  ;;  %9415 = vmatprep.subr.bf16.mxu0 %v11276_v52 }
 0x2b4   : > { %2329 = vmatprep.mubr.f32.mxu1 %v7135_v15  ;;  %2695 = vmatprep.mubr.f32.mxu0 %v7183_v45  ;;  %v7191_v15 = vld [vmem:[%s13529_s3 + $0x4b8] sm:$0xff] }
 0x2b5   : > { %2330 = vmatmul.mubr.f32.gmra.mrb[78].mxu1 %v7134_v20  ;;  %2696 = vmatmul.mubr.f32.gmra.mrb[78].mxu0 %v7182_v21  ;;  %v7239_v45 = vld [vmem:[%s13529_s3 + $0x638] sm:$0xff]  ;;  %v7190_v20 = vld [vmem:[%s13529_s3 + $0x4b0] sm:$0xff] }
 0x2b6   : > { %9321 = vmatpush3.bf16.msra.mxu1 %v11272_v3  ;;  %9417 = vmatpush3.bf16.msra.mxu0 %v11272_v3  ;;  %v7238_v21 = vld [vmem:[%s13529_s3 + $0x630] sm:$0xff] }
 0x2b7   : > { %9355 = vmatprep.subr.bf16.mxu1 %v11124_v49  ;;  %9451 = vmatprep.subr.bf16.mxu0 %v11124_v49 }
 0x2b8   : > { %2538 = vmatprep.mubr.f32.mxu1 %v7153_v9  ;;  %2904 = vmatprep.mubr.f32.mxu0 %v7201_v48  ;;  %v7193_v9 = vld [vmem:[%s13529_s3 + $0x4c8] sm:$0xff] }
 0x2b9   : > { %2539 = vmatmul.mubr.f32.vlgmr.msra.gmra.mrb[80].mxu1 %v7152_v26  ;;  %2905 = vmatmul.mubr.f32.vlgmr.msra.gmra.mrb[80].mxu0 %v7200_v30  ;;  %v7241_v48 = vld [vmem:[%s13529_s3 + $0x648] sm:$0xff]  ;;  %v7192_v26 = vld [vmem:[%s13529_s3 + $0x4c0] sm:$0xff] }
 0x2ba   : > { %9357 = vmatpush3.bf16.msra.mxu1 %v11132_v51  ;;  %9453 = vmatpush3.bf16.msra.mxu0 %v11132_v51  ;;  %v7240_v30 = vld [vmem:[%s13529_s3 + $0x640] sm:$0xff] }
 0x2bb   : > { %9359 = vmatprep.subr.bf16.mxu1 %v11144_v55  ;;  %9455 = vmatprep.subr.bf16.mxu0 %v11144_v55 }
 0x2bc   : > { %2543 = vmatprep.mubr.f32.mxu1 %v7155_v32  ;;  %2909 = vmatprep.mubr.f32.mxu0 %v7203_v31  ;;  %v7195_v32 = vld [vmem:[%s13529_s3 + $0x4d8] sm:$0xff] }
 0x2bd   : > { %2544 = vmatmul.mubr.f32.gmra.mrb[82].mxu1 %v7154_v34  ;;  %2910 = vmatmul.mubr.f32.gmra.mrb[82].mxu0 %v7202_v36  ;;  %v7243_v31 = vld [vmem:[%s13529_s3 + $0x658] sm:$0xff]  ;;  %v7194_v34 = vld [vmem:[%s13529_s3 + $0x4d0] sm:$0xff] }
 0x2be   : > { %9361 = vmatpush3.bf16.msra.mxu1 %v11152_v24  ;;  %9457 = vmatpush3.bf16.msra.mxu0 %v11152_v24  ;;  %v7242_v36 = vld [vmem:[%s13529_s3 + $0x650] sm:$0xff] }
 0x2bf   : > { %9363 = vmatprep.subr.bf16.mxu1 %v11170_v27  ;;  %9459 = vmatprep.subr.bf16.mxu0 %v11170_v27 }
 0x2c0   : > { %2548 = vmatprep.mubr.f32.mxu1 %v7157_v38  ;;  %2914 = vmatprep.mubr.f32.mxu0 %v7205_v33  ;;  %v7197_v38 = vld [vmem:[%s13529_s3 + $0x4e8] sm:$0xff] }
 0x2c1   : > { %2549 = vmatmul.mubr.f32.gmra.mrb[84].mxu1 %v7156_v18  ;;  %2915 = vmatmul.mubr.f32.gmra.mrb[84].mxu0 %v7204_v39  ;;  %v7245_v33 = vld [vmem:[%s13529_s3 + $0x668] sm:$0xff]  ;;  %v7196_v18 = vld [vmem:[%s13529_s3 + $0x4e0] sm:$0xff] }
 0x2c2   : > { %9365 = vmatpush3.bf16.msra.mxu1 %v11178_v54  ;;  %9461 = vmatpush3.bf16.msra.mxu0 %v11178_v54  ;;  %v7244_v39 = vld [vmem:[%s13529_s3 + $0x660] sm:$0xff] }
 0x2c3   : > { %9367 = vmatprep.subr.bf16.mxu1 %v11190_v16  ;;  %9463 = vmatprep.subr.bf16.mxu0 %v11190_v16 }
 0x2c4   : > { %2553 = vmatprep.mubr.f32.mxu1 %v7159_v42  ;;  %2919 = vmatprep.mubr.f32.mxu0 %v7207_v44  ;;  %v7199_v42 = vld [vmem:[%s13529_s3 + $0x4f8] sm:$0xff] }
 0x2c5   : > { %2554 = vmatmul.mubr.f32.gmra.mrb[86].mxu1 %v7158_v35  ;;  %2920 = vmatmul.mubr.f32.gmra.mrb[86].mxu0 %v7206_v46  ;;  %v7247_v44 = vld [vmem:[%s13529_s3 + $0x678] sm:$0xff]  ;;  %v7198_v35 = vld [vmem:[%s13529_s3 + $0x4f0] sm:$0xff] }
 0x2c6   : > { %9369 = vmatpush3.bf16.msra.mxu1 %v11198_v28  ;;  %9465 = vmatpush3.bf16.msra.mxu0 %v11198_v28  ;;  %v7246_v46 = vld [vmem:[%s13529_s3 + $0x670] sm:$0xff] }
 0x2c7   : > { %9371 = vmatprep.subr.bf16.mxu1 %v11210_v53  ;;  %9467 = vmatprep.subr.bf16.mxu0 %v11210_v53 }
 0x2c8   : > { %2558 = vmatprep.mubr.f32.mxu1 %v7161_v47  ;;  %2924 = vmatprep.mubr.f32.mxu0 %v7209_v50  ;;  %v7217_v47 = vld [vmem:[%s13529_s3 + $0x588] sm:$0xff] }
 0x2c9   : > { %2559 = vmatmul.mubr.f32.gmra.mrb[88].mxu1 %v7160_v56  ;;  %2925 = vmatmul.mubr.f32.gmra.mrb[88].mxu0 %v7208_v57  ;;  %v7265_v50 = vld [vmem:[%s13529_s3 + $0x708] sm:$0xff]  ;;  %v7216_v56 = vld [vmem:[%s13529_s3 + $0x580] sm:$0xff] }
 0x2ca   : > { %9373 = vmatpush3.bf16.msra.mxu1 %v11218_v60  ;;  %9469 = vmatpush3.bf16.msra.mxu0 %v11218_v60  ;;  %v7264_v57 = vld [vmem:[%s13529_s3 + $0x700] sm:$0xff] }
 0x2cb   : > { %9375 = vmatprep.subr.bf16.mxu1 %v11230_v2  ;;  %9471 = vmatprep.subr.bf16.mxu0 %v11230_v2 }
 0x2cc   : > { %2563 = vmatprep.mubr.f32.mxu1 %v7163_v37  ;;  %2929 = vmatprep.mubr.f32.mxu0 %v7211_v1  ;;  %v7219_v37 = vld [vmem:[%s13529_s3 + $0x598] sm:$0xff] }
 0x2cd   : > { %2564 = vmatmul.mubr.f32.gmra.mrb[90].mxu1 %v7162_v59  ;;  %2930 = vmatmul.mubr.f32.gmra.mrb[90].mxu0 %v7210_v62  ;;  %v7267_v1 = vld [vmem:[%s13529_s3 + $0x718] sm:$0xff]  ;;  %v7218_v59 = vld [vmem:[%s13529_s3 + $0x590] sm:$0xff] }
 0x2ce   : > { %9377 = vmatpush3.bf16.msra.mxu1 %v11238_v5  ;;  %9473 = vmatpush3.bf16.msra.mxu0 %v11238_v5  ;;  %v7266_v62 = vld [vmem:[%s13529_s3 + $0x710] sm:$0xff] }
 0x2cf   : > { %9379 = vmatprep.subr.bf16.mxu1 %v11250_v19  ;;  %9475 = vmatprep.subr.bf16.mxu0 %v11250_v19 }
 0x2d0   : > { %2568 = vmatprep.mubr.f32.mxu1 %v7165_v63  ;;  %2934 = vmatprep.mubr.f32.mxu0 %v7213_v61  ;;  %v7221_v63 = vld [vmem:[%s13529_s3 + $0x5a8] sm:$0xff] }
 0x2d1   : > { %2569 = vmatmul.mubr.f32.gmra.mrb[92].mxu1 %v7164_v12  ;;  %2935 = vmatmul.mubr.f32.gmra.mrb[92].mxu0 %v7212_v40  ;;  %v7269_v61 = vld [vmem:[%s13529_s3 + $0x728] sm:$0xff]  ;;  %v7220_v12 = vld [vmem:[%s13529_s3 + $0x5a0] sm:$0xff] }
 0x2d2   : > { %9381 = vmatpush3.bf16.msra.mxu1 %v11258_v22  ;;  %9477 = vmatpush3.bf16.msra.mxu0 %v11258_v22  ;;  %v7268_v40 = vld [vmem:[%s13529_s3 + $0x720] sm:$0xff] }
 0x2d3   : > { %9383 = vmatprep.subr.bf16.mxu1 %v11276_v52  ;;  %9479 = vmatprep.subr.bf16.mxu0 %v11276_v52 }
 0x2d4   : > { %2573 = vmatprep.mubr.f32.mxu1 %v7167_v25  ;;  %2939 = vmatprep.mubr.f32.mxu0 %v7215_v0  ;;  %v7223_v25 = vld [vmem:[%s13529_s3 + $0x5b8] sm:$0xff] }
 0x2d5   : > { %2574 = vmatmul.mubr.f32.gmra.mrb[94].mxu1 %v7166_v11  ;;  %2940 = vmatmul.mubr.f32.gmra.mrb[94].mxu0 %v7214_v41  ;;  %v7271_v0 = vld [vmem:[%s13529_s3 + $0x738] sm:$0xff]  ;;  %v7222_v11 = vld [vmem:[%s13529_s3 + $0x5b0] sm:$0xff] }
 0x2d6   : > { %9385 = vmatpush3.bf16.msra.mxu1 %v11272_v3  ;;  %9481 = vmatpush3.bf16.msra.mxu0 %v11272_v3  ;;  %v7270_v41 = vld [vmem:[%s13529_s3 + $0x730] sm:$0xff] }
 0x2d7   : > { %9419 = vmatprep.subr.bf16.mxu1 %v11124_v49  ;;  %9515 = vmatprep.subr.bf16.mxu0 %v11124_v49 }
 0x2d8   : > { %2782 = vmatprep.mubr.f32.mxu1 %v7185_v4  ;;  %3148 = vmatprep.mubr.f32.mxu0 %v7233_v23  ;;  %v7225_v4 = vld [vmem:[%s13529_s3 + $0x5c8] sm:$0xff] }
 0x2d9   : > { %2783 = vmatmul.mubr.f32.vlgmr.msra.gmra.mrb[96].mxu1 %v7184_v6  ;;  %3149 = vmatmul.mubr.f32.vlgmr.msra.gmra.mrb[96].mxu0 %v7232_v43  ;;  %v7273_v23 = vld [vmem:[%s13529_s3 + $0x748] sm:$0xff]  ;;  %v7224_v6 = vld [vmem:[%s13529_s3 + $0x5c0] sm:$0xff] }
 0x2da   : > { %9421 = vmatpush3.bf16.msra.mxu1 %v11132_v51  ;;  %9517 = vmatpush3.bf16.msra.mxu0 %v11132_v51  ;;  %v7272_v43 = vld [vmem:[%s13529_s3 + $0x740] sm:$0xff] }
 0x2db   : > { %9423 = vmatprep.subr.bf16.mxu1 %v11144_v55  ;;  %9519 = vmatprep.subr.bf16.mxu0 %v11144_v55 }
 0x2dc   : > { %2787 = vmatprep.mubr.f32.mxu1 %v7187_v7  ;;  %3153 = vmatprep.mubr.f32.mxu0 %v7235_v13  ;;  %v7227_v7 = vld [vmem:[%s13529_s3 + $0x5d8] sm:$0xff] }
 0x2dd   : > { %2788 = vmatmul.mubr.f32.gmra.mrb[98].mxu1 %v7186_v10  ;;  %3154 = vmatmul.mubr.f32.gmra.mrb[98].mxu0 %v7234_v14  ;;  %v7275_v13 = vld [vmem:[%s13529_s3 + $0x758] sm:$0xff]  ;;  %v7226_v10 = vld [vmem:[%s13529_s3 + $0x5d0] sm:$0xff] }
 0x2de   : > { %9425 = vmatpush3.bf16.msra.mxu1 %v11152_v24  ;;  %9521 = vmatpush3.bf16.msra.mxu0 %v11152_v24  ;;  %v7274_v14 = vld [vmem:[%s13529_s3 + $0x750] sm:$0xff] }
 0x2df   : > { %9427 = vmatprep.subr.bf16.mxu1 %v11170_v27  ;;  %9523 = vmatprep.subr.bf16.mxu0 %v11170_v27 }
 0x2e0   : > { %2792 = vmatprep.mubr.f32.mxu1 %v7189_v58  ;;  %3158 = vmatprep.mubr.f32.mxu0 %v7237_v8  ;;  %v7229_v58 = vld [vmem:[%s13529_s3 + $0x5e8] sm:$0xff] }
 0x2e1   : > { %2793 = vmatmul.mubr.f32.gmra.mrb[100].mxu1 %v7188_v29  ;;  %3159 = vmatmul.mubr.f32.gmra.mrb[100].mxu0 %v7236_v17  ;;  %v7277_v17 = vld [vmem:[%s13529_s3 + $0x768] sm:$0xff] }
 0x2e2   : > { %9429 = vmatpush3.bf16.msra.mxu1 %v11178_v54  ;;  %9525 = vmatpush3.bf16.msra.mxu0 %v11178_v54 }
 0x2e3   : > { %9431 = vmatprep.subr.bf16.mxu1 %v11190_v16  ;;  %9527 = vmatprep.subr.bf16.mxu0 %v11190_v16 }
 0x2e4   : > { %2797 = vmatprep.mubr.f32.mxu1 %v7191_v15  ;;  %3163 = vmatprep.mubr.f32.mxu0 %v7239_v45 }
 0x2e5   : > { %2798 = vmatmul.mubr.f32.gmra.mrb[102].mxu1 %v7190_v20  ;;  %3164 = vmatmul.mubr.f32.gmra.mrb[102].mxu0 %v7238_v21  ;;  %v7228_v21 = vld [vmem:[%s13529_s3 + $0x5e0] sm:$0xff] }
 0x2e6   : > { %9433 = vmatpush3.bf16.msra.mxu1 %v11198_v28  ;;  %9529 = vmatpush3.bf16.msra.mxu0 %v11198_v28 }
 0x2e7   : > { %9435 = vmatprep.subr.bf16.mxu1 %v11210_v53  ;;  %9531 = vmatprep.subr.bf16.mxu0 %v11210_v53 }
 0x2e8   : > { %2802 = vmatprep.mubr.f32.mxu1 %v7193_v9  ;;  %3168 = vmatprep.mubr.f32.mxu0 %v7241_v48  ;;  %v7276_v48 = vld [vmem:[%s13529_s3 + $0x760] sm:$0xff] }
 0x2e9   : > { %2803 = vmatmul.mubr.f32.gmra.mrb[104].mxu1 %v7192_v26  ;;  %3169 = vmatmul.mubr.f32.gmra.mrb[104].mxu0 %v7240_v30  ;;  %v7231_v26 = vld [vmem:[%s13529_s3 + $0x5f8] sm:$0xff] }
 0x2ea   : > { %9437 = vmatpush3.bf16.msra.mxu1 %v11218_v60  ;;  %9533 = vmatpush3.bf16.msra.mxu0 %v11218_v60 }
 0x2eb   : > { %9439 = vmatprep.subr.bf16.mxu1 %v11230_v2  ;;  %9535 = vmatprep.subr.bf16.mxu0 %v11230_v2 }
 0x2ec   : > { %2807 = vmatprep.mubr.f32.mxu1 %v7195_v32  ;;  %3173 = vmatprep.mubr.f32.mxu0 %v7243_v31  ;;  %v7279_v31 = vld [vmem:[%s13529_s3 + $0x778] sm:$0xff] }
 0x2ed   : > { %2808 = vmatmul.mubr.f32.gmra.mrb[106].mxu1 %v7194_v34  ;;  %3174 = vmatmul.mubr.f32.gmra.mrb[106].mxu0 %v7242_v36 }
 0x2ee   : > { %9441 = vmatpush3.bf16.msra.mxu1 %v11238_v5  ;;  %9537 = vmatpush3.bf16.msra.mxu0 %v11238_v5 }
 0x2ef   : > { %9443 = vmatprep.subr.bf16.mxu1 %v11250_v19  ;;  %9539 = vmatprep.subr.bf16.mxu0 %v11250_v19 }
 0x2f0   : > { %2812 = vmatprep.mubr.f32.mxu1 %v7197_v38  ;;  %3178 = vmatprep.mubr.f32.mxu0 %v7245_v33  ;;  %v7230_v33 = vld [vmem:[%s13529_s3 + $0x5f0] sm:$0xff] }
 0x2f1   : > { %2813 = vmatmul.mubr.f32.gmra.mrb[108].mxu1 %v7196_v18  ;;  %3179 = vmatmul.mubr.f32.gmra.mrb[108].mxu0 %v7244_v39  ;;  %v7278_v39 = vld [vmem:[%s13529_s3 + $0x770] sm:$0xff] }
 0x2f2   : > { %9445 = vmatpush3.bf16.msra.mxu1 %v11258_v22  ;;  %9541 = vmatpush3.bf16.msra.mxu0 %v11258_v22 }
 0x2f3   : > { %9447 = vmatprep.subr.bf16.mxu1 %v11276_v52  ;;  %9543 = vmatprep.subr.bf16.mxu0 %v11276_v52 }
 0x2f4   : > { %2817 = vmatprep.mubr.f32.mxu1 %v7199_v42  ;;  %3183 = vmatprep.mubr.f32.mxu0 %v7247_v44  ;;  %v7249_v42 = vld [vmem:[%s13529_s3 + $0x688] sm:$0xff] }
 0x2f5   : > { %2818 = vmatmul.mubr.f32.gmra.mrb[110].mxu1 %v7198_v35  ;;  %3184 = vmatmul.mubr.f32.gmra.mrb[110].mxu0 %v7246_v46 }
 0x2f6   : > { %9449 = vmatpush3.bf16.msra.mxu1 %v11272_v3  ;;  %9545 = vmatpush3.bf16.msra.mxu0 %v11272_v3 }
 0x2f7   : > { %9483 = vmatprep.subr.bf16.mxu1 %v11124_v49  ;;  %3026 = vmatprep.mubr.f32.mxu1 %v7217_v47 }
 0x2f8   : > { %3392 = vmatprep.mubr.f32.mxu0 %v7265_v50 }
 0x2f9   : > { %3027 = vmatmul.mubr.f32.vlgmr.msra.gmra.mrb[112].mxu1 %v7216_v56  ;;  %3393 = vmatmul.mubr.f32.vlgmr.msra.gmra.mrb[112].mxu0 %v7264_v57  ;;  %v7248_v57 = vld [vmem:[%s13529_s3 + $0x680] sm:$0xff] }
 0x2fa   : > { %9485 = vmatpush3.bf16.msra.mxu1 %v11132_v51  ;;  %3031 = vmatprep.mubr.f32.mxu1 %v7219_v37 }
 0x2fb   : > { %9487 = vmatprep.subr.bf16.mxu1 %v11144_v55  ;;  %3397 = vmatprep.mubr.f32.mxu0 %v7267_v1  ;;  %v7251_v1 = vld [vmem:[%s13529_s3 + $0x698] sm:$0xff] }
 0x2fd   : > { %3032 = vmatmul.mubr.f32.gmra.mrb[114].mxu1 %v7218_v59  ;;  %3398 = vmatmul.mubr.f32.gmra.mrb[114].mxu0 %v7266_v62 }
 0x2fe   : > { %9489 = vmatpush3.bf16.msra.mxu1 %v11152_v24  ;;  %3036 = vmatprep.mubr.f32.mxu1 %v7221_v63 }
 0x2ff   : > { %9491 = vmatprep.subr.bf16.mxu1 %v11170_v27  ;;  %3402 = vmatprep.mubr.f32.mxu0 %v7269_v61 }
 0x301   : > { %3037 = vmatmul.mubr.f32.gmra.mrb[116].mxu1 %v7220_v12  ;;  %3403 = vmatmul.mubr.f32.gmra.mrb[116].mxu0 %v7268_v40 }
 0x302   : > { %9493 = vmatpush3.bf16.msra.mxu1 %v11178_v54  ;;  %3041 = vmatprep.mubr.f32.mxu1 %v7223_v25  ;;  %v7253_v25 = vld [vmem:[%s13529_s3 + $0x6a8] sm:$0xff] }
 0x303   : > { %9495 = vmatprep.subr.bf16.mxu1 %v11190_v16  ;;  %3407 = vmatprep.mubr.f32.mxu0 %v7271_v0 }
 0x305   : > { %3042 = vmatmul.mubr.f32.gmra.mrb[118].mxu1 %v7222_v11  ;;  %3408 = vmatmul.mubr.f32.gmra.mrb[118].mxu0 %v7270_v41 }
 0x306   : > { %9497 = vmatpush3.bf16.msra.mxu1 %v11198_v28  ;;  %3046 = vmatprep.mubr.f32.mxu1 %v7225_v4 }
 0x307   : > { %9499 = vmatprep.subr.bf16.mxu1 %v11210_v53  ;;  %3412 = vmatprep.mubr.f32.mxu0 %v7273_v23 }
 0x309   : > { %3047 = vmatmul.mubr.f32.gmra.mrb[120].mxu1 %v7224_v6  ;;  %3413 = vmatmul.mubr.f32.gmra.mrb[120].mxu0 %v7272_v43  ;;  %v7255_v43 = vld [vmem:[%s13529_s3 + $0x6b8] sm:$0xff] }
 0x30a   : > { %9501 = vmatpush3.bf16.msra.mxu1 %v11218_v60  ;;  %3051 = vmatprep.mubr.f32.mxu1 %v7227_v7 }
 0x30b   : > { %9503 = vmatprep.subr.bf16.mxu1 %v11230_v2  ;;  %3417 = vmatprep.mubr.f32.mxu0 %v7275_v13 }
 0x30c   : > { %v7462_v8 = vpop.f32.mrb[16].mxu1  ;;  %v7574_v29 = vpop.f32.mrb[16].mxu0 }
 0x30d   : > { %v7463_v15 = vpop.f32.mrb[17].mxu1  ;;  %3052 = vmatmul.mubr.f32.gmra.mrb[122].mxu1 %v7226_v10  ;;  %3418 = vmatmul.mubr.f32.gmra.mrb[122].mxu0 %v7274_v14  ;;  %v7575_v45 = vpop.f32.mrb[17].mxu0 }
 0x30e   : > { %v12133_v20 = vadd.f32 %v7463_v15, %v7462_v8  ;;  %9505 = vmatpush3.bf16.msra.mxu1 %v11238_v5  ;;  %3056 = vmatprep.mubr.f32.mxu1 %v7229_v58  ;;  %v7576_v9 = vadd.f32 %v7575_v45, %v7574_v29  ;;  %v7257_v8 = vld [vmem:[%s13529_s3 + $0x6c8] sm:$0xff] }
 0x30f   : > { %9507 = vmatprep.subr.bf16.mxu1 %v11250_v19  ;;  %3422 = vmatprep.mubr.f32.mxu0 %v7277_v17 }
 0x310   : > { %v7465_v30 = vpop.f32.mrb[18].mxu1  ;;  %v7577_v32 = vpop.f32.mrb[18].mxu0 }
 0x311   : > { %v7466_v34 = vpop.f32.mrb[19].mxu1  ;;  %3057 = vmatmul.mubr.f32.gmra.mrb[124].mxu1 %v7228_v21  ;;  %v7578_v36 = vpop.f32.mrb[19].mxu0  ;;  %3423 = vmatmul.mubr.f32.gmra.mrb[124].mxu0 %v7276_v48  ;;  %v7259_v48 = vld [vmem:[%s13529_s3 + $0x6d8] sm:$0xff] }
 0x312   : > { %v12149_v38 = vadd.f32 %v7466_v34, %v7465_v30  ;;  %9509 = vmatpush3.bf16.msra.mxu1 %v11258_v22  ;;  %3061 = vmatprep.mubr.f32.mxu1 %v7231_v26  ;;  %v7579_v18 = vadd.f32 %v7578_v36, %v7577_v32  ;;  %v7261_v36 = vld [vmem:[%s13529_s3 + $0x6e8] sm:$0xff] }
 0x313   : > { %9511 = vmatprep.subr.bf16.mxu1 %v11276_v52  ;;  %3427 = vmatprep.mubr.f32.mxu0 %v7279_v31 }
 0x314   : > { %v7468_v44 = vpop.f32.mrb[20].mxu1  ;;  %v10036_v35 = vpack.i.bf16 %v7579_v18, %v7576_v9  ;;  %v7580_v46 = vpop.f32.mrb[20].mxu0 }
 0x315   : > { %v7469_v47 = vpop.f32.mrb[21].mxu1  ;;  %3062 = vmatmul.mubr.f32.gmra.mrb[126].mxu1 %v7230_v33  ;;  %v7581_v50 = vpop.f32.mrb[21].mxu0  ;;  %3428 = vmatmul.mubr.f32.gmra.mrb[126].mxu0 %v7278_v39 }
 0x316   : > { %v12162_v56 = vadd.f32 %v7469_v47, %v7468_v44  ;;  %9513 = vmatpush3.bf16.msra.mxu1 %v11272_v3  ;;  %3270 = vmatprep.mubr.f32.mxu1 %v7249_v42  ;;  %v7582_v37 = vadd.f32 %v7581_v50, %v7580_v46 }
 0x317   : > { %9547 = vmatprep.subr.bf16.mxu1 %v11124_v49  ;;  %10037 = vrot.lane.b32.xlu1 %v10036_v35, %s13530_s23  ;;  %v7250_v49 = vld [vmem:[%s13529_s3 + $0x690] sm:$0xff] }
 0x318   : > { %v7471_v59 = vpop.f32.mrb[22].mxu1  ;;  %v7583_v62 = vpop.f32.mrb[22].mxu0 }
 0x319   : > { %v7472_v63 = vpop.f32.mrb[23].mxu1  ;;  %3271 = vmatmul.mubr.f32.vlgmr.msra.gmra.mrb[128].mxu1 %v7248_v57  ;;  %v7584_v61 = vpop.f32.mrb[23].mxu0 }
 0x31a   : > { %v12173_v12 = vadd.f32 %v7472_v63, %v7471_v59  ;;  %9549 = vmatpush3.bf16.msra.mxu1 %v11132_v51  ;;  %3275 = vmatprep.mubr.f32.mxu1 %v7251_v1  ;;  %v7585_v40 = vadd.f32 %v7584_v61, %v7583_v62  ;;  %v7252_v51 = vld [vmem:[%s13529_s3 + $0x6a0] sm:$0xff]  ;;  %v7262_v1 = vld [vmem:[%s13529_s3 + $0x6f0] sm:$0xff]  ;;  %v7281_v63 = vld [vmem:[%s13529_s3 + $0x788] sm:$0xff] }
 0x31b   : > { %9551 = vmatprep.subr.bf16.mxu1 %v11144_v55 }
 0x31c   : > { %v7474_v0 = vpop.f32.mrb[24].mxu1  ;;  %v10041_v11 = vpack.i.bf16 %v7585_v40, %v7582_v37  ;;  %v7586_v41 = vpop.f32.mrb[24].mxu0 }
 0x31d   : > { %v7475_v4 = vpop.f32.mrb[25].mxu1  ;;  %3276 = vmatmul.mubr.f32.gmra.mrb[130].mxu1 %v7250_v49  ;;  %v7587_v23 = vpop.f32.mrb[25].mxu0 }
 0x31e   : > { %v12183_v6 = vadd.f32 %v7475_v4, %v7474_v0  ;;  %9553 = vmatpush3.bf16.msra.mxu1 %v11152_v24  ;;  %3280 = vmatprep.mubr.f32.mxu1 %v7253_v25  ;;  %v7588_v55 = vadd.f32 %v7587_v23, %v7586_v41 }
 0x31f   : > { %9555 = vmatprep.subr.bf16.mxu1 %v11170_v27  ;;  %10042 = vrot.lane.b32.xlu0 %v10041_v11, %s13530_s23  ;;  %v7254_v27 = vld [vmem:[%s13529_s3 + $0x6b0] sm:$0xff]  ;;  %v7283_v11 = vld [vmem:[%s13529_s3 + $0x798] sm:$0xff] }
 0x320   : > { %v7477_v7 = vpop.f32.mrb[26].mxu1  ;;  %v7589_v13 = vpop.f32.mrb[26].mxu0 }
 0x321   : > { %v7478_v10 = vpop.f32.mrb[27].mxu1  ;;  %3281 = vmatmul.mubr.f32.gmra.mrb[132].mxu1 %v7252_v51  ;;  %v7590_v14 = vpop.f32.mrb[27].mxu0 }
 0x322   : > { %v12194_v24 = vadd.f32 %v7478_v10, %v7477_v7  ;;  %9557 = vmatpush3.bf16.msra.mxu1 %v11178_v54  ;;  %3285 = vmatprep.mubr.f32.mxu1 %v7255_v43  ;;  %v7591_v58 = vadd.f32 %v7590_v14, %v7589_v13  ;;  %v7256_v54 = vld [vmem:[%s13529_s3 + $0x6c0] sm:$0xff]  ;;  %v7282_v43 = vld [vmem:[%s13529_s3 + $0x790] sm:$0xff]  ;;  %v7285_v7 = vld [vmem:[%s13529_s3 + $0x7a8] sm:$0xff] }
 0x323   : > { %9559 = vmatprep.subr.bf16.mxu1 %v11190_v16 }
 0x324   : > { %v7480_v29 = vpop.f32.mrb[28].mxu1  ;;  %v10046_v17 = vpack.i.bf16 %v7591_v58, %v7588_v55  ;;  %v7592_v15 = vpop.f32.mrb[28].mxu0 }
 0x325   : > { %v7481_v45 = vpop.f32.mrb[29].mxu1  ;;  %3286 = vmatmul.mubr.f32.gmra.mrb[134].mxu1 %v7254_v27  ;;  %v7593_v21 = vpop.f32.mrb[29].mxu0 }
 0x326   : > { %v12204_v9 = vadd.f32 %v7481_v45, %v7480_v29  ;;  %9561 = vmatpush3.bf16.msra.mxu1 %v11198_v28  ;;  %3290 = vmatprep.mubr.f32.mxu1 %v7257_v8  ;;  %v7594_v16 = vadd.f32 %v7593_v21, %v7592_v15  ;;  %v7287_v45 = vld [vmem:[%s13529_s3 + $0x7b8] sm:$0xff] }
 0x327   : > { %9563 = vmatprep.subr.bf16.mxu1 %v11210_v53  ;;  %10047 = vrot.lane.b32.xlu1 %v10046_v17, %s13530_s23  ;;  %v7258_v53 = vld [vmem:[%s13529_s3 + $0x6d0] sm:$0xff]  ;;  %v7284_v17 = vld [vmem:[%s13529_s3 + $0x7a0] sm:$0xff] }
 0x328   : > { %v7483_v26 = vpop.f32.mrb[30].mxu1  ;;  %v7595_v30 = vpop.f32.mrb[30].mxu0 }
 0x329   : > { %v7484_v32 = vpop.f32.mrb[31].mxu1  ;;  %3291 = vmatmul.mubr.f32.gmra.mrb[136].mxu1 %v7256_v54  ;;  %v7596_v31 = vpop.f32.mrb[31].mxu0 }
 0x32a   : > { %v12215_v28 = vadd.f32 %v7484_v32, %v7483_v26  ;;  %9565 = vmatpush3.bf16.msra.mxu1 %v11218_v60  ;;  %3295 = vmatprep.mubr.f32.mxu1 %v7259_v48  ;;  %v7597_v34 = vadd.f32 %v7596_v31, %v7595_v30  ;;  %v7260_v60 = vld [vmem:[%s13529_s3 + $0x6e0] sm:$0xff]  ;;  %v7286_v30 = vld [vmem:[%s13529_s3 + $0x7b0] sm:$0xff]  ;;  %v7289_v31 = vld [vmem:[%s13529_s3 + $0x7c8] sm:$0xff] }
 0x32b   : > { %9567 = vmatprep.subr.bf16.mxu1 %v11230_v2  ;;  %v7263_v2 = vld [vmem:[%s13529_s3 + $0x6f8] sm:$0xff] }
 0x32c   : > { %v7518_v33 = vpop.f32.mrb[32].mxu1  ;;  %v10051_v18 = vpack.i.bf16 %v7597_v34, %v7594_v16  ;;  %v7686_v39 = vpop.f32.mrb[32].mxu0 }
 0x32d   : > { %v7519_v42 = vpop.f32.mrb[33].mxu1  ;;  %3296 = vmatmul.mubr.f32.gmra.mrb[138].mxu1 %v7258_v53  ;;  %v7687_v44 = vpop.f32.mrb[33].mxu0 }
 0x32e   : > { %v7520_v35 = vadd.f32 %v7519_v42, %v7518_v33  ;;  %9569 = vmatpush3.bf16.msra.mxu1 %v11238_v5  ;;  %3300 = vmatprep.mubr.f32.mxu1 %v7261_v36  ;;  %v7688_v46 = vadd.f32 %v7687_v44, %v7686_v39  ;;  %v7288_v44 = vld [vmem:[%s13529_s3 + $0x7c0] sm:$0xff] }
 0x32f   : > { %9571 = vmatprep.subr.bf16.mxu1 %v11250_v19  ;;  %10052 = vrot.lane.b32.xlu0 %v10051_v18, %s13530_s23 }
 0x330   : > { %v7521_v47 = vpop.f32.mrb[34].mxu1  ;;  %v7689_v50 = vpop.f32.mrb[34].mxu0 }
 0x331   : > { %v7522_v57 = vpop.f32.mrb[35].mxu1  ;;  %3301 = vmatmul.mubr.f32.gmra.mrb[140].mxu1 %v7260_v60  ;;  %v7690_v37 = vpop.f32.mrb[35].mxu0  ;;  %v7291_v60 = vld [vmem:[%s13529_s3 + $0x7d8] sm:$0xff] }
 0x332   : > { %v7523_v5 = vadd.f32 %v7522_v57, %v7521_v47  ;;  %9573 = vmatpush3.bf16.msra.mxu1 %v11258_v22  ;;  %3305 = vmatprep.mubr.f32.mxu1 %v7263_v2  ;;  %v7691_v19 = vadd.f32 %v7690_v37, %v7689_v50 }
 0x333   : > { %9575 = vmatprep.subr.bf16.mxu1 %v11276_v52  ;;  %v7280_v52 = vld [vmem:[%s13529_s3 + $0x780] sm:$0xff] }
 0x334   : > { %v10056_v59 = vpack.i.bf16 %v7523_v5, %v7520_v35  ;;  %v7524_v62 = vpop.f32.mrb[36].mxu1  ;;  %v10061_v61 = vpack.i.bf16 %v7691_v19, %v7688_v46  ;;  %v7692_v49 = vpop.f32.mrb[36].mxu0  ;;  %v7290_v5 = vld [vmem:[%s13529_s3 + $0x7d0] sm:$0xff] }
 0x335   : > { %v7525_v40 = vpop.f32.mrb[37].mxu1  ;;  %3306 = vmatmul.mubr.f32.gmra.mrb[142].mxu1 %v7262_v1  ;;  %v7693_v25 = vpop.f32.mrb[37].mxu0  ;;  %v7293_v1 = vld [vmem:[%s13529_s3 + $0x7e8] sm:$0xff] }
 0x336   : > { %v7526_v22 = vadd.f32 %v7525_v40, %v7524_v62  ;;  %9577 = vmatpush3.bf16.msra.mxu1 %v11272_v3  ;;  %10057 = vrot.lane.b32.xlu0 %v10056_v59, %s13493_s25  ;;  %v7694_v0 = vadd.f32 %v7693_v25, %v7692_v49  ;;  %v7292_v25 = vld [vmem:[%s13529_s3 + $0x7e0] sm:$0xff]  ;;  %s10509_s25 = smov 56  }
 0x337   : > { %3514 = vmatprep.mubr.f32.mxu1 %v7281_v63  ;;  %10062 = vrot.lane.b32.xlu1 %v10061_v61, %s13531_s27 }
 0x338   : > { %v7527_v41 = vpop.f32.mrb[38].mxu1  ;;  %v7695_v4 = vpop.f32.mrb[38].mxu0 }
 0x339   : > { %v7528_v23 = vpop.f32.mrb[39].mxu1  ;;  %3515 = vmatmul.mubr.f32.vlgmr.msra.gmra.mrb[144].mxu1 %v7280_v52  ;;  %v7696_v3 = vpop.f32.mrb[39].mxu0  ;;  %v7295_v52 = vld [vmem:[%s13529_s3 + $0x7f8] sm:$0xff] }
 0x33a   : > { %v7529_v51 = vadd.f32 %v7528_v23, %v7527_v41  ;;  %3519 = vmatprep.mubr.f32.mxu1 %v7283_v11  ;;  %v7697_v55 = vadd.f32 %v7696_v3, %v7695_v4  ;;  %v7294_v3 = vld [vmem:[%s13529_s3 + $0x7f0] sm:$0xff] }
 0x33c   : > { %v10066_v13 = vpack.i.bf16 %v7529_v51, %v7526_v22  ;;  %v7530_v10 = vpop.f32.mrb[40].mxu1  ;;  %v10071_v14 = vpack.i.bf16 %v7697_v55, %v7694_v0  ;;  %v7698_v27 = vpop.f32.mrb[40].mxu0 }
 0x33d   : > { %v7531_v58 = vpop.f32.mrb[41].mxu1  ;;  %3520 = vmatmul.mubr.f32.gmra.mrb[146].mxu1 %v7282_v43  ;;  %v7699_v8 = vpop.f32.mrb[41].mxu0 }
 0x33e   : > { %v7532_v29 = vadd.f32 %v7531_v58, %v7530_v10  ;;  %10067 = vrot.lane.b32.xlu0 %v10066_v13, %s13532_s17  ;;  %3524 = vmatprep.mubr.f32.mxu1 %v7285_v7  ;;  %v7700_v15 = vadd.f32 %v7699_v8, %v7698_v27 }
 0x340   : > { %v7533_v21 = vpop.f32.mrb[42].mxu1  ;;  %v7701_v54 = vpop.f32.mrb[42].mxu0 }
 0x341   : > { %v7534_v16 = vpop.f32.mrb[43].mxu1  ;;  %3525 = vmatmul.mubr.f32.gmra.mrb[148].mxu1 %v7284_v17  ;;  %v7702_v48 = vpop.f32.mrb[43].mxu0 }
 0x342   : > { %v7535_v26 = vadd.f32 %v7534_v16, %v7533_v21  ;;  %10072 = vrot.lane.b32.xlu0 %v10071_v14, %s13531_s27  ;;  %3529 = vmatprep.mubr.f32.mxu1 %v7287_v45  ;;  %v7703_v32 = vadd.f32 %v7702_v48, %v7701_v54 }
 0x344   : > { %v10076_v34 = vpack.i.bf16 %v7535_v26, %v7532_v29  ;;  %v7536_v53 = vpop.f32.mrb[44].mxu1  ;;  %v10081_v36 = vpack.i.bf16 %v7703_v32, %v7700_v15  ;;  %v7704_v33 = vpop.f32.mrb[44].mxu0 }
 0x345   : > { %v7537_v18 = vpop.f32.mrb[45].mxu1  ;;  %3530 = vmatmul.mubr.f32.gmra.mrb[150].mxu1 %v7286_v30  ;;  %v7705_v39 = vpop.f32.mrb[45].mxu0 }
 0x346   : > { %v7538_v42 = vadd.f32 %v7537_v18, %v7536_v53  ;;  %10077 = vrot.lane.b32.xlu0 %v10076_v34, %s13532_s17  ;;  %3534 = vmatprep.mubr.f32.mxu1 %v7289_v31  ;;  %v7706_v35 = vadd.f32 %v7705_v39, %v7704_v33 }
 0x347   : > { %10082 = vrot.lane.b32.xlu1 %v10081_v36, %s13531_s27 }
 0x348   : > { %v7539_v46 = vpop.f32.mrb[46].mxu1  ;;  %v7707_v2 = vpop.f32.mrb[46].mxu0 }
 0x349   : > { %v7540_v47 = vpop.f32.mrb[47].mxu1  ;;  %3535 = vmatmul.mubr.f32.gmra.mrb[152].mxu1 %v7288_v44  ;;  %v7708_v50 = vpop.f32.mrb[47].mxu0 }
 0x34a   : > { %v7541_v57 = vadd.f32 %v7540_v47, %v7539_v46  ;;  %3539 = vmatprep.mubr.f32.mxu1 %v7291_v60  ;;  %v7709_v37 = vadd.f32 %v7708_v50, %v7707_v2 }
 0x34c   : > { %v10086_v19 = vpack.i.bf16 %v7541_v57, %v7538_v42  ;;  %v7630_v59 = vpop.f32.mrb[48].mxu1  ;;  %v10091_v62 = vpack.i.bf16 %v7709_v37, %v7706_v35  ;;  %v7798_v63 = vpop.f32.mrb[48].mxu0 }
 0x34d   : > { %v7631_v61 = vpop.f32.mrb[49].mxu1  ;;  %3540 = vmatmul.mubr.f32.gmra.mrb[154].mxu1 %v7290_v5  ;;  %v7799_v49 = vpop.f32.mrb[49].mxu0 }
 0x34e   : > { %v7632_v40 = vadd.f32 %v7631_v61, %v7630_v59  ;;  %10087 = vrot.lane.b32.xlu0 %v10086_v19, %s13532_s17  ;;  %3544 = vmatprep.mubr.f32.mxu1 %v7293_v1  ;;  %v7800_v22 = vadd.f32 %v7799_v49, %v7798_v63 }
 0x350   : > { %v7633_v0 = vpop.f32.mrb[50].mxu1  ;;  %v7801_v11 = vpop.f32.mrb[50].mxu0 }
 0x351   : > { %v7634_v41 = vpop.f32.mrb[51].mxu1  ;;  %3545 = vmatmul.mubr.f32.gmra.mrb[156].mxu1 %v7292_v25  ;;  %v7802_v4 = vpop.f32.mrb[51].mxu0 }
 0x352   : > { %v7635_v23 = vadd.f32 %v7634_v41, %v7633_v0  ;;  %10092 = vrot.lane.b32.xlu0 %v10091_v62, %s13531_s27  ;;  %3549 = vmatprep.mubr.f32.mxu1 %v7295_v52  ;;  %v7803_v51 = vadd.f32 %v7802_v4, %v7801_v11 }
 0x354   : > { %v10096_v55 = vpack.i.bf16 %v7635_v23, %v7632_v40  ;;  %v7636_v43 = vpop.f32.mrb[52].mxu1  ;;  %v10101_v7 = vpack.i.bf16 %v7803_v51, %v7800_v22  ;;  %v7804_v13 = vpop.f32.mrb[52].mxu0 }
 0x355   : > { %v7637_v10 = vpop.f32.mrb[53].mxu1  ;;  %3550 = vmatmul.mubr.f32.gmra.mrb[158].mxu1 %v7294_v3  ;;  %v7805_v14 = vpop.f32.mrb[53].mxu0 }
 0x356   : > { %v7638_v27 = vadd.f32 %v7637_v10, %v7636_v43  ;;  %10097 = vrot.lane.b32.xlu0 %v10096_v55, %s13497_s16  ;;  %v7806_v58 = vadd.f32 %v7805_v14, %v7804_v13  ;;  %10102 = vrot.lane.b32.xlu1 %v10101_v7, %s13533_s30 }
 0x358   : > { %v7639_v8 = vpop.f32.mrb[54].mxu1  ;;  %v7807_v29 = vpop.f32.mrb[54].mxu0 }
 0x359   : > { %v7640_v17 = vpop.f32.mrb[55].mxu1  ;;  %v7808_v15 = vpop.f32.mrb[55].mxu0 }
 0x35a   : > { %v7641_v45 = vadd.f32 %v7640_v17, %v7639_v8  ;;  %v7809_v21 = vadd.f32 %v7808_v15, %v7807_v29 }
 0x35c   : > { %v10106_v54 = vpack.i.bf16 %v7641_v45, %v7638_v27  ;;  %v7642_v16 = vpop.f32.mrb[56].mxu1  ;;  %v10111_v48 = vpack.i.bf16 %v7809_v21, %v7806_v58  ;;  %v7810_v26 = vpop.f32.mrb[56].mxu0 }
 0x35d   : > { %v7643_v30 = vpop.f32.mrb[57].mxu1  ;;  %v7811_v32 = vpop.f32.mrb[57].mxu0 }
 0x35e   : > { %v7644_v31 = vadd.f32 %v7643_v30, %v7642_v16  ;;  %10107 = vrot.lane.b32.xlu0 %v10106_v54, %s13497_s16  ;;  %v7812_v34 = vadd.f32 %v7811_v32, %v7810_v26 }
 0x360   : > { %v7645_v53 = vpop.f32.mrb[58].mxu1  ;;  %v7813_v36 = vpop.f32.mrb[58].mxu0 }
 0x361   : > { %v7646_v33 = vpop.f32.mrb[59].mxu1  ;;  %v7814_v18 = vpop.f32.mrb[59].mxu0 }
 0x362   : > { %v7647_v39 = vadd.f32 %v7646_v33, %v7645_v53  ;;  %10112 = vrot.lane.b32.xlu0 %v10111_v48, %s13533_s30  ;;  %v7815_v42 = vadd.f32 %v7814_v18, %v7813_v36 }
 0x364   : > { %v10116_v44 = vpack.i.bf16 %v7647_v39, %v7644_v31  ;;  %v7648_v35 = vpop.f32.mrb[60].mxu1  ;;  %v10121_v60 = vpack.i.bf16 %v7815_v42, %v7812_v34  ;;  %v7816_v46 = vpop.f32.mrb[60].mxu0 }
 0x365   : > { %v7649_v2 = vpop.f32.mrb[61].mxu1  ;;  %v7817_v47 = vpop.f32.mrb[61].mxu0 }
 0x366   : > { %v7650_v50 = vadd.f32 %v7649_v2, %v7648_v35  ;;  %10117 = vrot.lane.b32.xlu0 %v10116_v44, %s13497_s16  ;;  %v7818_v57 = vadd.f32 %v7817_v47, %v7816_v46  ;;  %10122 = vrot.lane.b32.xlu1 %v10121_v60, %s13533_s30 }
 0x368   : > { %v7651_v37 = vpop.f32.mrb[62].mxu1  ;;  %v7819_v5 = vpop.f32.mrb[62].mxu0 }
 0x369   : > { %v7652_v1 = vpop.f32.mrb[63].mxu1  ;;  %v7820_v19 = vpop.f32.mrb[63].mxu0 }
 0x36a   : > { %v7653_v59 = vadd.f32 %v7652_v1, %v7651_v37  ;;  %v7821_v62 = vadd.f32 %v7820_v19, %v7819_v5 }
 0x36c   : > { %v10126_v63 = vpack.i.bf16 %v7653_v59, %v7650_v50  ;;  %v7742_v61 = vpop.f32.mrb[64].mxu1  ;;  %v10131_v49 = vpack.i.bf16 %v7821_v62, %v7818_v57  ;;  %v7910_v40 = vpop.f32.mrb[64].mxu0 }
 0x36d   : > { %v7743_v25 = vpop.f32.mrb[65].mxu1  ;;  %v7911_v22 = vpop.f32.mrb[65].mxu0 }
 0x36e   : > { %v7744_v52 = vadd.f32 %v7743_v25, %v7742_v61  ;;  %10127 = vrot.lane.b32.xlu0 %v10126_v63, %s13497_s16  ;;  %v7912_v0 = vadd.f32 %v7911_v22, %v7910_v40  ;;  %s13504_s16 = smov 112  }
 0x370   : > { %v7745_v11 = vpop.f32.mrb[66].mxu1  ;;  %v7913_v41 = vpop.f32.mrb[66].mxu0 }
 0x371   : > { %v7746_v4 = vpop.f32.mrb[67].mxu1  ;;  %v7914_v23 = vpop.f32.mrb[67].mxu0 }
 0x372   : > { %v7747_v3 = vadd.f32 %v7746_v4, %v7745_v11  ;;  %v7915_v51 = vadd.f32 %v7914_v23, %v7913_v41  ;;  %10132 = vrot.lane.b32.xlu0 %v10131_v49, %s13533_s30 }
 0x374   : > { %v10136_v55 = vpack.i.bf16 %v7747_v3, %v7744_v52  ;;  %v7748_v43 = vpop.f32.mrb[68].mxu1  ;;  %v10141_v7 = vpack.i.bf16 %v7915_v51, %v7912_v0  ;;  %v7916_v13 = vpop.f32.mrb[68].mxu0 }
 0x375   : > { %v7749_v10 = vpop.f32.mrb[69].mxu1  ;;  %v7917_v14 = vpop.f32.mrb[69].mxu0 }
 0x376   : > { %v7750_v27 = vadd.f32 %v7749_v10, %v7748_v43  ;;  %10137 = vrot.lane.b32.xlu1 %v10136_v55, %s13495_s0  ;;  %v7918_v58 = vadd.f32 %v7917_v14, %v7916_v13 }
 0x378   : > { %v7751_v8 = vpop.f32.mrb[70].mxu1  ;;  %v7919_v29 = vpop.f32.mrb[70].mxu0 }
 0x379   : > { %v7752_v17 = vpop.f32.mrb[71].mxu1  ;;  %v7920_v15 = vpop.f32.mrb[71].mxu0 }
 0x37a   : > { %v7753_v45 = vadd.f32 %v7752_v17, %v7751_v8  ;;  %10142 = vrot.lane.b32.xlu1 %v10141_v7, %s13500_s20  ;;  %v7921_v21 = vadd.f32 %v7920_v15, %v7919_v29 }
 0x37c   : > { %v10146_v54 = vpack.i.bf16 %v7753_v45, %v7750_v27  ;;  %v7754_v16 = vpop.f32.mrb[72].mxu1  ;;  %v10151_v48 = vpack.i.bf16 %v7921_v21, %v7918_v58  ;;  %v7922_v26 = vpop.f32.mrb[72].mxu0 }
 0x37d   : > { %v7755_v30 = vpop.f32.mrb[73].mxu1  ;;  %v7923_v32 = vpop.f32.mrb[73].mxu0 }
 0x37e   : > { %v7756_v31 = vadd.f32 %v7755_v30, %v7754_v16  ;;  %10147 = vrot.lane.b32.xlu1 %v10146_v54, %s13495_s0  ;;  %v7924_v34 = vadd.f32 %v7923_v32, %v7922_v26  ;;  %10152 = vrot.lane.b32.xlu0 %v10151_v48, %s13500_s20 }
 0x380   : > { %v7757_v53 = vpop.f32.mrb[74].mxu1  ;;  %v7925_v36 = vpop.f32.mrb[74].mxu0 }
 0x381   : > { %v7758_v33 = vpop.f32.mrb[75].mxu1  ;;  %v7926_v18 = vpop.f32.mrb[75].mxu0 }
 0x382   : > { %v7759_v39 = vadd.f32 %v7758_v33, %v7757_v53  ;;  %v7927_v42 = vadd.f32 %v7926_v18, %v7925_v36 }
 0x384   : > { %v10156_v44 = vpack.i.bf16 %v7759_v39, %v7756_v31  ;;  %v7760_v35 = vpop.f32.mrb[76].mxu1  ;;  %v10161_v60 = vpack.i.bf16 %v7927_v42, %v7924_v34  ;;  %v7928_v46 = vpop.f32.mrb[76].mxu0 }
 0x385   : > { %v7761_v2 = vpop.f32.mrb[77].mxu1  ;;  %v7929_v47 = vpop.f32.mrb[77].mxu0 }
 0x386   : > { %v7762_v50 = vadd.f32 %v7761_v2, %v7760_v35  ;;  %10157 = vrot.lane.b32.xlu1 %v10156_v44, %s13495_s0  ;;  %v7930_v57 = vadd.f32 %v7929_v47, %v7928_v46 }
 0x388   : > { %v7763_v37 = vpop.f32.mrb[78].mxu1  ;;  %v7931_v5 = vpop.f32.mrb[78].mxu0 }
 0x389   : > { %v7764_v1 = vpop.f32.mrb[79].mxu1  ;;  %v7932_v19 = vpop.f32.mrb[79].mxu0 }
 0x38a   : > { %v7765_v59 = vadd.f32 %v7764_v1, %v7763_v37  ;;  %10162 = vrot.lane.b32.xlu1 %v10161_v60, %s13500_s20  ;;  %v7933_v62 = vadd.f32 %v7932_v19, %v7931_v5  ;;  %v10038_v35 = vpop.permute.xlu1 %10037 }
 0x38b   : > { %v10040_v19 = vunpack.i.h.bf16 %v10038_v35 }
 0x38c   : > { %v10166_v63 = vpack.i.bf16 %v7765_v59, %v7762_v50  ;;  %v7854_v61 = vpop.f32.mrb[80].mxu1  ;;  %v10171_v49 = vpack.i.bf16 %v7933_v62, %v7930_v57  ;;  %v8022_v40 = vpop.f32.mrb[80].mxu0  ;;  %v10039_v59 = vunpack.i.l.bf16 %v10038_v35 }
 0x38d   : > { %v7855_v25 = vpop.f32.mrb[81].mxu1  ;;  %v8023_v22 = vpop.f32.mrb[81].mxu0 }
 0x38e   : > { %v7856_v52 = vadd.f32 %v7855_v25, %v7854_v61  ;;  %10167 = vrot.lane.b32.xlu1 %v10166_v63, %s13495_s0  ;;  %v8024_v0 = vadd.f32 %v8023_v22, %v8022_v40  ;;  %10172 = vrot.lane.b32.xlu0 %v10171_v49, %s13500_s20  ;;  %s13498_s0 = smov 96   ;;  %s13545_s20 = smov 120  }
 0x390   : > { %v7857_v11 = vpop.f32.mrb[82].mxu1  ;;  %v8025_v41 = vpop.f32.mrb[82].mxu0 }
 0x391   : > { %v7858_v4 = vpop.f32.mrb[83].mxu1  ;;  %v8026_v23 = vpop.f32.mrb[83].mxu0 }
 0x392   : > { %v7859_v3 = vadd.f32 %v7858_v4, %v7857_v11  ;;  %v8027_v51 = vadd.f32 %v8026_v23, %v8025_v41  ;;  %v12314_v54 = vpop.permute.xlu0 %10042 }
 0x394   : > { %v10176_v55 = vpack.i.bf16 %v7859_v3, %v7856_v52  ;;  %v7860_v43 = vpop.f32.mrb[84].mxu1  ;;  %v10181_v7 = vpack.i.bf16 %v8027_v51, %v8024_v0  ;;  %v8028_v13 = vpop.f32.mrb[84].mxu0 }
 0x395   : > { %v7861_v10 = vpop.f32.mrb[85].mxu1  ;;  %v8029_v14 = vpop.f32.mrb[85].mxu0 }
 0x396   : > { %v7862_v27 = vadd.f32 %v7861_v10, %v7860_v43  ;;  %10177 = vrot.lane.b32.xlu1 %v10176_v55, %s10509_s25  ;;  %v8030_v58 = vadd.f32 %v8029_v14, %v8028_v13  ;;  %v10044_v14 = vunpack.i.l.bf16 %v12314_v54 }
 0x398   : > { %v7863_v8 = vpop.f32.mrb[86].mxu1  ;;  %v8031_v29 = vpop.f32.mrb[86].mxu0 }
 0x399   : > { %v7864_v17 = vpop.f32.mrb[87].mxu1  ;;  %v8032_v15 = vpop.f32.mrb[87].mxu0 }
 0x39a   : > { %v7865_v45 = vadd.f32 %v7864_v17, %v7863_v8  ;;  %10182 = vrot.lane.b32.xlu1 %v10181_v7, %s13502_s26  ;;  %v8033_v21 = vadd.f32 %v8032_v15, %v8031_v29 }
 0x39c   : > { %v10186_v16 = vpack.i.bf16 %v7865_v45, %v7862_v27  ;;  %v7866_v48 = vpop.f32.mrb[88].mxu1  ;;  %v10191_v26 = vpack.i.bf16 %v8033_v21, %v8030_v58  ;;  %v8034_v30 = vpop.f32.mrb[88].mxu0 }
 0x39d   : > { %v7867_v32 = vpop.f32.mrb[89].mxu1  ;;  %v8035_v31 = vpop.f32.mrb[89].mxu0 }
 0x39e   : > { %v7868_v34 = vadd.f32 %v7867_v32, %v7866_v48  ;;  %10187 = vrot.lane.b32.xlu1 %v10186_v16, %s10509_s25  ;;  %v8036_v53 = vadd.f32 %v8035_v31, %v8034_v30  ;;  %10192 = vrot.lane.b32.xlu0 %v10191_v26, %s13502_s26  ;;  %v10048_v16 = vpop.permute.xlu1 %10047 }
 0x39f   : > { %v10049_v35 = vunpack.i.l.bf16 %v10048_v16 }
 0x3a0   : > { %v7869_v36 = vpop.f32.mrb[90].mxu1  ;;  %v8037_v33 = vpop.f32.mrb[90].mxu0 }
 0x3a1   : > { %v7870_v18 = vpop.f32.mrb[91].mxu1  ;;  %v12318_v42 = vpop.permute.xlu0 %10052 }
 0x3a2   : > { %v7871_v39 = vadd.f32 %v7870_v18, %v7869_v36  ;;  %v8038_v44 = vpop.f32.mrb[91].mxu0 }
 0x3a3   : > { %v8039_v60 = vadd.f32 %v8038_v44, %v8037_v33  ;;  %v10050_v44 = vunpack.i.h.bf16 %v10048_v16 }
 0x3a4   : > { %v10196_v46 = vpack.i.bf16 %v7871_v39, %v7868_v34  ;;  %v7872_v2 = vpop.f32.mrb[92].mxu1  ;;  %v8040_v47 = vpop.f32.mrb[92].mxu0 }
 0x3a5   : > { %v7873_v50 = vpop.f32.mrb[93].mxu1  ;;  %v10201_v57 = vpack.i.bf16 %v8039_v60, %v8036_v53  ;;  %v8041_v37 = vpop.f32.mrb[93].mxu0 }
 0x3a6   : > { %v7874_v5 = vadd.f32 %v7873_v50, %v7872_v2  ;;  %10197 = vrot.lane.b32.xlu1 %v10196_v46, %s10509_s25  ;;  %v8042_v1 = vadd.f32 %v8041_v37, %v8040_v47 }
 0x3a8   : > { %v7875_v62 = vpop.f32.mrb[94].mxu1  ;;  %v10058_v63 = vpop.permute.xlu0 %10057 }
 0x3a9   : > { %v10060_v61 = vunpack.i.h.bf16 %v10058_v63  ;;  %v10059_v49 = vunpack.i.l.bf16 %v10058_v63  ;;  %v7876_v40 = vpop.f32.mrb[95].mxu1  ;;  %v8043_v25 = vpop.f32.mrb[94].mxu0 }
 0x3aa   : > { %v7877_v22 = vadd.f32 %v7876_v40, %v7875_v62  ;;  %10202 = vrot.lane.b32.xlu1 %v10201_v57, %s13502_s26  ;;  %v8044_v52 = vpop.f32.mrb[95].mxu0 }
 0x3ab   : > { %v4035_v0 = vsel %vm1571_vm5, %v12133_v20, %v10059_v49  ;;  %v4036_v11 = vsel %vm1571_vm5, %v12149_v38, %v10060_v61  ;;  %v8045_v41 = vadd.f32 %v8044_v52, %v8043_v25  ;;  %v10045_v38 = vunpack.i.h.bf16 %v12314_v54 }
 0x3ac   : > { %v10206_v4 = vpack.i.bf16 %v7877_v22, %v7874_v5  ;;  %v7966_v23 = vpop.f32.mrb[96].mxu1  ;;  %v8134_v3 = vpop.f32.mrb[96].mxu0  ;;  %v12327_v51 = vsel %vm1039_vm0, %v4035_v0, %v10039_v59  ;;  %v12330_v55 = vsel %vm1039_vm0, %v4036_v11, %v10040_v19  ;;  %v10055_v11 = vunpack.i.h.bf16 %v12318_v42 }
 0x3ad   : > { %v7967_v43 = vpop.f32.mrb[97].mxu1  ;;  %v10211_v7 = vpack.i.bf16 %v8045_v41, %v8042_v1  ;;  %v8135_v13 = vpop.f32.mrb[97].mxu0 }
 0x3ae   : > { %v7968_v10 = vadd.f32 %v7967_v43, %v7966_v23  ;;  %10207 = vrot.lane.b32.xlu1 %v10206_v4, %s10509_s25  ;;  %v8136_v20 = vadd.f32 %v8135_v13, %v8134_v3  ;;  %s13496_s25 = smov 72  }
 0x3af   : > { %10212 = vrot.lane.b32.xlu0 %v10211_v7, %s13502_s26  ;;  %s13546_s26 = smov 40  }
 0x3b0   : > { %v7969_v27 = vpop.f32.mrb[98].mxu1  ;;  %v10068_v58 = vpop.permute.xlu0 %10067 }
 0x3b1   : > { %v10070_v8 = vunpack.i.h.bf16 %v10068_v58  ;;  %v10069_v29 = vunpack.i.l.bf16 %v10068_v58  ;;  %v7970_v17 = vpop.f32.mrb[99].mxu1  ;;  %v8137_v15 = vpop.f32.mrb[98].mxu0 }
 0x3b2   : > { %v7971_v45 = vadd.f32 %v7970_v17, %v7969_v27  ;;  %v8138_v21 = vpop.f32.mrb[99].mxu0 }
 0x3b3   : > { %v4037_v48 = vsel %vm1571_vm5, %v12162_v56, %v10069_v29  ;;  %v4038_v26 = vsel %vm1571_vm5, %v12173_v12, %v10070_v8  ;;  %v8139_v30 = vadd.f32 %v8138_v21, %v8137_v15 }
 0x3b4   : > { %v10216_v32 = vpack.i.bf16 %v7971_v45, %v7968_v10  ;;  %v7972_v31 = vpop.f32.mrb[100].mxu1  ;;  %v12340_v34 = vpop.permute.xlu0 %10072  ;;  %v12343_v54 = vsel %vm1039_vm0, %v4037_v48, %v10044_v14  ;;  %v12346_v53 = vsel %vm1039_vm0, %v4038_v26, %v10045_v38 }
 0x3b5   : > { %v7973_v36 = vpop.f32.mrb[101].mxu1  ;;  %v10221_v33 = vpack.i.bf16 %v8139_v30, %v8136_v20  ;;  %v8140_v18 = vpop.f32.mrb[100].mxu0 }
 0x3b6   : > { %v7974_v39 = vadd.f32 %v7973_v36, %v7972_v31  ;;  %10217 = vrot.lane.b32.xlu0 %v10216_v32, %s13496_s25  ;;  %v8141_v56 = vpop.f32.mrb[101].mxu0  ;;  %v10063_v20 = vpop.permute.xlu1 %10062 }
 0x3b7   : > { %v8142_v12 = vadd.f32 %v8141_v56, %v8140_v18  ;;  %10222 = vrot.lane.b32.xlu1 %v10221_v33, %s13498_s0  ;;  %v10064_v26 = vunpack.i.l.bf16 %v10063_v20 }
 0x3b8   : > { %v7975_v60 = vpop.f32.mrb[102].mxu1  ;;  %v10078_v46 = vpop.permute.xlu0 %10077 }
 0x3b9   : > { %v10080_v2 = vunpack.i.h.bf16 %v10078_v46  ;;  %v10079_v47 = vunpack.i.l.bf16 %v10078_v46  ;;  %v7976_v50 = vpop.f32.mrb[103].mxu1  ;;  %v8143_v57 = vpop.f32.mrb[102].mxu0 }
 0x3ba   : > { %v7977_v37 = vadd.f32 %v7976_v50, %v7975_v60  ;;  %v8144_v5 = vpop.f32.mrb[103].mxu0 }
 0x3bb   : > { %v4039_v1 = vsel %vm1571_vm5, %v12183_v6, %v10079_v47  ;;  %v4040_v19 = vsel %vm1571_vm5, %v12194_v24, %v10080_v2  ;;  %v8145_v59 = vadd.f32 %v8144_v5, %v8143_v57  ;;  %v10054_v24 = vunpack.i.l.bf16 %v12318_v42 }
 0x3bc   : > { %v10226_v62 = vpack.i.bf16 %v7977_v37, %v7974_v39  ;;  %v7978_v63 = vpop.f32.mrb[104].mxu1  ;;  %v8146_v61 = vpop.f32.mrb[104].mxu0  ;;  %v12355_v49 = vsel %vm1039_vm0, %v4039_v1, %v10049_v35  ;;  %v12358_v40 = vsel %vm1039_vm0, %v4040_v19, %v10050_v44  ;;  %v10075_v19 = vunpack.i.h.bf16 %v12340_v34 }
 0x3bd   : > { %v7979_v25 = vpop.f32.mrb[105].mxu1  ;;  %v10231_v22 = vpack.i.bf16 %v8145_v59, %v8142_v12  ;;  %v8147_v52 = vpop.f32.mrb[105].mxu0 }
 0x3be   : > { %v7980_v0 = vadd.f32 %v7979_v25, %v7978_v63  ;;  %10227 = vrot.lane.b32.xlu0 %v10226_v62, %s13496_s25  ;;  %v8148_v6 = vadd.f32 %v8147_v52, %v8146_v61 }
 0x3c0   : > { %v7981_v41 = vpop.f32.mrb[106].mxu1  ;;  %v10088_v4 = vpop.permute.xlu0 %10087 }
 0x3c1   : > { %v10090_v23 = vunpack.i.h.bf16 %v10088_v4  ;;  %v10089_v3 = vunpack.i.l.bf16 %v10088_v4  ;;  %v7982_v43 = vpop.f32.mrb[107].mxu1  ;;  %v8149_v7 = vpop.f32.mrb[106].mxu0 }
 0x3c2   : > { %v7983_v13 = vadd.f32 %v7982_v43, %v7981_v41  ;;  %10232 = vrot.lane.b32.xlu0 %v10231_v22, %s13498_s0  ;;  %v8150_v10 = vpop.f32.mrb[107].mxu0 }
 0x3c3   : > { %v4041_v38 = vsel %vm1571_vm5, %v12204_v9, %v10089_v3  ;;  %v4042_v14 = vsel %vm1571_vm5, %v12215_v28, %v10090_v23  ;;  %v8151_v27 = vadd.f32 %v8150_v10, %v8149_v7  ;;  %v10065_v28 = vunpack.i.h.bf16 %v10063_v20 }
 0x3c4   : > { %v10236_v58 = vpack.i.bf16 %v7983_v13, %v7980_v0  ;;  %v7984_v42 = vpop.f32.mrb[108].mxu1  ;;  %v12368_v8 = vpop.permute.xlu0 %10092  ;;  %v12371_v29 = vsel %vm1039_vm0, %v4041_v38, %v10054_v24  ;;  %v12374_v17 = vsel %vm1039_vm0, %v4042_v14, %v10055_v11  ;;  %vm4051_vm5 = vcmask 195584  }
 0x3c5   : > { %v7985_v15 = vpop.f32.mrb[109].mxu1  ;;  %v10241_v45 = vpack.i.bf16 %v8151_v27, %v8148_v6  ;;  %v8152_v21 = vpop.f32.mrb[108].mxu0 }
 0x3c6   : > { %v7986_v16 = vadd.f32 %v7985_v15, %v7984_v42  ;;  %10237 = vrot.lane.b32.xlu0 %v10236_v58, %s13496_s25  ;;  %v8153_v9 = vpop.f32.mrb[109].mxu0  ;;  %v10083_v6 = vpop.permute.xlu1 %10082 }
 0x3c7   : > { %v8154_v48 = vadd.f32 %v8153_v9, %v8152_v21  ;;  %10242 = vrot.lane.b32.xlu1 %v10241_v45, %s13498_s0  ;;  %v10085_v38 = vunpack.i.h.bf16 %v10083_v6  ;;  %v10084_v14 = vunpack.i.l.bf16 %v10083_v6 }
 0x3c8   : > { %v7987_v30 = vpop.f32.mrb[110].mxu1  ;;  %v10098_v32 = vpop.permute.xlu0 %10097 }
 0x3c9   : > { %v10100_v31 = vunpack.i.h.bf16 %v10098_v32  ;;  %v10099_v36 = vunpack.i.l.bf16 %v10098_v32  ;;  %v7988_v33 = vpop.f32.mrb[111].mxu1  ;;  %v8155_v18 = vpop.f32.mrb[110].mxu0 }
 0x3ca   : > { %v7989_v39 = vadd.f32 %v7988_v33, %v7987_v30  ;;  %v8156_v56 = vpop.f32.mrb[111].mxu0  ;;  %v10103_v30 = vpop.permute.xlu1 %10102 }
 0x3cb   : > { %v4052_v12 = vsel %vm4051_vm5, %v12327_v51, %v10099_v36  ;;  %v4053_v44 = vsel %vm4051_vm5, %v12330_v55, %v10100_v31  ;;  %v8157_v35 = vadd.f32 %v8156_v56, %v8155_v18  ;;  %v10074_v55 = vunpack.i.l.bf16 %v12340_v34 }
 0x3cc   : > { %v10246_v60 = vpack.i.bf16 %v7989_v39, %v7986_v16  ;;  %v8078_v46 = vpop.f32.mrb[112].mxu1  ;;  %v8246_v2 = vpop.f32.mrb[112].mxu0  ;;  %v12383_v47 = vsel %vm1072_vm1, %v4052_v12, %v10064_v26  ;;  %v12386_v50 = vsel %vm1072_vm1, %v4053_v44, %v10065_v28 }
 0x3cd   : > { %v8079_v57 = vpop.f32.mrb[113].mxu1  ;;  %v10251_v37 = vpack.i.bf16 %v8157_v35, %v8154_v48  ;;  %v8247_v5 = vpop.f32.mrb[113].mxu0  ;;  %v10094_v35 = vunpack.i.l.bf16 %v12368_v8 }
 0x3ce   : > { %v8080_v1 = vadd.f32 %v8079_v57, %v8078_v46  ;;  %10247 = vrot.lane.b32.xlu0 %v10246_v60, %s13496_s25  ;;  %v8248_v51 = vadd.f32 %v8247_v5, %v8246_v2  ;;  %s10513_s25 = smov 88  }
 0x3d0   : > { %v8081_v59 = vpop.f32.mrb[114].mxu1  ;;  %v10108_v62 = vpop.permute.xlu0 %10107 }
 0x3d1   : > { %v10110_v63 = vunpack.i.h.bf16 %v10108_v62  ;;  %v10109_v61 = vunpack.i.l.bf16 %v10108_v62  ;;  %v8082_v25 = vpop.f32.mrb[115].mxu1  ;;  %v8249_v22 = vpop.f32.mrb[114].mxu0 }
 0x3d2   : > { %v8083_v52 = vadd.f32 %v8082_v25, %v8081_v59  ;;  %10252 = vrot.lane.b32.xlu0 %v10251_v37, %s13498_s0  ;;  %v8250_v0 = vpop.f32.mrb[115].mxu0  ;;  %s12729_s0 = sand.u32 1, %s10492_s19  }
 0x3d3   : > { %v4054_v11 = vsel %vm4051_vm5, %v12343_v54, %v10109_v61  ;;  %v4055_v24 = vsel %vm4051_vm5, %v12346_v53, %v10110_v63  ;;  %v8251_v41 = vadd.f32 %v8250_v0, %v8249_v22 }
 0x3d4   : > { %v10256_v4 = vpack.i.bf16 %v8083_v52, %v8080_v1  ;;  %v8084_v34 = vpop.f32.mrb[116].mxu1  ;;  %v12396_v23 = vpop.permute.xlu0 %10112  ;;  %v12399_v3 = vsel %vm1072_vm1, %v4054_v11, %v10074_v55  ;;  %v12402_v43 = vsel %vm1072_vm1, %v4055_v24, %v10075_v19  ;;  %v10104_v24 = vunpack.i.l.bf16 %v10103_v30 }
 0x3d5   : > { %v8085_v7 = vpop.f32.mrb[117].mxu1  ;;  %v10261_v13 = vpack.i.bf16 %v8251_v41, %v8248_v51  ;;  %v8252_v10 = vpop.f32.mrb[116].mxu0 }
 0x3d6   : > { %v8086_v20 = vadd.f32 %v8085_v7, %v8084_v34  ;;  %10257 = vrot.lane.b32.xlu0 %v10256_v4, %s10513_s25  ;;  %v8253_v54 = vpop.f32.mrb[117].mxu0 }
 0x3d7   : > { %v8254_v53 = vadd.f32 %v8253_v54, %v8252_v10  ;;  %10262 = vrot.lane.b32.xlu1 %v10261_v13, %s13504_s16 }
 0x3d8   : > { %v8087_v27 = vpop.f32.mrb[118].mxu1  ;;  %v10118_v58 = vpop.permute.xlu0 %10117 }
 0x3d9   : > { %v10120_v42 = vunpack.i.h.bf16 %v10118_v58  ;;  %v10119_v15 = vunpack.i.l.bf16 %v10118_v58  ;;  %v8088_v45 = vpop.f32.mrb[119].mxu1  ;;  %v8255_v21 = vpop.f32.mrb[118].mxu0  ;;  %v4166_v58 = vld [vmem:[%s13534_s4 + $0x8] sm:$0xff] }
 0x3da   : > { %v8089_v16 = vadd.f32 %v8088_v45, %v8087_v27  ;;  %v8256_v9 = vpop.f32.mrb[119].mxu0  ;;  %v12420_v51 = vpop.permute.xlu1 %10122  ;;  %v4165_v27 = vld [vmem:[%s13534_s4] sm:$0xff] }
 0x3db   : > { %v4056_v48 = vsel %vm4051_vm5, %v12355_v49, %v10119_v15  ;;  %v4057_v28 = vsel %vm4051_vm5, %v12358_v40, %v10120_v42  ;;  %v8257_v26 = vadd.f32 %v8256_v9, %v8255_v21  ;;  %v10095_v40 = vunpack.i.h.bf16 %v12368_v8 }
 0x3dc   : > { %v10266_v32 = vpack.i.bf16 %v8089_v16, %v8086_v20  ;;  %v8090_v31 = vpop.f32.mrb[120].mxu1  ;;  %v8258_v36 = vpop.f32.mrb[120].mxu0  ;;  %v12411_v33 = vsel %vm1072_vm1, %v4056_v48, %v10084_v14  ;;  %v12414_v18 = vsel %vm1072_vm1, %v4057_v28, %v10085_v38  ;;  %v4167_v28 = vld [vmem:[%s13534_s4 + $0x10] sm:$0xff] }
 0x3dd   : > { %v8091_v39 = vpop.f32.mrb[121].mxu1  ;;  %v10271_v56 = vpack.i.bf16 %v8257_v26, %v8254_v53  ;;  %v8259_v12 = vpop.f32.mrb[121].mxu0  ;;  %v4168_v26 = vld [vmem:[%s13534_s4 + $0x18] sm:$0xff] }
 0x3de   : > { %v8092_v44 = vadd.f32 %v8091_v39, %v8090_v31  ;;  %10267 = vrot.lane.b32.xlu0 %v10266_v32, %s10513_s25  ;;  %v8260_v49 = vadd.f32 %v8259_v12, %v8258_v36  ;;  %v9582_v31 = vpack.c.bf16 %v4168_v26, %v4167_v28  ;;  %v4169_v12 = vld [vmem:[%s13534_s4 + $0x20] sm:$0xff] }
 0x3e0   : > { %v8093_v60 = vpop.f32.mrb[122].mxu1  ;;  %v10128_v46 = vpop.permute.xlu0 %10127 }
 0x3e1   : > { %v10130_v2 = vunpack.i.h.bf16 %v10128_v46  ;;  %v10129_v57 = vunpack.i.l.bf16 %v10128_v46  ;;  %v8094_v37 = vpop.f32.mrb[123].mxu1  ;;  %v8261_v5 = vpop.f32.mrb[122].mxu0 }
 0x3e2   : > { %v8095_v1 = vadd.f32 %v8094_v37, %v8093_v60  ;;  %10272 = vrot.lane.b32.xlu0 %v10271_v56, %s13504_s16  ;;  %v8262_v19 = vpop.f32.mrb[123].mxu0 }
 0x3e3   : > { %v4058_v55 = vsel %vm4051_vm5, %v12371_v29, %v10129_v57  ;;  %v4059_v59 = vsel %vm4051_vm5, %v12374_v17, %v10130_v2  ;;  %v8263_v62 = vadd.f32 %v8262_v19, %v8261_v5  ;;  %v10105_v17 = vunpack.i.h.bf16 %v10103_v30  ;;  %v4171_v5 = vld [vmem:[%s13534_s4 + $0x30] sm:$0xff] }
 0x3e4   : > { %v10276_v8 = vpack.i.bf16 %v8095_v1, %v8092_v44  ;;  %v8096_v63 = vpop.f32.mrb[124].mxu1  ;;  %v12427_v61 = vsel %vm1072_vm1, %v4058_v55, %v10094_v35  ;;  %v12430_v25 = vsel %vm1072_vm1, %v4059_v59, %v10095_v40  ;;  %v8264_v0 = vpop.f32.mrb[124].mxu0  ;;  %v4170_v44 = vld [vmem:[%s13534_s4 + $0x28] sm:$0xff]  ;;  %v10124_v1 = vunpack.i.l.bf16 %v12420_v51 }
 0x3e5   : > { %v8097_v22 = vpop.f32.mrb[125].mxu1  ;;  %v10281_v52 = vpack.i.bf16 %v8263_v62, %v8260_v49  ;;  %v8265_v11 = vpop.f32.mrb[125].mxu0  ;;  %v9586_v40 = vpack.c.bf16 %v4170_v44, %v4169_v12 }
 0x3e6   : > { %v8098_v6 = vadd.f32 %v8097_v22, %v8096_v63  ;;  %10277 = vrot.lane.b32.xlu0 %v10276_v8, %s10513_s25  ;;  %v8266_v29 = vadd.f32 %v8265_v11, %v8264_v0  ;;  %v4173_v22 = vld [vmem:[%s13534_s4 + $0x40] sm:$0xff] }
 0x3e7   : > { %10282 = vrot.lane.b32.xlu1 %v10281_v52, %s13504_s16  ;;  %s13535_s16 = smov 112   ;;  %v4174_v52 = vld [vmem:[%s13534_s4 + $0x48] sm:$0xff] }
 0x3e8   : > { %v8099_v41 = vpop.f32.mrb[126].mxu1  ;;  %v10138_v4 = vpop.permute.xlu1 %10137 }
 0x3e9   : > { %v10140_v34 = vunpack.i.h.bf16 %v10138_v4  ;;  %v10139_v7 = vunpack.i.l.bf16 %v10138_v4  ;;  %v8100_v13 = vpop.f32.mrb[127].mxu1  ;;  %v8267_v10 = vpop.f32.mrb[126].mxu0 }
 0x3ea   : > { %v8101_v20 = vadd.f32 %v8100_v13, %v8099_v41  ;;  %v8268_v54 = vpop.f32.mrb[127].mxu0 }
 0x3eb   : > { %v4069_v53 = vsel %vm4068_vm15, %v12383_v47, %v10139_v7  ;;  %v4070_v38 = vsel %vm4068_vm15, %v12386_v50, %v10140_v34  ;;  %v8269_v14 = vadd.f32 %v8268_v54, %v8267_v10  ;;  %v9578_v50 = vpack.c.bf16 %v4166_v58, %v4165_v27  ;;  %v12501_v34 = vpop.permute.xlu0 %10132  ;;  %v4177_v58 = vld [vmem:[%s13534_s4 + $0x60] sm:$0xff] }
 0x3ec   : > { %v10286_v42 = vpack.i.bf16 %v8101_v20, %v8098_v6  ;;  %v8190_v15 = vpop.f32.mrb[128].mxu1  ;;  %v12444_v45 = vpop.permute.xlu1 %10142  ;;  %v12447_v21 = vsel %vm1105_vm2, %v4069_v53, %v10104_v24  ;;  %v12450_v47 = vsel %vm1105_vm2, %v4070_v38, %v10105_v17  ;;  %v9594_v6 = vpack.c.bf16 %v4174_v52, %v4173_v22 }
 0x3ed   : > { %v8191_v16 = vpop.f32.mrb[129].mxu1  ;;  %v10291_v9 = vpack.i.bf16 %v8269_v14, %v8266_v29  ;;  %9579 = vmatprep.subr.bf16.mxu0 %v9578_v50  ;;  %v10135_v10 = vunpack.i.h.bf16 %v12501_v34 }
 0x3ee   : > { %v8192_v48 = vadd.f32 %v8191_v16, %v8190_v15  ;;  %10287 = vrot.lane.b32.xlu0 %v10286_v42, %s10513_s25  ;;  %9581 = vmatpush3.bf16.msra.mxu0 %v9578_v50  ;;  %v4178_v42 = vld [vmem:[%s13534_s4 + $0x68] sm:$0xff]  ;;  %s13508_s25 = smov 120  }
 0x3ef   : > { %9583 = vmatprep.subr.bf16.mxu0 %v9582_v31  ;;  %v9602_v50 = vpack.c.bf16 %v4178_v42, %v4177_v58 }
 0x3f0   : > { %v8193_v30 = vpop.f32.mrb[130].mxu1  ;;  %v10148_v32 = vpop.permute.xlu1 %10147 }
 0x3f1   : > { %v10150_v36 = vunpack.i.h.bf16 %v10148_v32  ;;  %v10149_v39 = vunpack.i.l.bf16 %v10148_v32  ;;  %v8194_v56 = vpop.f32.mrb[131].mxu1 }
 0x3f2   : > { %v8195_v49 = vadd.f32 %v8194_v56, %v8193_v30  ;;  %10292 = vrot.lane.b32.xlu0 %v10291_v9, %s13535_s16  ;;  %9585 = vmatpush3.bf16.msra.mxu0 %v9582_v31  ;;  %v10145_v31 = vunpack.i.h.bf16 %v12444_v45 }
 0x3f3   : > { %v12468_v35 = vsel %vm4068_vm15, %v12399_v3, %v10149_v39  ;;  %v12472_v60 = vsel %vm4068_vm15, %v12402_v43, %v10150_v36  ;;  %9587 = vmatprep.subr.bf16.mxu0 %v9586_v40  ;;  %v4172_v3 = vld [vmem:[%s13534_s4 + $0x38] sm:$0xff]  ;;  %v10125_v43 = vunpack.i.h.bf16 %v12420_v51  ;;  %v10144_v36 = vunpack.i.l.bf16 %v12444_v45 }
 0x3f4   : > { %v10296_v46 = vpack.i.bf16 %v8195_v49, %v8192_v48  ;;  %v8196_v2 = vpop.f32.mrb[132].mxu1  ;;  %v9590_v59 = vpack.c.bf16 %v4172_v3, %v4171_v5 }
 0x3f5   : > { %v8197_v57 = vpop.f32.mrb[133].mxu1 }
 0x3f6   : > { %v8198_v37 = vadd.f32 %v8197_v57, %v8196_v2  ;;  %10297 = vrot.lane.b32.xlu1 %v10296_v46, %s13506_s1  ;;  %9589 = vmatpush3.bf16.msra.mxu0 %v9586_v40 }
 0x3f7   : > { %9591 = vmatprep.subr.bf16.mxu0 %v9590_v59 }
 0x3f8   : > { %v8199_v19 = vpop.f32.mrb[134].mxu1  ;;  %v10158_v55 = vpop.permute.xlu1 %10157 }
 0x3f9   : > { %v10160_v62 = vunpack.i.h.bf16 %v10158_v55  ;;  %v10159_v8 = vunpack.i.l.bf16 %v10158_v55  ;;  %v8200_v63 = vpop.f32.mrb[135].mxu1 }
 0x3fa   : > { %v8201_v0 = vadd.f32 %v8200_v63, %v8199_v19  ;;  %9593 = vmatpush3.bf16.msra.mxu0 %v9590_v59 }
 0x3fb   : > { %v4073_v51 = vsel %vm4068_vm15, %v12411_v33, %v10159_v8  ;;  %v4074_v11 = vsel %vm4068_vm15, %v12414_v18, %v10160_v62  ;;  %9595 = vmatprep.subr.bf16.mxu0 %v9594_v6  ;;  %v4175_v33 = vld [vmem:[%s13534_s4 + $0x50] sm:$0xff]  ;;  %v4176_v18 = vld [vmem:[%s13534_s4 + $0x58] sm:$0xff] }
 0x3fc   : > { %v10301_v29 = vpack.i.bf16 %v8201_v0, %v8198_v37  ;;  %v8202_v17 = vpop.f32.mrb[136].mxu1  ;;  %v12493_v24 = vpop.permute.xlu1 %10162  ;;  %v12496_v41 = vsel %vm1105_vm2, %v4073_v51, %v10124_v1  ;;  %v12499_v4 = vsel %vm1105_vm2, %v4074_v11, %v10125_v43  ;;  %v9598_v53 = vpack.c.bf16 %v4176_v18, %v4175_v33 }
 0x3fd   : > { %v8203_v7 = vpop.f32.mrb[137].mxu1  ;;  %v10165_v52 = vunpack.i.h.bf16 %v12493_v24  ;;  %v10164_v0 = vunpack.i.l.bf16 %v12493_v24 }
 0x3fe   : > { %v8204_v13 = vadd.f32 %v8203_v7, %v8202_v17  ;;  %10302 = vrot.lane.b32.xlu1 %v10301_v29, %s13506_s1  ;;  %9597 = vmatpush3.bf16.msra.mxu0 %v9594_v6 }
 0x3ff   : > { %9599 = vmatprep.subr.bf16.mxu0 %v9598_v53 }
 0x400   : > { %v8205_v20 = vpop.f32.mrb[138].mxu1  ;;  %v10168_v54 = vpop.permute.xlu1 %10167 }
 0x401   : > { %v10170_v38 = vunpack.i.h.bf16 %v10168_v54  ;;  %v10169_v14 = vunpack.i.l.bf16 %v10168_v54  ;;  %v8206_v27 = vpop.f32.mrb[139].mxu1 }
 0x402   : > { %v8207_v15 = vadd.f32 %v8206_v27, %v8205_v20  ;;  %9601 = vmatpush3.bf16.msra.mxu0 %v9598_v53 }
 0x403   : > { %v12519_v16 = vsel %vm4068_vm15, %v12427_v61, %v10169_v14  ;;  %v4076_v9 = vsel %vm4068_vm15, %v12430_v25, %v10170_v38  ;;  %9603 = vmatprep.subr.bf16.mxu0 %v9602_v50  ;;  %v4179_v61 = vld [vmem:[%s13534_s4 + $0x70] sm:$0xff]  ;;  %v4180_v25 = vld [vmem:[%s13534_s4 + $0x78] sm:$0xff]  ;;  %s6954_s4 = sshll.u32 %s12729_s0, 4 }
 0x404   : > { %v10306_v48 = vpack.i.bf16 %v8207_v15, %v8204_v13  ;;  %v8208_v28 = vpop.f32.mrb[140].mxu1  ;;  %v12524_v26 = vsel %vm1105_vm2, %v4076_v9, %v10135_v10  ;;  %v9606_v12 = vpack.c.bf16 %v4180_v25, %v4179_v61  ;;  %s13195_s19 = scalar_lea.vmem [#allocation4], %s6954_s4  ;;  %s13544_s4 = smov 72  }
 0x405   : > { %v8209_v30 = vpop.f32.mrb[141].mxu1 }
 0x406   : > { %v8210_v32 = vadd.f32 %v8209_v30, %v8208_v28  ;;  %10307 = vrot.lane.b32.xlu1 %v10306_v48, %s13536_s12  ;;  %9605 = vmatpush3.bf16.msra.mxu0 %v9602_v50  ;;  %v12566_v28 = vpop.permute.xlu0 %10152 }
 0x407   : > { %9607 = vmatprep.subr.bf16.mxu0 %v9606_v12 }
 0x408   : > { %v8211_v39 = vpop.f32.mrb[142].mxu1  ;;  %v10178_v56 = vpop.permute.xlu1 %10177 }
 0x409   : > { %v10180_v44 = vunpack.i.h.bf16 %v10178_v56  ;;  %v10179_v49 = vunpack.i.l.bf16 %v10178_v56  ;;  %v8212_v40 = vpop.f32.mrb[143].mxu1 }
 0x40a   : > { %v8213_v46 = vadd.f32 %v8212_v40, %v8211_v39  ;;  %9609 = vmatpush3.bf16.msra.mxu0 %v9606_v12  ;;  %v12568_v30 = vpop.permute.xlu0 %10172 }
 0x40b   : > { %v4086_v2 = vsel %vm4085_vm4, %v12447_v21, %v10179_v49  ;;  %v4087_v57 = vsel %vm4085_vm4, %v12450_v47, %v10180_v44 }
 0x40c   : > { %v10311_v37 = vpack.i.bf16 %v8213_v46, %v8210_v32  ;;  %v8302_v5 = vpop.f32.mrb[144].mxu1  ;;  %v12540_v45 = vsel %vm1153_vm3, %v4086_v2, %v10144_v36  ;;  %v12543_v3 = vsel %vm1153_vm3, %v4087_v57, %v10145_v31  ;;  %v12545_v1 = vpop.permute.xlu1 %10182 }
 0x40d   : > { %v8303_v43 = vpop.f32.mrb[145].mxu1 }
 0x40e   : > { %v8304_v19 = vadd.f32 %v8303_v43, %v8302_v5  ;;  %10312 = vrot.lane.b32.xlu1 %v10311_v37, %s13536_s12 }
 0x410   : > { %v8305_v55 = vpop.f32.mrb[146].mxu1  ;;  %v12548_v62 = vpop.permute.xlu1 %10187 }
 0x411   : > { %v8306_v21 = vpop.f32.mrb[147].mxu1  ;;  %v12570_v32 = vpop.permute.xlu0 %10192 }
 0x412   : > { %v8307_v59 = vadd.f32 %v8306_v21, %v8305_v55  ;;  %v10115_v55 = vunpack.i.h.bf16 %v12396_v23  ;;  %v10114_v21 = vunpack.i.l.bf16 %v12396_v23 }
 0x414   : > { %v10316_v47 = vpack.i.bf16 %v8307_v59, %v8304_v19  ;;  %v8308_v8 = vpop.f32.mrb[148].mxu1 }
 0x415   : > { %v8309_v63 = vpop.f32.mrb[149].mxu1 }
 0x416   : > { %v8310_v22 = vadd.f32 %v8309_v63, %v8308_v8  ;;  %10317 = vrot.lane.b32.xlu1 %v10316_v47, %s13508_s25  ;;  %v10134_v47 = vunpack.i.l.bf16 %v12501_v34  ;;  %v10190_v8 = vunpack.i.h.bf16 %v12548_v62  ;;  %v10189_v63 = vunpack.i.l.bf16 %v12548_v62 }
 0x417   : > { %v4079_v62 = vsel %vm1105_vm2, %v12468_v35, %v10114_v21 }
 0x418   : > { %v8311_v6 = vpop.f32.mrb[150].mxu1  ;;  %v10198_v51 = vpop.permute.xlu1 %10197 }
 0x419   : > { %v10200_v11 = vunpack.i.h.bf16 %v10198_v51  ;;  %v10199_v29 = vunpack.i.l.bf16 %v10198_v51  ;;  %v8312_v17 = vpop.f32.mrb[151].mxu1 }
 0x41a   : > { %v8313_v7 = vadd.f32 %v8312_v17, %v8311_v6  ;;  %v10184_v6 = vunpack.i.l.bf16 %v12545_v1 }
 0x41b   : > { %v4090_v13 = vsel %vm4085_vm4, %v12496_v41, %v10199_v29  ;;  %v4091_v33 = vsel %vm4085_vm4, %v12499_v4, %v10200_v11 }
 0x41c   : > { %v10321_v18 = vpack.i.bf16 %v8313_v7, %v8310_v22  ;;  %v8314_v10 = vpop.f32.mrb[152].mxu1  ;;  %v12558_v20 = vsel %vm1153_vm3, %v4090_v13, %v10164_v0  ;;  %v12561_v54 = vsel %vm1153_vm3, %v4091_v33, %v10165_v52  ;;  %v12574_v25 = vpop.permute.xlu1 %10202  ;;  %v10155_v22 = vunpack.i.h.bf16 %v12566_v28 }
 0x41d   : > { %v8315_v24 = vpop.f32.mrb[153].mxu1  ;;  %v10154_v52 = vunpack.i.l.bf16 %v12566_v28  ;;  %v10185_v0 = vunpack.i.h.bf16 %v12545_v1  ;;  %v4080_v7 = vsel %vm1105_vm2, %v12472_v60, %v10115_v55  ;;  %v10175_v13 = vunpack.i.h.bf16 %v12568_v30 }
 0x41e   : > { %v8316_v53 = vadd.f32 %v8315_v24, %v8314_v10  ;;  %10322 = vrot.lane.b32.xlu1 %v10321_v18, %s13508_s25  ;;  %v4089_v1 = vsel %vm4085_vm4, %v4080_v7, %v10190_v8 }
 0x420   : > { %v8317_v38 = vpop.f32.mrb[154].mxu1  ;;  %v12576_v39 = vpop.permute.xlu1 %10207 }
 0x421   : > { %v8318_v14 = vpop.f32.mrb[155].mxu1  ;;  %v12572_v61 = vpop.permute.xlu0 %10212 }
 0x422   : > { %v8319_v27 = vadd.f32 %v8318_v14, %v8317_v38 }
 0x424   : > { %v10326_v58 = vpack.i.bf16 %v8319_v27, %v8316_v53  ;;  %v8320_v41 = vpop.f32.mrb[156].mxu1 }
 0x425   : > { %v8321_v42 = vpop.f32.mrb[157].mxu1 }
 0x426   : > { %v8322_v15 = vadd.f32 %v8321_v42, %v8320_v41  ;;  %10327 = vrot.lane.b32.xlu1 %v10326_v58, %s13508_s25  ;;  %v10195_v58 = vunpack.i.h.bf16 %v12570_v32  ;;  %v10194_v41 = vunpack.i.l.bf16 %v12570_v32 }
 0x428   : > { %v8323_v4 = vpop.f32.mrb[158].mxu1  ;;  %v10218_v31 = vpop.permute.xlu0 %10217 }
 0x429   : > { %v8324_v50 = vpop.f32.mrb[159].mxu1  ;;  %v12578_v56 = vpop.permute.xlu1 %10222  ;;  %v10220_v5 = vunpack.i.h.bf16 %v10218_v31  ;;  %v10219_v43 = vunpack.i.l.bf16 %v10218_v31 }
 0x42a   : > { %v8325_v9 = vadd.f32 %v8324_v50, %v8323_v4  ;;  %v10225_v10 = vunpack.i.h.bf16 %v12578_v56  ;;  %v10224_v24 = vunpack.i.l.bf16 %v12578_v56 }
 0x42b   : > { %v4103_v23 = vsel %vm4102_vm6, %v12540_v45, %v10219_v43  ;;  %v4104_v51 = vsel %vm4102_vm6, %v12543_v3, %v10220_v5  ;;  %v4088_v45 = vsel %vm4085_vm4, %v4079_v62, %v10189_v63  ;;  %v10210_v5 = vunpack.i.h.bf16 %v12576_v39 }
 0x42c   : > { %v10331_v48 = vpack.i.bf16 %v8325_v9, %v8322_v15  ;;  %v4112_v35 = vsel %vm4111_vm7, %v4103_v23, %v10184_v6  ;;  %v4113_v53 = vsel %vm4111_vm7, %v4104_v51, %v10185_v0  ;;  %v4096_v42 = vsel %vm1153_vm3, %v4088_v45, %v10154_v52 }
 0x42d   : > { %v4097_v15 = vsel %vm1153_vm3, %v4089_v1, %v10155_v22  ;;  %v10209_v43 = vunpack.i.l.bf16 %v12576_v39  ;;  %v10205_v1 = vunpack.i.h.bf16 %v12574_v25 }
 0x42e   : > { %10332 = vrot.lane.b32.xlu1 %v10331_v48, %s13508_s25  ;;  %s6953_s25 = sshll.u32 %s12729_s0, 6 }
 0x42f   : > { %s12735_s2 = scalar_lea.vmem [#allocation2], %s6953_s25  ;;  %s13543_s25 = smov 24  }
 0x430   : > { %v10228_v36 = vpop.permute.xlu0 %10227 }
 0x431   : > { %v10230_v3 = vunpack.i.h.bf16 %v10228_v36  ;;  %v10229_v18 = vunpack.i.l.bf16 %v10228_v36 }
 0x433   : > { %v4105_v50 = vsel %vm4102_vm6, %v4096_v42, %v10229_v18  ;;  %v4106_v9 = vsel %vm4102_vm6, %v4097_v15, %v10230_v3  ;;  %v10204_v3 = vunpack.i.l.bf16 %v12574_v25  ;;  %v4083_v18 = vsel %vm1105_vm2, %v12519_v16, %v10134_v47 }
 0x434   : > { %v12580_v12 = vpop.permute.xlu0 %10232  ;;  %v4115_v63 = vsel %vm4111_vm7, %v4106_v9, %v10195_v58  ;;  %v4092_v34 = vsel %vm4085_vm4, %v4083_v18, %v10209_v43  ;;  %v4093_v16 = vsel %vm4085_vm4, %v12524_v26, %v10210_v5  ;;  %v10214_v5 = vunpack.i.l.bf16 %v12572_v61 }
 0x435   : > { %v10235_v21 = vunpack.i.h.bf16 %v12580_v12  ;;  %v10234_v8 = vunpack.i.l.bf16 %v12580_v12 }
 0x438   : > { %v12584_v49 = vpop.permute.xlu0 %10237 }
 0x439   : > { %v12582_v44 = vpop.permute.xlu1 %10242  ;;  %v10240_v52 = vunpack.i.h.bf16 %v12584_v49  ;;  %v10239_v0 = vunpack.i.l.bf16 %v12584_v49  ;;  %v10174_v49 = vunpack.i.l.bf16 %v12568_v30 }
 0x43b   : > { %v4100_v43 = vsel %vm1153_vm3, %v4092_v34, %v10174_v49 }
 0x440   : > { %v12588_v46 = vpop.permute.xlu0 %10247 }
 0x441   : > { %v10250_v42 = vunpack.i.h.bf16 %v12588_v46  ;;  %v10249_v15 = vunpack.i.l.bf16 %v12588_v46  ;;  %v10215_v46 = vunpack.i.h.bf16 %v12572_v61 }
 0x444   : > { %v12592_v57 = vpop.permute.xlu0 %10252 }
 0x448   : > { %v10258_v19 = vpop.permute.xlu0 %10257 }
 0x449   : > { %v12586_v40 = vpop.permute.xlu1 %10262  ;;  %v10260_v11 = vunpack.i.h.bf16 %v10258_v19  ;;  %v10259_v29 = vunpack.i.l.bf16 %v10258_v19 }
 0x44a   : > { %v10265_v28 = vunpack.i.h.bf16 %v12586_v40  ;;  %v10264_v31 = vunpack.i.l.bf16 %v12586_v40  ;;  %v4114_v40 = vsel %vm4111_vm7, %v4105_v50, %v10194_v41 }
 0x44b   : > { %v4121_v60 = vsel %vm4120_vm8, %v4112_v35, %v10259_v29  ;;  %v4122_v38 = vsel %vm4120_vm8, %v4113_v53, %v10260_v11 }
 0x44c   : > { %v4130_v32 = vsel %vm4129_vm9, %v4121_v60, %v10224_v24 }
 0x450   : > { %v10268_v17 = vpop.permute.xlu0 %10267 }
 0x451   : > { %v10270_v36 = vunpack.i.h.bf16 %v10268_v17  ;;  %v10269_v56 = vunpack.i.l.bf16 %v10268_v17 }
 0x453   : > { %v4123_v39 = vsel %vm4120_vm8, %v4114_v40, %v10269_v56  ;;  %v4124_v51 = vsel %vm4120_vm8, %v4115_v63, %v10270_v36 }
 0x454   : > { %v10273_v48 = vpop.permute.xlu0 %10272  ;;  %v4132_v24 = vsel %vm4129_vm9, %v4123_v39, %v10234_v8  ;;  %v4133_v35 = vsel %vm4129_vm9, %v4124_v51, %v10235_v21 }
 0x455   : > { %v10275_v53 = vunpack.i.h.bf16 %v10273_v48  ;;  %v10274_v60 = vunpack.i.l.bf16 %v10273_v48 }
 0x458   : > { %v10278_v12 = vpop.permute.xlu0 %10277 }
 0x459   : > { %v12590_v2 = vpop.permute.xlu1 %10282  ;;  %v10280_v25 = vunpack.i.h.bf16 %v10278_v12 }
 0x45a   : > { %v10284_v8 = vunpack.i.l.bf16 %v12590_v2 }
 0x468   : > { %v10298_v37 = vpop.permute.xlu1 %10297 }
 0x469   : > { %v10300_v14 = vunpack.i.h.bf16 %v10298_v37  ;;  %v10299_v27 = vunpack.i.l.bf16 %v10298_v37  ;;  %v4131_v37 = vsel %vm4129_vm9, %v4122_v38, %v10225_v10  ;;  %v4107_v10 = vsel %vm4102_vm6, %v12558_v20, %v10239_v0 }
 0x46a   : > { %v10279_v38 = vunpack.i.l.bf16 %v10278_v12 }
 0x46b   : > { %v4140_v19 = vsel %vm4138_vm10, %v4131_v37, %v10300_v14  ;;  %v4139_v55 = vsel %vm4138_vm10, %v4130_v32, %v10299_v27  ;;  %v10244_v14 = vunpack.i.l.bf16 %v12582_v44  ;;  %v4116_v27 = vsel %vm4111_vm7, %v4107_v10, %v10204_v3 }
 0x46c   : > { %v4148_v11 = vsel %vm4147_vm11, %v4139_v55, %v10264_v31  ;;  %v4149_v29 = vsel %vm4147_vm11, %v4140_v19, %v10265_v28  ;;  %v4125_v26 = vsel %vm4120_vm8, %v4116_v27, %v10279_v38  ;;  %v4101_v19 = vsel %vm1153_vm3, %v4093_v16, %v10175_v13  ;;  %v4325_v16 = vld [vmem:[%s13537_s6] sm:$0xff] }
 0x46d   : > { %v4109_v55 = vsel %vm4102_vm6, %v4100_v43, %v10249_v15  ;;  %v4110_v21 = vsel %vm4102_vm6, %v4101_v19, %v10250_v42  ;;  %v4134_v61 = vsel %vm4129_vm9, %v4125_v26, %v10244_v14 }
 0x46e   : > { %v4119_v0 = vsel %vm4111_vm7, %v4110_v21, %v10215_v46 }
 0x470   : > { %v12596_v59 = vpop.permute.xlu1 %10302 }
 0x471   : > { %v10305_v17 = vunpack.i.h.bf16 %v12596_v59  ;;  %v10304_v62 = vunpack.i.l.bf16 %v12596_v59  ;;  %v4108_v59 = vsel %vm4102_vm6, %v12561_v54, %v10240_v52  ;;  %v10245_v54 = vunpack.i.h.bf16 %v12582_v44  ;;  %v10288_v44 = vpop.permute.xlu0 %10287 }
 0x472   : > { %v4117_v58 = vsel %vm4111_vm7, %v4108_v59, %v10205_v1  ;;  %v10290_v40 = vunpack.i.h.bf16 %v10288_v44  ;;  %v10289_v63 = vunpack.i.l.bf16 %v10288_v44  ;;  %v4118_v52 = vsel %vm4111_vm7, %v4109_v55, %v10214_v5 }
 0x473   : > { %v4141_v47 = vsel %vm4138_vm10, %v4132_v24, %v10304_v62  ;;  %v4142_v20 = vsel %vm4138_vm10, %v4133_v35, %v10305_v17  ;;  %v4126_v48 = vsel %vm4120_vm8, %v4117_v58, %v10280_v25 }
 0x474   : > { %v4150_v28 = vsel %vm4147_vm11, %v4141_v47, %v10274_v60  ;;  %v4151_v31 = vsel %vm4147_vm11, %v4142_v20, %v10275_v53  ;;  %v7299_v47 = vld [vmem:[%s13537_s6 + $0x10] sm:$0xff]  ;;  %v7296_v20 = vld [vmem:[%s13538_s5] ss:$0 sm:$0xff]  ;;  %s13540_s5 = smov 80  }
 0x475   : > { %8718 = vmatprep.mubr.msk.f32.mxu1 %vm1153_vm3, %v7299_v47  ;;  %v7351_v47 = vld [vmem:[%s13537_s6 + $0xe0] sm:$0xff] }
 0x478   : > { %v12614_v33 = vpop.permute.xlu1 %10307 }
 0x479   : > { %v10310_v36 = vunpack.i.h.bf16 %v12614_v33  ;;  %v10309_v56 = vunpack.i.l.bf16 %v12614_v33  ;;  %v10285_v33 = vunpack.i.h.bf16 %v12590_v2  ;;  %v10254_v2 = vunpack.i.l.bf16 %v12592_v57 }
 0x47b   : > { %v4143_v30 = vsel %vm4138_vm10, %v4134_v61, %v10309_v56 }
 0x47c   : > { %v4152_v12 = vsel %vm4147_vm11, %v4143_v30, %v10284_v8 }
 0x480   : > { %v12628_v4 = vpop.permute.xlu1 %10312 }
 0x481   : > { %v10315_v62 = vunpack.i.h.bf16 %v12628_v4 }
 0x488   : > { %v10318_v22 = vpop.permute.xlu1 %10317 }
 0x489   : > { %v10320_v6 = vunpack.i.h.bf16 %v10318_v22  ;;  %v10319_v23 = vunpack.i.l.bf16 %v10318_v22  ;;  %v4135_v22 = vsel %vm4129_vm9, %v4126_v48, %v10245_v54 }
 0x48a   : > { %v4144_v13 = vsel %vm4138_vm10, %v4135_v22, %v10310_v36 }
 0x48b   : > { %v4157_v7 = vsel %vm4156_vm12, %v4148_v11, %v10319_v23  ;;  %v4158_v45 = vsel %vm4156_vm12, %v4149_v29, %v10320_v6  ;;  %v10255_v23 = vunpack.i.h.bf16 %v12592_v57  ;;  %v4127_v11 = vsel %vm4120_vm8, %v4118_v52, %v10289_v63 }
 0x48c   : > { %8671 = vmatprep.mubr.f32.mxu0 %v4157_v7  ;;  %v4128_v29 = vsel %vm4120_vm8, %v4119_v0, %v10290_v40  ;;  %v4153_v17 = vsel %vm4147_vm11, %v4144_v13, %v10285_v33  ;;  %v10314_v7 = vunpack.i.l.bf16 %v12628_v4  ;;  %v4136_v18 = vsel %vm4129_vm9, %v4127_v11, %v10254_v2  ;;  %v4326_v2 = vld [vmem:[%s13537_s6 + $0x8] sm:$0xff]  ;;  %v7307_v11 = vld [vmem:[%s13537_s6 + $0x30] sm:$0xff] }
 0x48d   : > { %8672 = vmatmul.mubr.f32.vlgmr.msra.gmra.mrb[128].mxu0 %v4158_v45  ;;  %v10293_v45 = vpop.permute.xlu0 %10292  ;;  %v4137_v10 = vsel %vm4129_vm9, %v4128_v29, %v10255_v23  ;;  %v7304_v29 = vld [vmem:[%s13537_s6 + $0x28] sm:$0xff] }
 0x48e   : > { %v10295_v57 = vunpack.i.h.bf16 %v10293_v45  ;;  %v10294_v3 = vunpack.i.l.bf16 %v10293_v45  ;;  %v4145_v59 = vsel %vm4138_vm10, %v4136_v18, %v10314_v7  ;;  %v4146_v24 = vsel %vm4138_vm10, %v4137_v10, %v10315_v62  ;;  %v7315_v62 = vld [vmem:[%s13537_s6 + $0x50] sm:$0xff]  ;;  %v7312_v7 = vld [vmem:[%s13537_s6 + $0x48] sm:$0xff]  ;;  %v7316_v45 = vld [vmem:[%s13537_s6 + $0x58] sm:$0xff] }
 0x48f   : > { %v7327_v18 = vld [vmem:[%s13537_s6 + $0x80] sm:$0xff]  ;;  %v7331_v10 = vld [vmem:[%s13537_s6 + $0x90] sm:$0xff] }
 0x490   : > { %v10323_v41 = vpop.permute.xlu1 %10322  ;;  %v4154_v60 = vsel %vm4147_vm11, %v4145_v59, %v10294_v3  ;;  %v4155_v25 = vsel %vm4147_vm11, %v4146_v24, %v10295_v57  ;;  %v7320_v57 = vld [vmem:[%s13537_s6 + $0x68] sm:$0xff]  ;;  %v7324_v3 = vld [vmem:[%s13537_s6 + $0x78] sm:$0xff] }
 0x491   : > { %v10325_v50 = vunpack.i.h.bf16 %v10323_v41  ;;  %v10324_v9 = vunpack.i.l.bf16 %v10323_v41  ;;  %v7328_v59 = vld [vmem:[%s13537_s6 + $0x88] sm:$0xff]  ;;  %v7332_v24 = vld [vmem:[%s13537_s6 + $0x98] sm:$0xff] }
 0x493   : > { %v4159_v37 = vsel %vm4156_vm12, %v4150_v28, %v10324_v9  ;;  %v4160_v32 = vsel %vm4156_vm12, %v4151_v31, %v10325_v50 }
 0x494   : > { %8674 = vmatprep.mubr.f32.mxu0 %v4159_v37 }
 0x495   : > { %8675 = vmatmul.mubr.f32.gmra.mrb[130].mxu0 %v4160_v32 }
 0x498   : > { %v10328_v6 = vpop.permute.xlu1 %10327 }
 0x499   : > { %v10330_v39 = vunpack.i.h.bf16 %v10328_v6  ;;  %v10329_v51 = vunpack.i.l.bf16 %v10328_v6 }
 0x49b   : > { %v4161_v49 = vsel %vm4156_vm12, %v4152_v12, %v10329_v51  ;;  %v4162_v1 = vsel %vm4156_vm12, %v4153_v17, %v10330_v39  ;;  %v7300_v39 = vld [vmem:[%s13537_s6 + $0x18] sm:$0xff]  ;;  %v7303_v51 = vld [vmem:[%s13537_s6 + $0x20] sm:$0xff] }
 0x49c   : > { %8677 = vmatprep.mubr.f32.mxu0 %v4161_v49  ;;  %v7308_v12 = vld [vmem:[%s13537_s6 + $0x38] sm:$0xff]  ;;  %v7311_v17 = vld [vmem:[%s13537_s6 + $0x40] sm:$0xff] }
 0x49d   : > { %8678 = vmatmul.mubr.f32.gmra.mrb[132].mxu0 %v4162_v1  ;;  %v7319_v49 = vld [vmem:[%s13537_s6 + $0x60] sm:$0xff]  ;;  %v7323_v1 = vld [vmem:[%s13537_s6 + $0x70] sm:$0xff] }
 0x4a0   : > { %v10333_v35 = vpop.permute.xlu1 %10332 }
 0x4a1   : > { %v10335_v4 = vunpack.i.h.bf16 %v10333_v35  ;;  %v10334_v53 = vunpack.i.l.bf16 %v10333_v35  ;;  %v7335_v35 = vld [vmem:[%s13537_s6 + $0xa0] sm:$0xff] }
 0x4a3   : > { %v4163_v38 = vsel %vm4156_vm12, %v4154_v60, %v10334_v53  ;;  %v4164_v34 = vsel %vm4156_vm12, %v4155_v25, %v10335_v4  ;;  %v7339_v4 = vld [vmem:[%s13537_s6 + $0xb0] sm:$0xff]  ;;  %v7336_v53 = vld [vmem:[%s13537_s6 + $0xa8] sm:$0xff]  ;;  %v7340_v60 = vld [vmem:[%s13537_s6 + $0xb8] sm:$0xff] }
 0x4a4   : > { %8680 = vmatprep.mubr.f32.mxu0 %v4163_v38  ;;  %v7343_v25 = vld [vmem:[%s13537_s6 + $0xc0] sm:$0xff]  ;;  %v7347_v38 = vld [vmem:[%s13537_s6 + $0xd0] sm:$0xff] }
 0x4a5   : > { %8681 = vmatmul.mubr.f32.gmra.mrb[134].mxu0 %v4164_v34  ;;  %v7344_v34 = vld [vmem:[%s13537_s6 + $0xc8] sm:$0xff] }
 0x4a6   : > { %8699 = vmatprep.mubr.msk.f32.mxu0 %vm1153_vm3, %v4325_v16  ;;  %v7348_v16 = vld [vmem:[%s13537_s6 + $0xd8] sm:$0xff] }
 0x560   : > { %v8673_v54 = vpop.f32.mrb[128].mxu0 }
 0x561   : > { %v4260_v14 = vadd.f32 %v8673_v54, %v7296_v20  ;;  %v4254_v27 = vpop.f32.mrb[129].mxu0  ;;  %v7352_v54 = vld [vmem:[%s13537_s6 + $0xe8] sm:$0xff] }
 0x562   : > { %v4255_v58 = vadd.f32 %v7296_v20, %v4254_v27 }
 0x563   : > { %vm4294_vm13 = vcmp.ge.f32.partialorder %v4260_v14, 0.0  ;;  %v4302_v41 = vmul.f32 0.01, %v4260_v14 }
 0x564   : > { %vm4293_vm14 = vcmp.ge.f32.partialorder %v4255_v58, 0.0  ;;  %v4301_v42 = vmul.f32 0.01, %v4255_v58 }
 0x565   : > { %v4310_v15 = vsel %vm4294_vm13, %v4260_v14, %v4302_v41  ;;  %v7356_v14 = vld [vmem:[%s13537_s6 + $0xf8] sm:$0xff] }
 0x566   : > { %4318 = vst.msk [vmem:[%s12735_s2 + $0x8] sm:$0xff] %vm1039_vm0, %v4310_v15  ;;  %v4309_v50 = vsel %vm4293_vm14, %v4255_v58, %v4301_v42 }
 0x567   : > { %4317 = vst.msk [vmem:[%s12735_s2] sm:$0xff] %vm1039_vm0, %v4309_v50  ;;  %v12741_v9 = vpack.c.bf16 %v4310_v15, %v4309_v50 }
 0x568   : > { %v8676_v26 = vpop.f32.mrb[130].mxu0 }
 0x569   : > { %v4270_v48 = vadd.f32 %v8676_v26, %v7296_v20  ;;  %v4264_v28 = vpop.f32.mrb[131].mxu0  ;;  %9611 = vmatprep.subr.bf16.mxu0 %v12741_v9  ;;  %9627 = vmatprep.subr.bf16.mxu1 %v12741_v9 }
 0x56a   : > { %v4265_v31 = vadd.f32 %v7296_v20, %v4264_v28  ;;  %9613 = vmatpush3.bf16.msra.mxu0 %v12741_v9  ;;  %9629 = vmatpush3.bf16.msra.mxu1 %v12741_v9 }
 0x56b   : > { %vm4296_vm4 = vcmp.ge.f32.partialorder %v4270_v48, 0.0  ;;  %v4304_v44 = vmul.f32 0.01, %v4270_v48 }
 0x56c   : > { %vm4295_vm10 = vcmp.ge.f32.partialorder %v4265_v31, 0.0  ;;  %v4303_v36 = vmul.f32 0.01, %v4265_v31 }
 0x56d   : > { %v4312_v56 = vsel %vm4296_vm4, %v4270_v48, %v4304_v44 }
 0x56e   : > { %4320 = vst.msk [vmem:[%s12735_s2 + $0x18] sm:$0xff] %vm1039_vm0, %v4312_v56  ;;  %v4311_v37 = vsel %vm4295_vm10, %v4265_v31, %v4303_v36 }
 0x56f   : > { %4319 = vst.msk [vmem:[%s12735_s2 + $0x10] sm:$0xff] %vm1039_vm0, %v4311_v37  ;;  %v12751_v32 = vpack.c.bf16 %v4312_v56, %v4311_v37 }
 0x570   : > { %v8679_v46 = vpop.f32.mrb[132].mxu0 }
 0x571   : > { %v4280_v5 = vadd.f32 %v8679_v46, %v7296_v20  ;;  %v4274_v43 = vpop.f32.mrb[133].mxu0  ;;  %9615 = vmatprep.subr.bf16.mxu0 %v12751_v32  ;;  %9631 = vmatprep.subr.bf16.mxu1 %v12751_v32 }
 0x572   : > { %v4275_v19 = vadd.f32 %v7296_v20, %v4274_v43  ;;  %9617 = vmatpush3.bf16.msra.mxu0 %v12751_v32  ;;  %9633 = vmatpush3.bf16.msra.mxu1 %v12751_v32 }
 0x573   : > { %vm4298_vm13 = vcmp.ge.f32.partialorder %v4280_v5, 0.0  ;;  %v4306_v55 = vmul.f32 0.01, %v4280_v5 }
 0x574   : > { %vm4297_vm14 = vcmp.ge.f32.partialorder %v4275_v19, 0.0  ;;  %v4305_v21 = vmul.f32 0.01, %v4275_v19 }
 0x575   : > { %v4314_v33 = vsel %vm4298_vm13, %v4280_v5, %v4306_v55 }
 0x576   : > { %4322 = vst.msk [vmem:[%s12735_s2 + $0x28] sm:$0xff] %vm1039_vm0, %v4314_v33  ;;  %v4313_v8 = vsel %vm4297_vm14, %v4275_v19, %v4305_v21 }
 0x577   : > { %4321 = vst.msk [vmem:[%s12735_s2 + $0x20] sm:$0xff] %vm1039_vm0, %v4313_v8  ;;  %v12761_v40 = vpack.c.bf16 %v4314_v33, %v4313_v8  ;;  %v5824_v33 = vld [vmem:[%s13539_s7 + $0x80] sm:$0xff]  ;;  %v5825_v8 = vld [vmem:[%s13539_s7 + $0x88] sm:$0xff] }
 0x578   : > { %v8682_v63 = vpop.f32.mrb[134].mxu0 }
 0x579   : > { %v4290_v61 = vadd.f32 %v8682_v63, %v7296_v20  ;;  %v4284_v22 = vpop.f32.mrb[135].mxu0  ;;  %9619 = vmatprep.subr.bf16.mxu0 %v12761_v40  ;;  %9635 = vmatprep.subr.bf16.mxu1 %v12761_v40  ;;  %v5808_v63 = vld [vmem:[%s13539_s7] sm:$0xff] }
 0x57a   : > { %v4285_v30 = vadd.f32 %v7296_v20, %v4284_v22  ;;  %9621 = vmatpush3.bf16.msra.mxu0 %v12761_v40  ;;  %9637 = vmatpush3.bf16.msra.mxu1 %v12761_v40  ;;  %v7355_v20 = vld [vmem:[%s13537_s6 + $0xf0] sm:$0xff]  ;;  %s13541_s6 = smov 64  }
 0x57b   : > { %vm4300_vm4 = vcmp.ge.f32.partialorder %v4290_v61, 0.0  ;;  %v4308_v13 = vmul.f32 0.01, %v4290_v61 }
 0x57c   : > { %vm4299_vm10 = vcmp.ge.f32.partialorder %v4285_v30, 0.0  ;;  %v4307_v52 = vmul.f32 0.01, %v4285_v30 }
 0x57d   : > { %v4316_v0 = vsel %vm4300_vm4, %v4290_v61, %v4308_v13  ;;  %v5809_v61 = vld [vmem:[%s13539_s7 + $0x8] sm:$0xff] }
 0x57e   : > { %4324 = vst.msk [vmem:[%s12735_s2 + $0x38] sm:$0xff] %vm1039_vm0, %v4316_v0  ;;  %v4315_v6 = vsel %vm4299_vm10, %v4285_v30, %v4307_v52  ;;  %v9868_v22 = vpack.c.bf16 %v5809_v61, %v5808_v63  ;;  %v5826_v52 = vld [vmem:[%s13539_s7 + $0x90] sm:$0xff]  ;;  %v5839_v63 = vld [vmem:[%s13539_s7 + $0xf8] sm:$0xff] }
 0x57f   : > { %4323 = vst.msk [vmem:[%s12735_s2 + $0x30] sm:$0xff] %vm1039_vm0, %v4315_v6  ;;  %v12771_v23 = vpack.c.bf16 %v4316_v0, %v4315_v6  ;;  %v5827_v0 = vld [vmem:[%s13539_s7 + $0x98] sm:$0xff]  ;;  %v5810_v6 = vld [vmem:[%s13539_s7 + $0x10] sm:$0xff] }
 0x581   : > { %9623 = vmatprep.subr.bf16.mxu0 %v12771_v23  ;;  %9639 = vmatprep.subr.bf16.mxu1 %v12771_v23 }
 0x582   : > { %9625 = vmatpush3.bf16.msra.mxu0 %v12771_v23  ;;  %9641 = vmatpush3.bf16.msra.mxu1 %v12771_v23 }
 0x583   : > { %9643 = vmatprep.subr.bf16.mxu0 %v12741_v9  ;;  %9659 = vmatprep.subr.bf16.mxu1 %v12741_v9 }
 0x585   : > { %8700 = vmatmul.mubr.msk.f32.vlgmr.msra.gmra.mrb[136].mxu0 %vm1153_vm3, %v4326_v2  ;;  %8719 = vmatmul.mubr.msk.f32.vlgmr.msra.gmra.mrb[160].mxu1 %vm1153_vm3, %v7300_v39 }
 0x586   : > { %9645 = vmatpush3.bf16.msra.mxu0 %v12741_v9  ;;  %9661 = vmatpush3.bf16.msra.mxu1 %v12741_v9 }
 0x587   : > { %9647 = vmatprep.subr.bf16.mxu0 %v12751_v32  ;;  %9663 = vmatprep.subr.bf16.mxu1 %v12751_v32 }
 0x588   : > { %8737 = vmatprep.mubr.msk.f32.mxu0 %vm1153_vm3, %v7303_v51  ;;  %8756 = vmatprep.mubr.msk.f32.mxu1 %vm1153_vm3, %v7307_v11  ;;  %v9870_v11 = vpack.c.bf16 %v5827_v0, %v5826_v52 }
 0x58a   : > { %9649 = vmatpush3.bf16.msra.mxu0 %v12751_v32  ;;  %9665 = vmatpush3.bf16.msra.mxu1 %v12751_v32 }
 0x58b   : > { %9651 = vmatprep.subr.bf16.mxu0 %v12761_v40  ;;  %9667 = vmatprep.subr.bf16.mxu1 %v12761_v40 }
 0x58e   : > { %9653 = vmatpush3.bf16.msra.mxu0 %v12761_v40  ;;  %9669 = vmatpush3.bf16.msra.mxu1 %v12761_v40 }
 0x58f   : > { %9655 = vmatprep.subr.bf16.mxu0 %v12771_v23  ;;  %9671 = vmatprep.subr.bf16.mxu1 %v12771_v23 }
 0x592   : > { %9657 = vmatpush3.bf16.msra.mxu0 %v12771_v23  ;;  %9673 = vmatpush3.bf16.msra.mxu1 %v12771_v23 }
 0x593   : > { %9675 = vmatprep.subr.bf16.mxu0 %v12741_v9  ;;  %9691 = vmatprep.subr.bf16.mxu1 %v12741_v9 }
 0x595   : > { %8738 = vmatmul.mubr.msk.f32.vlgmr.msra.gmra.mrb[138].mxu0 %vm1153_vm3, %v7304_v29  ;;  %8757 = vmatmul.mubr.msk.f32.vlgmr.msra.gmra.mrb[162].mxu1 %vm1153_vm3, %v7308_v12  ;;  %v5811_v29 = vld [vmem:[%s13539_s7 + $0x18] sm:$0xff] }
 0x596   : > { %9677 = vmatpush3.bf16.msra.mxu0 %v12741_v9  ;;  %9693 = vmatpush3.bf16.msra.mxu1 %v12741_v9 }
 0x597   : > { %9679 = vmatprep.subr.bf16.mxu0 %v12751_v32  ;;  %9695 = vmatprep.subr.bf16.mxu1 %v12751_v32 }
 0x598   : > { %8775 = vmatprep.mubr.msk.f32.mxu0 %vm1153_vm3, %v7311_v17  ;;  %8794 = vmatprep.mubr.msk.f32.mxu1 %vm1153_vm3, %v7315_v62  ;;  %v9872_v62 = vpack.c.bf16 %v5811_v29, %v5810_v6 }
 0x59a   : > { %9681 = vmatpush3.bf16.msra.mxu0 %v12751_v32  ;;  %9697 = vmatpush3.bf16.msra.mxu1 %v12751_v32 }
 0x59b   : > { %9683 = vmatprep.subr.bf16.mxu0 %v12761_v40  ;;  %9699 = vmatprep.subr.bf16.mxu1 %v12761_v40 }
 0x59e   : > { %9685 = vmatpush3.bf16.msra.mxu0 %v12761_v40  ;;  %9701 = vmatpush3.bf16.msra.mxu1 %v12761_v40 }
 0x59f   : > { %9687 = vmatprep.subr.bf16.mxu0 %v12771_v23  ;;  %9703 = vmatprep.subr.bf16.mxu1 %v12771_v23 }
 0x5a2   : > { %9689 = vmatpush3.bf16.msra.mxu0 %v12771_v23  ;;  %9705 = vmatpush3.bf16.msra.mxu1 %v12771_v23 }
 0x5a3   : > { %9707 = vmatprep.subr.bf16.mxu0 %v12741_v9  ;;  %9723 = vmatprep.subr.bf16.mxu1 %v12741_v9 }
 0x5a5   : > { %8776 = vmatmul.mubr.msk.f32.vlgmr.msra.gmra.mrb[140].mxu0 %vm1153_vm3, %v7312_v7  ;;  %8795 = vmatmul.mubr.msk.f32.vlgmr.msra.gmra.mrb[164].mxu1 %vm1153_vm3, %v7316_v45  ;;  %v5828_v7 = vld [vmem:[%s13539_s7 + $0xa0] sm:$0xff]  ;;  %v5829_v45 = vld [vmem:[%s13539_s7 + $0xa8] sm:$0xff] }
 0x5a6   : > { %9709 = vmatpush3.bf16.msra.mxu0 %v12741_v9  ;;  %9725 = vmatpush3.bf16.msra.mxu1 %v12741_v9 }
 0x5a7   : > { %9711 = vmatprep.subr.bf16.mxu0 %v12751_v32  ;;  %9727 = vmatprep.subr.bf16.mxu1 %v12751_v32 }
 0x5a8   : > { %8813 = vmatprep.mubr.msk.f32.mxu0 %vm1153_vm3, %v7319_v49  ;;  %8832 = vmatprep.mubr.msk.f32.mxu1 %vm1153_vm3, %v7323_v1  ;;  %v9874_v49 = vpack.c.bf16 %v5829_v45, %v5828_v7  ;;  %v5812_v1 = vld [vmem:[%s13539_s7 + $0x20] sm:$0xff] }
 0x5aa   : > { %9713 = vmatpush3.bf16.msra.mxu0 %v12751_v32  ;;  %9729 = vmatpush3.bf16.msra.mxu1 %v12751_v32 }
 0x5ab   : > { %9715 = vmatprep.subr.bf16.mxu0 %v12761_v40  ;;  %9731 = vmatprep.subr.bf16.mxu1 %v12761_v40 }
 0x5ae   : > { %9717 = vmatpush3.bf16.msra.mxu0 %v12761_v40  ;;  %9733 = vmatpush3.bf16.msra.mxu1 %v12761_v40 }
 0x5af   : > { %9719 = vmatprep.subr.bf16.mxu0 %v12771_v23  ;;  %9735 = vmatprep.subr.bf16.mxu1 %v12771_v23 }
 0x5b2   : > { %9721 = vmatpush3.bf16.msra.mxu0 %v12771_v23  ;;  %9737 = vmatpush3.bf16.msra.mxu1 %v12771_v23 }
 0x5b3   : > { %9739 = vmatprep.subr.bf16.mxu0 %v12741_v9  ;;  %9755 = vmatprep.subr.bf16.mxu1 %v12741_v9 }
 0x5b5   : > { %8814 = vmatmul.mubr.msk.f32.vlgmr.msra.gmra.mrb[142].mxu0 %vm1153_vm3, %v7320_v57  ;;  %8833 = vmatmul.mubr.msk.f32.vlgmr.msra.gmra.mrb[166].mxu1 %vm1153_vm3, %v7324_v3  ;;  %v5813_v57 = vld [vmem:[%s13539_s7 + $0x28] sm:$0xff] }
 0x5b6   : > { %9741 = vmatpush3.bf16.msra.mxu0 %v12741_v9  ;;  %9757 = vmatpush3.bf16.msra.mxu1 %v12741_v9  ;;  %v9876_v3 = vpack.c.bf16 %v5813_v57, %v5812_v1 }
 0x5b7   : > { %9743 = vmatprep.subr.bf16.mxu0 %v12751_v32  ;;  %9759 = vmatprep.subr.bf16.mxu1 %v12751_v32 }
 0x5b8   : > { %8851 = vmatprep.mubr.msk.f32.mxu0 %vm1153_vm3, %v7327_v18  ;;  %8870 = vmatprep.mubr.msk.f32.mxu1 %vm1153_vm3, %v7331_v10  ;;  %v5830_v18 = vld [vmem:[%s13539_s7 + $0xb0] sm:$0xff]  ;;  %v5831_v10 = vld [vmem:[%s13539_s7 + $0xb8] sm:$0xff] }
 0x5ba   : > { %9745 = vmatpush3.bf16.msra.mxu0 %v12751_v32  ;;  %9761 = vmatpush3.bf16.msra.mxu1 %v12751_v32 }
 0x5bb   : > { %9747 = vmatprep.subr.bf16.mxu0 %v12761_v40  ;;  %9763 = vmatprep.subr.bf16.mxu1 %v12761_v40 }
 0x5be   : > { %9749 = vmatpush3.bf16.msra.mxu0 %v12761_v40  ;;  %9765 = vmatpush3.bf16.msra.mxu1 %v12761_v40 }
 0x5bf   : > { %9751 = vmatprep.subr.bf16.mxu0 %v12771_v23  ;;  %9767 = vmatprep.subr.bf16.mxu1 %v12771_v23 }
 0x5c2   : > { %9753 = vmatpush3.bf16.msra.mxu0 %v12771_v23  ;;  %9769 = vmatpush3.bf16.msra.mxu1 %v12771_v23 }
 0x5c3   : > { %9771 = vmatprep.subr.bf16.mxu0 %v12741_v9  ;;  %9787 = vmatprep.subr.bf16.mxu1 %v12741_v9 }
 0x5c5   : > { %8852 = vmatmul.mubr.msk.f32.vlgmr.msra.gmra.mrb[144].mxu0 %vm1153_vm3, %v7328_v59  ;;  %8871 = vmatmul.mubr.msk.f32.vlgmr.msra.gmra.mrb[168].mxu1 %vm1153_vm3, %v7332_v24  ;;  %v9878_v59 = vpack.c.bf16 %v5831_v10, %v5830_v18  ;;  %v5814_v24 = vld [vmem:[%s13539_s7 + $0x30] sm:$0xff] }
 0x5c6   : > { %9773 = vmatpush3.bf16.msra.mxu0 %v12741_v9  ;;  %9789 = vmatpush3.bf16.msra.mxu1 %v12741_v9 }
 0x5c7   : > { %9775 = vmatprep.subr.bf16.mxu0 %v12751_v32  ;;  %9791 = vmatprep.subr.bf16.mxu1 %v12751_v32 }
 0x5c8   : > { %8889 = vmatprep.mubr.msk.f32.mxu0 %vm1153_vm3, %v7335_v35  ;;  %8908 = vmatprep.mubr.msk.f32.mxu1 %vm1153_vm3, %v7339_v4  ;;  %v5815_v35 = vld [vmem:[%s13539_s7 + $0x38] sm:$0xff] }
 0x5c9   : > { %v9880_v4 = vpack.c.bf16 %v5815_v35, %v5814_v24 }
 0x5ca   : > { %9777 = vmatpush3.bf16.msra.mxu0 %v12751_v32  ;;  %9793 = vmatpush3.bf16.msra.mxu1 %v12751_v32 }
 0x5cb   : > { %9779 = vmatprep.subr.bf16.mxu0 %v12761_v40  ;;  %9795 = vmatprep.subr.bf16.mxu1 %v12761_v40 }
 0x5ce   : > { %9781 = vmatpush3.bf16.msra.mxu0 %v12761_v40  ;;  %9797 = vmatpush3.bf16.msra.mxu1 %v12761_v40 }
 0x5cf   : > { %9783 = vmatprep.subr.bf16.mxu0 %v12771_v23  ;;  %9799 = vmatprep.subr.bf16.mxu1 %v12771_v23 }
 0x5d2   : > { %9785 = vmatpush3.bf16.msra.mxu0 %v12771_v23  ;;  %9801 = vmatpush3.bf16.msra.mxu1 %v12771_v23 }
 0x5d3   : > { %9803 = vmatprep.subr.bf16.mxu0 %v12741_v9  ;;  %9819 = vmatprep.subr.bf16.mxu1 %v12741_v9 }
 0x5d5   : > { %8890 = vmatmul.mubr.msk.f32.vlgmr.msra.gmra.mrb[146].mxu0 %vm1153_vm3, %v7336_v53  ;;  %8909 = vmatmul.mubr.msk.f32.vlgmr.msra.gmra.mrb[170].mxu1 %vm1153_vm3, %v7340_v60  ;;  %v5832_v53 = vld [vmem:[%s13539_s7 + $0xc0] sm:$0xff]  ;;  %v5833_v60 = vld [vmem:[%s13539_s7 + $0xc8] sm:$0xff] }
 0x5d6   : > { %9805 = vmatpush3.bf16.msra.mxu0 %v12741_v9  ;;  %9821 = vmatpush3.bf16.msra.mxu1 %v12741_v9 }
 0x5d7   : > { %9807 = vmatprep.subr.bf16.mxu0 %v12751_v32  ;;  %9823 = vmatprep.subr.bf16.mxu1 %v12751_v32 }
 0x5d8   : > { %8927 = vmatprep.mubr.msk.f32.mxu0 %vm1153_vm3, %v7343_v25  ;;  %8946 = vmatprep.mubr.msk.f32.mxu1 %vm1153_vm3, %v7347_v38  ;;  %v9882_v25 = vpack.c.bf16 %v5833_v60, %v5832_v53  ;;  %v5816_v38 = vld [vmem:[%s13539_s7 + $0x40] sm:$0xff] }
 0x5da   : > { %9809 = vmatpush3.bf16.msra.mxu0 %v12751_v32  ;;  %9825 = vmatpush3.bf16.msra.mxu1 %v12751_v32 }
 0x5db   : > { %9811 = vmatprep.subr.bf16.mxu0 %v12761_v40  ;;  %9827 = vmatprep.subr.bf16.mxu1 %v12761_v40 }
 0x5de   : > { %9813 = vmatpush3.bf16.msra.mxu0 %v12761_v40  ;;  %9829 = vmatpush3.bf16.msra.mxu1 %v12761_v40 }
 0x5df   : > { %9815 = vmatprep.subr.bf16.mxu0 %v12771_v23  ;;  %9831 = vmatprep.subr.bf16.mxu1 %v12771_v23 }
 0x5e2   : > { %9817 = vmatpush3.bf16.msra.mxu0 %v12771_v23  ;;  %9833 = vmatpush3.bf16.msra.mxu1 %v12771_v23 }
 0x5e3   : > { %9835 = vmatprep.subr.bf16.mxu0 %v12741_v9  ;;  %9851 = vmatprep.subr.bf16.mxu1 %v12741_v9 }
 0x5e5   : > { %8928 = vmatmul.mubr.msk.f32.vlgmr.msra.gmra.mrb[148].mxu0 %vm1153_vm3, %v7344_v34  ;;  %8947 = vmatmul.mubr.msk.f32.vlgmr.msra.gmra.mrb[172].mxu1 %vm1153_vm3, %v7348_v16  ;;  %v5817_v34 = vld [vmem:[%s13539_s7 + $0x48] sm:$0xff] }
 0x5e6   : > { %9837 = vmatpush3.bf16.msra.mxu0 %v12741_v9  ;;  %9853 = vmatpush3.bf16.msra.mxu1 %v12741_v9  ;;  %v9884_v16 = vpack.c.bf16 %v5817_v34, %v5816_v38 }
 0x5e7   : > { %9839 = vmatprep.subr.bf16.mxu0 %v12751_v32  ;;  %9855 = vmatprep.subr.bf16.mxu1 %v12751_v32 }
 0x5e8   : > { %8965 = vmatprep.mubr.msk.f32.mxu0 %vm1153_vm3, %v7351_v47  ;;  %8984 = vmatprep.mubr.msk.f32.mxu1 %vm1153_vm3, %v7355_v20 }
 0x5ea   : > { %9841 = vmatpush3.bf16.msra.mxu0 %v12751_v32  ;;  %9857 = vmatpush3.bf16.msra.mxu1 %v12751_v32 }
 0x5eb   : > { %9843 = vmatprep.subr.bf16.mxu0 %v12761_v40  ;;  %9859 = vmatprep.subr.bf16.mxu1 %v12761_v40 }
 0x5ee   : > { %9845 = vmatpush3.bf16.msra.mxu0 %v12761_v40  ;;  %9861 = vmatpush3.bf16.msra.mxu1 %v12761_v40  ;;  %v9866_v40 = vpack.c.bf16 %v5825_v8, %v5824_v33 }
 0x5ef   : > { %9847 = vmatprep.subr.bf16.mxu0 %v12771_v23  ;;  %9863 = vmatprep.subr.bf16.mxu1 %v12771_v23 }
 0x5f2   : > { %9849 = vmatpush3.bf16.msra.mxu0 %v12771_v23  ;;  %9865 = vmatpush3.bf16.msra.mxu1 %v12771_v23 }
 0x5f3   : > { %9867 = vmatprep.subr.bf16.mxu0 %v9866_v40  ;;  %v5838_v40 = vld [vmem:[%s13539_s7 + $0xf0] sm:$0xff] }
 0x5f4   : > { %v9894_v61 = vpack.c.bf16 %v5839_v63, %v5838_v40 }
 0x5f5   : > { %8966 = vmatmul.mubr.msk.f32.vlgmr.msra.gmra.mrb[150].mxu0 %vm1153_vm3, %v7352_v54  ;;  %8985 = vmatmul.mubr.msk.f32.vlgmr.msra.gmra.mrb[174].mxu1 %vm1153_vm3, %v7356_v14  ;;  %v5834_v54 = vld [vmem:[%s13539_s7 + $0xd0] sm:$0xff]  ;;  %v5835_v14 = vld [vmem:[%s13539_s7 + $0xd8] sm:$0xff] }
 0x5f6   : > { %9869 = vmatpush3.bf16.msra.mxu0 %v9868_v22  ;;  %v5822_v22 = vld [vmem:[%s13539_s7 + $0x70] sm:$0xff] }
 0x5f7   : > { %9871 = vmatprep.subr.bf16.mxu0 %v9870_v11 }
 0x5fa   : > { %9873 = vmatpush3.bf16.msra.mxu0 %v9872_v62 }
 0x5fb   : > { %9875 = vmatprep.subr.bf16.mxu0 %v9874_v49 }
 0x5fe   : > { %9877 = vmatpush3.bf16.msra.mxu0 %v9876_v3 }
 0x5ff   : > { %9879 = vmatprep.subr.bf16.mxu0 %v9878_v59 }
 0x602   : > { %9881 = vmatpush3.bf16.msra.mxu0 %v9880_v4 }
 0x603   : > { %9883 = vmatprep.subr.bf16.mxu0 %v9882_v25 }
 0x606   : > { %9885 = vmatpush3.bf16.msra.mxu0 %v9884_v16 }
 0x658   : > { %v13009_v27 = vpop.f32.mrb[136].mxu0  ;;  %v8720_v58 = vpop.f32.mrb[160].mxu1 }
 0x659   : > { %v13011_v41 = vpop.f32.mrb[137].mxu0  ;;  %v4483_v42 = vpop.f32.mrb[161].mxu1 }
 0x668   : > { %v8739_v15 = vpop.f32.mrb[138].mxu0  ;;  %v8758_v50 = vpop.f32.mrb[162].mxu1 }
 0x669   : > { %v4567_v9 = vpop.f32.mrb[139].mxu0  ;;  %v4651_v26 = vpop.f32.mrb[163].mxu1 }
 0x678   : > { %v13013_v48 = vpop.f32.mrb[140].mxu0  ;;  %v13015_v28 = vpop.f32.mrb[164].mxu1 }
 0x679   : > { %v13017_v31 = vpop.f32.mrb[141].mxu0  ;;  %v13019_v44 = vpop.f32.mrb[165].mxu1 }
 0x688   : > { %v13021_v36 = vpop.f32.mrb[142].mxu0  ;;  %v13023_v56 = vpop.f32.mrb[166].mxu1 }
 0x689   : > { %v13025_v37 = vpop.f32.mrb[143].mxu0  ;;  %v13027_v32 = vpop.f32.mrb[167].mxu1 }
 0x698   : > { %v13029_v46 = vpop.f32.mrb[144].mxu0  ;;  %v8872_v5 = vpop.f32.mrb[168].mxu1 }
 0x699   : > { %v10336_v43 = vpack.i.bf16 %v8720_v58, %v8872_v5  ;;  %v13031_v19 = vpop.f32.mrb[145].mxu0  ;;  %v5155_v55 = vpop.f32.mrb[169].mxu1  ;;  %v5818_v58 = vld [vmem:[%s13539_s7 + $0x50] sm:$0xff]  ;;  %v5819_v5 = vld [vmem:[%s13539_s7 + $0x58] sm:$0xff] }
 0x69a   : > { %v10341_v21 = vpack.i.bf16 %v4483_v42, %v5155_v55 }
 0x69b   : > { %10337 = vrot.lane.b32.xlu0 %v10336_v43, %s13530_s23 }
 0x69f   : > { %10342 = vrot.lane.b32.xlu0 %v10341_v21, %s13530_s23  ;;  %v9888_v21 = vpack.c.bf16 %v5819_v5, %v5818_v58 }
 0x6a8   : > { %v8891_v30 = vpop.f32.mrb[146].mxu0  ;;  %v8910_v13 = vpop.f32.mrb[170].mxu1 }
 0x6a9   : > { %v10346_v23 = vpack.i.bf16 %v8739_v15, %v8891_v30  ;;  %v10351_v2 = vpack.i.bf16 %v8758_v50, %v8910_v13  ;;  %v5239_v39 = vpop.f32.mrb[147].mxu0  ;;  %v5323_v51 = vpop.f32.mrb[171].mxu1  ;;  %v5823_v30 = vld [vmem:[%s13539_s7 + $0x78] sm:$0xff] }
 0x6aa   : > { %v10356_v12 = vpack.i.bf16 %v4567_v9, %v5239_v39  ;;  %v10361_v17 = vpack.i.bf16 %v4651_v26, %v5323_v51  ;;  %v9886_v26 = vpack.c.bf16 %v5835_v14, %v5834_v54  ;;  %v9896_v13 = vpack.c.bf16 %v5823_v30, %v5822_v22 }
 0x6ab   : > { %10347 = vrot.lane.b32.xlu0 %v10346_v23, %s13531_s27 }
 0x6ac   : > { %10357 = vrot.lane.b32.xlu1 %v10356_v12, %s13531_s27  ;;  %9887 = vmatprep.subr.bf16.mxu0 %v9886_v26  ;;  %s13542_s27 = smov 96  }
 0x6ad   : > { %9889 = vmatpush3.bf16.msra.mxu0 %v9888_v21 }
 0x6af   : > { %10352 = vrot.lane.b32.xlu0 %v10351_v2, %s13533_s30 }
 0x6b3   : > { %10362 = vrot.lane.b32.xlu0 %v10361_v17, %s13533_s30 }
 0x6b8   : > { %v8929_v47 = vpop.f32.mrb[148].mxu0  ;;  %v8948_v20 = vpop.f32.mrb[172].mxu1 }
 0x6b9   : > { %v10366_v42 = vpack.i.bf16 %v13013_v48, %v8929_v47  ;;  %v10371_v15 = vpack.i.bf16 %v13015_v28, %v8948_v20  ;;  %v5407_v50 = vpop.f32.mrb[149].mxu0  ;;  %v5491_v9 = vpop.f32.mrb[173].mxu1  ;;  %v5836_v48 = vld [vmem:[%s13539_s7 + $0xe0] sm:$0xff]  ;;  %v5837_v28 = vld [vmem:[%s13539_s7 + $0xe8] sm:$0xff] }
 0x6ba   : > { %v10376_v43 = vpack.i.bf16 %v13017_v31, %v5407_v50  ;;  %v10381_v55 = vpack.i.bf16 %v13019_v44, %v5491_v9  ;;  %v9890_v33 = vpack.c.bf16 %v5837_v28, %v5836_v48  ;;  %v5820_v31 = vld [vmem:[%s13539_s7 + $0x60] sm:$0xff]  ;;  %v5821_v44 = vld [vmem:[%s13539_s7 + $0x68] sm:$0xff] }
 0x6bb   : > { %10372 = vrot.lane.b32.xlu1 %v10371_v15, %s13540_s5  ;;  %10367 = vrot.lane.b32.xlu0 %v10366_v42, %s13541_s6  ;;  %v9892_v8 = vpack.c.bf16 %v5821_v44, %v5820_v31 }
 0x6bc   : > { %9891 = vmatprep.subr.bf16.mxu0 %v9890_v33 }
 0x6bd   : > { %9893 = vmatpush3.bf16.msra.mxu0 %v9892_v8 }
 0x6be   : > { %9895 = vmatprep.subr.bf16.mxu0 %v9894_v61 }
 0x6bf   : > { %10377 = vrot.lane.b32.xlu1 %v10376_v43, %s13541_s6 }
 0x6c1   : > { %9897 = vmatpush3.bf16.msra.mxu0 %v9896_v13 }
 0x6c3   : > { %10382 = vrot.lane.b32.xlu1 %v10381_v55, %s13540_s5 }
 0x6c8   : > { %v8967_v52 = vpop.f32.mrb[150].mxu0  ;;  %v8986_v0 = vpop.f32.mrb[174].mxu1 }
 0x6c9   : > { %v10386_v6 = vpack.i.bf16 %v13021_v36, %v8967_v52  ;;  %v10401_v23 = vpack.i.bf16 %v13023_v56, %v8986_v0  ;;  %v5575_v2 = vpop.f32.mrb[151].mxu0  ;;  %v5659_v39 = vpop.f32.mrb[175].mxu1 }
 0x6ca   : > { %v10391_v51 = vpack.i.bf16 %v13025_v37, %v5575_v2  ;;  %v10396_v11 = vpack.i.bf16 %v13027_v32, %v5659_v39 }
 0x6cb   : > { %10387 = vrot.lane.b32.xlu0 %v10386_v6, %s13542_s27 }
 0x6cc   : > { %10392 = vrot.lane.b32.xlu1 %v10391_v51, %s13542_s27 }
 0x6d0   : > { %10397 = vrot.lane.b32.xlu1 %v10396_v11, %s13535_s16 }
 0x6d4   : > { %10402 = vrot.lane.b32.xlu1 %v10401_v23, %s13535_s16 }
 0x70d   : > { %v10338_v29 = vpop.permute.xlu0 %10337 }
 0x70e   : > { %v10340_v45 = vunpack.i.h.bf16 %v10338_v29  ;;  %v10339_v37 = vunpack.i.l.bf16 %v10338_v29 }
 0x710   : > { %v5781_v10 = vsel %vm1039_vm0, %v13009_v27, %v10340_v45  ;;  %v5795_v59 = vsel %vm1039_vm0, %v13029_v46, %v10339_v37  ;;  %v10519_v45 = vmov 0.0  }
 0x711   : > { %v10343_v12 = vpop.permute.xlu0 %10342 }
 0x712   : > { %v10345_v32 = vunpack.i.h.bf16 %v10343_v12  ;;  %v10344_v1 = vunpack.i.l.bf16 %v10343_v12 }
 0x714   : > { %v5780_v53 = vsel %vm1039_vm0, %v13011_v41, %v10345_v32  ;;  %v5794_v60 = vsel %vm1039_vm0, %v13031_v19, %v10344_v1 }
 0x71d   : > { %v10348_v36 = vpop.permute.xlu0 %10347 }
 0x71e   : > { %v10358_v17 = vpop.permute.xlu1 %10357  ;;  %v10350_v57 = vunpack.i.h.bf16 %v10348_v36  ;;  %v10349_v3 = vunpack.i.l.bf16 %v10348_v36 }
 0x71f   : > { %v10360_v24 = vunpack.i.h.bf16 %v10358_v17  ;;  %v10359_v35 = vunpack.i.l.bf16 %v10358_v17 }
 0x720   : > { %v5783_v34 = vsel %vm1072_vm1, %v5781_v10, %v10350_v57  ;;  %v5797_v16 = vsel %vm1072_vm1, %v5795_v59, %v10349_v3 }
 0x721   : > { %v10353_v56 = vpop.permute.xlu0 %10352  ;;  %v5782_v42 = vsel %vm1072_vm1, %v5780_v53, %v10360_v24  ;;  %v5796_v41 = vsel %vm1072_vm1, %v5794_v60, %v10359_v35  ;;  %vm10518_vm1 = vmmov 0  }
 0x722   : > { %v10355_v25 = vunpack.i.h.bf16 %v10353_v56  ;;  %v10354_v38 = vunpack.i.l.bf16 %v10353_v56  ;;  %8991 = vmatprep.mubr.msk.f32.mxu1 %vm10518_vm1, %v10519_v45 }
 0x724   : > { %v5785_v19 = vsel %vm1105_vm2, %v5783_v34, %v10355_v25  ;;  %v5799_v9 = vsel %vm1105_vm2, %v5797_v16, %v10354_v38  ;;  %v5930_v25 = vld [vmem:[%s13477_s9] sm:$0xf]  ;;  %v7361_v38 = vld [vmem:[%s13477_s9 + $0x4] sm:$0xf]  ;;  %v7363_v34 = vld [vmem:[%s13477_s9 + $0x8] sm:$0xf] }
 0x725   : > { %v10363_v49 = vpop.permute.xlu0 %10362  ;;  %v7365_v16 = vld [vmem:[%s13477_s9 + $0xc] sm:$0xf] }
 0x726   : > { %v10365_v47 = vunpack.i.h.bf16 %v10363_v49  ;;  %v10364_v27 = vunpack.i.l.bf16 %v10363_v49  ;;  %v7359_v49 = vld [vmem:[%s13476_s8] ss:$0 sm:$0xff] }
 0x728   : > { %v5784_v43 = vsel %vm1105_vm2, %v5782_v42, %v10365_v47  ;;  %v5798_v55 = vsel %vm1105_vm2, %v5796_v41, %v10364_v27  ;;  %v7367_v47 = vld [vmem:[%s13477_s9 + $0x10] sm:$0xf]  ;;  %v7369_v27 = vld [vmem:[%s13477_s9 + $0x14] sm:$0xf] }
 0x729   : > { %v6646_v42 = vld [vmem:[%s13478_s10 + $0x10] sm:$0xff] }
 0x72d   : > { %v13151_v62 = vpop.permute.xlu1 %10372  ;;  %v10368_v4 = vpop.permute.xlu0 %10367 }
 0x72e   : > { %v10370_v20 = vunpack.i.h.bf16 %v10368_v4  ;;  %v10369_v54 = vunpack.i.l.bf16 %v10368_v4  ;;  %v10375_v21 = vunpack.i.h.bf16 %v13151_v62  ;;  %v10374_v48 = vunpack.i.l.bf16 %v13151_v62 }
 0x730   : > { %v5787_v33 = vsel %vm1153_vm3, %v5785_v19, %v10370_v20  ;;  %v5801_v31 = vsel %vm1153_vm3, %v5799_v9, %v10369_v54  ;;  %v7371_v20 = vld [vmem:[%s13477_s9 + $0x18] sm:$0xf]  ;;  %v7373_v54 = vld [vmem:[%s13477_s9 + $0x1c] sm:$0xf]  ;;  %v6648_v19 = vld [vmem:[%s13478_s10 + $0x20] sm:$0xff] }
 0x731   : > { %v10378_v7 = vpop.permute.xlu1 %10377  ;;  %v5803_v29 = vsel %vm4111_vm7, %v5801_v31, %v10374_v48  ;;  %v5789_v12 = vsel %vm4111_vm7, %v5787_v33, %v10375_v21  ;;  %v6649_v9 = vld [vmem:[%s13478_s10 + $0x28] sm:$0xff]  ;;  %v6652_v21 = vld [vmem:[%s13478_s10 + $0x40] sm:$0xff]  ;;  %v6654_v33 = vld [vmem:[%s13478_s10 + $0x50] sm:$0xff] }
 0x732   : > { %v10380_v46 = vunpack.i.h.bf16 %v10378_v7  ;;  %v10379_v14 = vunpack.i.l.bf16 %v10378_v7  ;;  %v10517_v7 = vmov 0.0|0.0   ;;  %v6653_v48 = vld [vmem:[%s13478_s10 + $0x48] sm:$0xff]  ;;  %v6655_v31 = vld [vmem:[%s13478_s10 + $0x58] sm:$0xff] }
 0x733   : > { %9898 = vmatprep.subr.bf16.mxu1 %v10517_v7  ;;  %9925 = vmatprep.subr.bf16.mxu0 %v10517_v7 }
 0x734   : > { %v5786_v44 = vsel %vm1153_vm3, %v5784_v43, %v10380_v46  ;;  %v5800_v8 = vsel %vm1153_vm3, %v5798_v55, %v10379_v14  ;;  %v7375_v46 = vld [vmem:[%s13477_s9 + $0x20] sm:$0xf]  ;;  %v6651_v43 = vld [vmem:[%s13478_s10 + $0x38] sm:$0xff] }
 0x735   : > { %v10383_v18 = vpop.permute.xlu1 %10382  ;;  %v6644_v14 = vld [vmem:[%s13478_s10] sm:$0xff] }
 0x736   : > { %v10385_v15 = vunpack.i.h.bf16 %v10383_v18  ;;  %v10384_v50 = vunpack.i.l.bf16 %v10383_v18 }
 0x738   : > { %v5788_v63 = vsel %vm4111_vm7, %v5786_v44, %v10385_v15  ;;  %v5802_v30 = vsel %vm4111_vm7, %v5800_v8, %v10384_v50  ;;  %v6647_v15 = vld [vmem:[%s13478_s10 + $0x18] sm:$0xff]  ;;  %v9941_v44 = vpack.c.bf16 %v6655_v31, %v6654_v33  ;;  %v6656_v8 = vld [vmem:[%s13478_s10 + $0x60] sm:$0xff] }
 0x739   : > { %v9929_v50 = vpack.c.bf16 %v6647_v15, %v6646_v42 }
 0x73d   : > { %v10388_v28 = vpop.permute.xlu0 %10387 }
 0x73e   : > { %v10393_v58 = vpop.permute.xlu1 %10392  ;;  %v10390_v13 = vunpack.i.h.bf16 %v10388_v28  ;;  %v10389_v52 = vunpack.i.l.bf16 %v10388_v28  ;;  %v9938_v28 = vpack.c.bf16 %v6653_v48, %v6652_v21 }
 0x73f   : > { %v10395_v26 = vunpack.i.h.bf16 %v10393_v58  ;;  %v10394_v5 = vunpack.i.l.bf16 %v10393_v58  ;;  %v6645_v58 = vld [vmem:[%s13478_s10 + $0x8] sm:$0xff] }
 0x740   : > { %v5805_v17 = vsel %vm4129_vm9, %v5803_v29, %v10389_v52  ;;  %v5791_v36 = vsel %vm4129_vm9, %v5789_v12, %v10390_v13  ;;  %v9926_v41 = vpack.c.bf16 %v6645_v58, %v6644_v14  ;;  %v6660_v13 = vld [vmem:[%s13478_s10 + $0x80] sm:$0xff]  ;;  %v6661_v52 = vld [vmem:[%s13478_s10 + $0x88] sm:$0xff] }
 0x741   : > { %v5804_v0 = vsel %vm4129_vm9, %v5802_v30, %v10394_v5  ;;  %v5790_v6 = vsel %vm4129_vm9, %v5788_v63, %v10395_v26  ;;  %v9932_v26 = vpack.c.bf16 %v6649_v9, %v6648_v19  ;;  %v6650_v5 = vld [vmem:[%s13478_s10 + $0x30] sm:$0xff]  ;;  %v6664_v12 = vld [vmem:[%s13478_s10 + $0xa0] sm:$0xff] }
 0x742   : > { %v10398_v40 = vpop.permute.xlu1 %10397  ;;  %v9935_v55 = vpack.c.bf16 %v6651_v43, %v6650_v5 }
 0x743   : > { %v10400_v61 = vunpack.i.h.bf16 %v10398_v40  ;;  %v10399_v22 = vunpack.i.l.bf16 %v10398_v40  ;;  %v6657_v40 = vld [vmem:[%s13478_s10 + $0x68] sm:$0xff] }
 0x744   : > { %v9944_v63 = vpack.c.bf16 %v6657_v40, %v6656_v8 }
 0x745   : > { %v5806_v23 = vsel %vm4147_vm11, %v5804_v0, %v10399_v22  ;;  %v5792_v2 = vsel %vm4147_vm11, %v5790_v6, %v10400_v61  ;;  %v6658_v61 = vld [vmem:[%s13478_s10 + $0x70] sm:$0xff]  ;;  %v6659_v22 = vld [vmem:[%s13478_s10 + $0x78] sm:$0xff]  ;;  %v9950_v6 = vpack.c.bf16 %v6661_v52, %v6660_v13 }
 0x746   : > { %v10403_v39 = vpop.permute.xlu1 %10402  ;;  %5911 = vmatprep.mubr.f32.mxu0 %v5806_v23  ;;  %v9947_v30 = vpack.c.bf16 %v6659_v22, %v6658_v61  ;;  %v6662_v23 = vld [vmem:[%s13478_s10 + $0x90] sm:$0xff] }
 0x747   : > { %v10405_v51 = vunpack.i.h.bf16 %v10403_v39  ;;  %v10404_v11 = vunpack.i.l.bf16 %v10403_v39  ;;  %5912 = vmatmul.mubr.f32.vlgmr.msra.gmra.mrb[152].mxu0 %v5792_v2  ;;  %v6663_v2 = vld [vmem:[%s13478_s10 + $0x98] sm:$0xff] }
 0x748   : > { %9927 = vmatpush1.bf16.msra.mxu0 %v9926_v41 }
 0x749   : > { %v5807_v62 = vsel %vm4147_vm11, %v5805_v17, %v10404_v11  ;;  %v5793_v56 = vsel %vm4147_vm11, %v5791_v36, %v10405_v51  ;;  %9928 = vmatprep.subr.bf16.mxu0 %v10517_v7  ;;  %v9953_v51 = vpack.c.bf16 %v6663_v2, %v6662_v23  ;;  %v6665_v17 = vld [vmem:[%s13478_s10 + $0xa8] sm:$0xff] }
 0x74a   : > { %5916 = vmatprep.mubr.f32.mxu0 %v5807_v62  ;;  %v9956_v62 = vpack.c.bf16 %v6665_v17, %v6664_v12 }
 0x74b   : > { %5917 = vmatmul.mubr.f32.gmra.mrb[154].mxu0 %v5793_v56 }
 0x74c   : > { %9930 = vmatpush1.bf16.msra.mxu0 %v9929_v50 }
 0x74d   : > { %9931 = vmatprep.subr.bf16.mxu0 %v10517_v7 }
 0x750   : > { %9933 = vmatpush1.bf16.msra.mxu0 %v9932_v26 }
 0x751   : > { %9934 = vmatprep.subr.bf16.mxu0 %v10517_v7 }
 0x754   : > { %9936 = vmatpush1.bf16.msra.mxu0 %v9935_v55 }
 0x755   : > { %9937 = vmatprep.subr.bf16.mxu0 %v10517_v7 }
 0x758   : > { %9939 = vmatpush1.bf16.msra.mxu0 %v9938_v28 }
 0x759   : > { %9940 = vmatprep.subr.bf16.mxu0 %v10517_v7 }
 0x75c   : > { %9942 = vmatpush1.bf16.msra.mxu0 %v9941_v44 }
 0x75d   : > { %9943 = vmatprep.subr.bf16.mxu0 %v10517_v7 }
 0x760   : > { %9945 = vmatpush1.bf16.msra.mxu0 %v9944_v63 }
 0x761   : > { %9946 = vmatprep.subr.bf16.mxu0 %v10517_v7 }
 0x764   : > { %9948 = vmatpush1.bf16.msra.mxu0 %v9947_v30 }
 0x765   : > { %9949 = vmatprep.subr.bf16.mxu0 %v10517_v7 }
 0x768   : > { %9951 = vmatpush1.bf16.msra.mxu0 %v9950_v6 }
 0x769   : > { %9952 = vmatprep.subr.bf16.mxu0 %v10517_v7 }
 0x76c   : > { %9954 = vmatpush1.bf16.msra.mxu0 %v9953_v51 }
 0x76d   : > { %9955 = vmatprep.subr.bf16.mxu0 %v10517_v7 }
 0x770   : > { %9957 = vmatpush1.bf16.msra.mxu0 %v9956_v62 }
 0x771   : > { %9958 = vmatprep.subr.bf16.mxu0 %v10517_v7 }
 0x81a   : > { %v8542_v37 = vpop.f32.mrb[152].mxu0 }
 0x81b   : > { %v8543_v32 = vpop.f32.mrb[153].mxu0 }
 0x81c   : > { %v8544_v1 = vadd.f32 %v8543_v32, %v8542_v37  ;;  %v6666_v37 = vld [vmem:[%s13478_s10 + $0xb0] sm:$0xff] }
 0x81e   : > { %v5914_v57 = vadd.f32 %v8544_v1, %v7359_v49  ;;  %v8545_v3 = vpop.f32.mrb[154].mxu0 }
 0x81f   : > { %v8546_v18 = vpop.f32.mrb[155].mxu0 }
 0x820   : > { %vm5922_vm7 = vcmp.ge.f32.partialorder %v5914_v57, 0.0  ;;  %v5924_v10 = vmul.f32 0.01, %v5914_v57  ;;  %v8547_v59 = vadd.f32 %v8546_v18, %v8545_v3  ;;  %v6668_v3 = vld [vmem:[%s13478_s10 + $0xc0] sm:$0xff]  ;;  %v6669_v18 = vld [vmem:[%s13478_s10 + $0xc8] sm:$0xff] }
 0x822   : > { %v5926_v24 = vsel %vm5922_vm7, %v5914_v57, %v5924_v10  ;;  %v5919_v35 = vadd.f32 %v8547_v59, %v7359_v49  ;;  %v6667_v49 = vld [vmem:[%s13478_s10 + $0xb8] sm:$0xff]  ;;  %v9962_v59 = vpack.c.bf16 %v6669_v18, %v6668_v3 }
 0x823   : > { %5928 = vst.msk [vmem:[%s13195_s19] sm:$0xff] %vm4051_vm5, %v5926_v24  ;;  %v9959_v1 = vpack.c.bf16 %v6667_v49, %v6666_v37 }
 0x824   : > { %vm5923_vm11 = vcmp.ge.f32.partialorder %v5919_v35, 0.0  ;;  %v5925_v4 = vmul.f32 0.01, %v5919_v35 }
 0x825   : > { %9960 = vmatpush1.bf16.msra.mxu0 %v9959_v1 }
 0x826   : > { %v5927_v53 = vsel %vm5923_vm11, %v5919_v35, %v5925_v4  ;;  %9961 = vmatprep.subr.bf16.mxu0 %v10517_v7  ;;  %v6670_v4 = vld [vmem:[%s13478_s10 + $0xd0] sm:$0xff] }
 0x827   : > { %5929 = vst.msk [vmem:[%s13195_s19 + $0x8] sm:$0xff] %vm4051_vm5, %v5927_v53  ;;  %v9899_v60 = vpack.c.bf16 %v5927_v53, %v5926_v24 }
 0x829   : > { %9900 = vmatpush3.bf16.msra.mxu1 %v9899_v60  ;;  %9963 = vmatpush1.bf16.msra.mxu0 %v9962_v59 }
 0x82a   : > { %9901 = vmatprep.subr.bf16.mxu1 %v10517_v7  ;;  %6733 = vmatprep.subr.mxu0 %v10519_v45 }
 0x82c   : > { %8992 = vmatmul.mubr.msk.f32.vlgmr.msra.gmra.mrb[176].mxu1 %vm1039_vm0, %v5930_v25 }
 0x82d   : > { %9903 = vmatpush3.bf16.msra.mxu1 %v9899_v60  ;;  %8998 = vmatprep.mubr.msk.f32.mxu1 %vm10518_vm1, %v10519_v45 }
 0x82e   : > { %9904 = vmatprep.subr.bf16.mxu1 %v10517_v7  ;;  %6734 = vmatpush1.msra.mxu0 %v6670_v4 }
 0x830   : > { %8999 = vmatmul.mubr.msk.f32.vlgmr.msra.gmra.mrb[178].mxu1 %vm1039_vm0, %v7361_v38 }
 0x831   : > { %9906 = vmatpush3.bf16.msra.mxu1 %v9899_v60  ;;  %9005 = vmatprep.mubr.msk.f32.mxu1 %vm10518_vm1, %v10519_v45 }
 0x832   : > { %9907 = vmatprep.subr.bf16.mxu1 %v10517_v7 }
 0x834   : > { %9006 = vmatmul.mubr.msk.f32.vlgmr.msra.gmra.mrb[180].mxu1 %vm1039_vm0, %v7363_v34 }
 0x835   : > { %9909 = vmatpush3.bf16.msra.mxu1 %v9899_v60  ;;  %9012 = vmatprep.mubr.msk.f32.mxu1 %vm10518_vm1, %v10519_v45 }
 0x836   : > { %9910 = vmatprep.subr.bf16.mxu1 %v10517_v7 }
 0x838   : > { %9013 = vmatmul.mubr.msk.f32.vlgmr.msra.gmra.mrb[182].mxu1 %vm1039_vm0, %v7365_v16 }
 0x839   : > { %9912 = vmatpush3.bf16.msra.mxu1 %v9899_v60  ;;  %9019 = vmatprep.mubr.msk.f32.mxu1 %vm10518_vm1, %v10519_v45 }
 0x83a   : > { %9913 = vmatprep.subr.bf16.mxu1 %v10517_v7 }
 0x83c   : > { %9020 = vmatmul.mubr.msk.f32.vlgmr.msra.gmra.mrb[184].mxu1 %vm1039_vm0, %v7367_v47 }
 0x83d   : > { %9915 = vmatpush3.bf16.msra.mxu1 %v9899_v60  ;;  %9026 = vmatprep.mubr.msk.f32.mxu1 %vm10518_vm1, %v10519_v45 }
 0x83e   : > { %9916 = vmatprep.subr.bf16.mxu1 %v10517_v7 }
 0x840   : > { %9027 = vmatmul.mubr.msk.f32.vlgmr.msra.gmra.mrb[186].mxu1 %vm1039_vm0, %v7369_v27 }
 0x841   : > { %9918 = vmatpush3.bf16.msra.mxu1 %v9899_v60  ;;  %9033 = vmatprep.mubr.msk.f32.mxu1 %vm10518_vm1, %v10519_v45 }
 0x842   : > { %9919 = vmatprep.subr.bf16.mxu1 %v10517_v7 }
 0x844   : > { %9034 = vmatmul.mubr.msk.f32.vlgmr.msra.gmra.mrb[188].mxu1 %vm1039_vm0, %v7371_v20 }
 0x845   : > { %9921 = vmatpush3.bf16.msra.mxu1 %v9899_v60  ;;  %9040 = vmatprep.mubr.msk.f32.mxu1 %vm10518_vm1, %v10519_v45 }
 0x846   : > { %9922 = vmatprep.subr.bf16.mxu1 %v10517_v7 }
 0x848   : > { %9041 = vmatmul.mubr.msk.f32.vlgmr.msra.gmra.mrb[190].mxu1 %vm1039_vm0, %v7373_v54 }
 0x849   : > { %9924 = vmatpush3.bf16.msra.mxu1 %v9899_v60  ;;  %9047 = vmatprep.mubr.msk.f32.mxu1 %vm10518_vm1, %v10519_v45 }
 0x84c   : > { %9048 = vmatmul.mubr.msk.f32.vlgmr.msra.gmra.mrb[192].mxu1 %vm1039_vm0, %v7375_v46 }
 0x8ff   : > { %v6000_v0 = vpop.f32.mrb[176].mxu1 }
 0x900   : > { %v8993_v39 = vpop.f32.mrb[177].mxu1 }
 0x903   : > { %v6075_v11 = vpop.f32.mrb[178].mxu1 }
 0x904   : > { %6605 = vrot.lane.b32.xlu0 %v6075_v11, %s13543_s25  ;;  %v9000_v29 = vpop.f32.mrb[179].mxu1  ;;  %s10520_s25 = smov [#allocation2]  }
 0x905   : > { %s10410_s3 = sshll.u32 %s10520_s25, 4  ;;  %s10411_s3 = int_to_ptr.vmem [resolvable:$false] %s10410_s3 }
 0x907   : > { %v6150_v36 = vpop.f32.mrb[180].mxu1 }
 0x908   : > { %6609 = vrot.lane.b32.xlu1 %v6150_v36, %s13533_s30  ;;  %v9007_v56 = vpop.f32.mrb[181].mxu1 }
 0x90b   : > { %v6225_v32 = vpop.f32.mrb[182].mxu1 }
 0x90c   : > { %6613 = vrot.lane.b32.xlu0 %v6225_v32, %s13544_s4  ;;  %v9014_v57 = vpop.f32.mrb[183].mxu1  ;;  %s6762_s4 = scalar_lea.sflag [#allocation3], %s12729_s0 }
 0x90f   : > { %v6300_v10 = vpop.f32.mrb[184].mxu1 }
 0x910   : > { %v9021_v24 = vpop.f32.mrb[185].mxu1 }
 0x913   : > { %v6375_v35 = vpop.f32.mrb[186].mxu1 }
 0x914   : > { %6621 = vrot.lane.b32.xlu0 %v6375_v35, %s13545_s20  ;;  %v9028_v7 = vpop.f32.mrb[187].mxu1 }
 0x917   : > { %v6450_v53 = vpop.f32.mrb[188].mxu1 }
 0x918   : > { %6617 = vrot.lane.b32.xlu0 %v6300_v10, %s13542_s27  ;;  %6625 = vrot.lane.b32.xlu1 %v6450_v53, %s13530_s23  ;;  %v9035_v60 = vpop.f32.mrb[189].mxu1  ;;  %s7388_s23 = sshll.u32 %s10624_s22, 10 }
 0x919   : > { %s13377_s5 = scalar_lea.hbm %s13481_s13, %s7388_s23 }
 0x91b   : > { %v6525_v25 = vpop.f32.mrb[190].mxu1 }
 0x91c   : > { %6629 = vrot.lane.b32.xlu1 %v6525_v25, %s13546_s26  ;;  %v9042_v38 = vpop.f32.mrb[191].mxu1 }
 0x91f   : > { %v6600_v45 = vpop.f32.mrb[192].mxu1 }
 0x920   : > { %6633 = vrot.lane.b32.xlu1 %v6600_v45, %s13541_s6  ;;  %v9049_v34 = vpop.f32.mrb[193].mxu1  ;;  %s6787_s6 = sshll.u32 %s12735_s2, 4  ;;  %s10412_s2 = scalar_lea.vmem %s10411_s3, 2048  ;;  %s13379_s6 = int_to_ptr.vmem [resolvable:$true] %s6787_s6 }
 0x921   : > { %s10406_s30 = scalar_lea.vmem %s13379_s6, 1024  ;;  %p10413_p0 = scmp.lt.s32.totalorder %s13379_s6, %s10411_s3 }
 0x922   : > { %p10407_p11 = scmp.ne.s32.totalorder %s13379_s6, %s10406_s30  ;;  %p10414_p1 = scmp.lt.s32.totalorder %s10412_s2, %s10406_s30 }
 0x924   : > { %p10408_p12 = pnand %p10407_p11, %p10641_p5  ;;  %p10415_p2 = por %p10414_p1, %p10413_p0 }
 0x926   : > { %p10409_p13 = pneg %p10408_p12 }
 0x928   : > { %p10416_p3 = pnand %p10415_p2, %p10409_p13 }
 0x976   : > { %v6606_v16 = vpop.permute.xlu0 %6605 }
 0x977   : > { %v6636_v46 = vsel %vm4051_vm5, %v6000_v0, %v6606_v16 }
 0x97a   : > { %v6610_v27 = vpop.permute.xlu1 %6609 }
 0x97b   : > { %v6637_v42 = vsel %vm1105_vm2, %v6636_v46, %v6610_v27 }
 0x97e   : > { %v6614_v47 = vpop.permute.xlu0 %6613 }
 0x97f   : > { %v6638_v41 = vsel %vm4102_vm6, %v6637_v42, %v6614_v47 }
 0x986   : > { %v6622_v20 = vpop.permute.xlu0 %6621 }
 0x98a   : > { %v6626_v54 = vpop.permute.xlu1 %6625  ;;  %v6618_v14 = vpop.permute.xlu0 %6617 }
 0x98b   : > { %v6639_v15 = vsel %vm4129_vm9, %v6638_v41, %v6618_v14  ;;  %v6641_v50 = vsel %vm1039_vm0, %v6622_v20, %v6626_v54 }
 0x98c   : > { %v6640_v5 = vsel %vm4156_vm12, %v6639_v15, %v6622_v20 }
 0x98e   : > { %v6630_v58 = vpop.permute.xlu1 %6629 }
 0x98f   : > { %v6642_v19 = vsel %vm4068_vm15, %v6641_v50, %v6630_v58 }
 0x992   : > { %v6634_v9 = vpop.permute.xlu1 %6633 }
 0x993   : > { %v6643_v26 = vsel %vm1153_vm3, %v6642_v19, %v6634_v9 }
 0x994   : > { %7378 = vmatprep.mubr.msk.f32.mxu0 %vm4120_vm8, %v6643_v26 }
 0x995   : > { %6746 = vmatmul.mubr.f32.vlgmr.msra.gmra.mrb[156].mxu0 %v6640_v5 }
 0x996   : > { %10419 = shalt.err (!%p10416_p3)
}
 0x997   : > { %s10420_s12 = scalar_lea.hbm %s13377_s5, 1024  ;;  %s10424_s20 = scalar_lea.hbm %s13481_s13, 2048 }
 0x998   : > { %p10421_p4 = scmp.ne.s32.totalorder %s13377_s5, %s10420_s12  ;;  %p10425_p9 = scmp.lt.u32.totalorder %s13377_s5, %s13481_s13 }
 0x999   : > { %p10426_p10 = scmp.lt.u32.totalorder %s10424_s20, %s10420_s12  ;;  %p10428_p12 = scmp.lt.u32.totalorder %s10420_s12, %s13377_s5 }
 0x99a   : > { %p10422_p7 = pnand %p10421_p4, %p10641_p5 }
 0x99b   : > { %p10427_p11 = por %p10426_p10, %p10425_p9 }
 0x99c   : > { %p10423_p8 = pneg %p10422_p7 }
 0x99d   : > { %p10429_p13 = por %p10428_p12, %p10427_p11 }
 0x99f   : > { %p10430_p0 = pnand %p10429_p13, %p10423_p8 }
 0x9a1   : > { %10433 = shalt.err (!%p10430_p0)
}
 0x9a2   : > { %s10521_s27 = smov 128   ;;  %s7389_s16 = sshll.u32 %s10624_s22, 8 }
 0x9a3   : > { %9973 = dma.vmem_to_hbm [thread:$0]  (%p10641_p5), %s13379_s6, 1024, %s13377_s5, %s6762_s4, %s10521_s27, %s10521_s27, %s13532_s17  }
 0x9a4   : > { %s6803_s30 = sshll.u32 %s13195_s19, 4  ;;  %s13413_s2 = scalar_lea.hbm %s13482_s14, %s7389_s16  ;;  %s13415_s30 = int_to_ptr.vmem [resolvable:$true] %s6803_s30 }
 0x9a5   : > { %s6767_s12 = scalar_lea.sflag [#allocation5], %s12729_s0  ;;  %s10434_s1 = scalar_lea.vmem %s13415_s30, 256 }
 0x9a6   : > { %p10435_p1 = scmp.ne.s32.totalorder %s13415_s30, %s10434_s1  ;;  %s10522_s7 = smov [#allocation4]  }
 0x9a7   : > { %s10438_s6 = sshll.u32 %s10522_s7, 4  ;;  %s10439_s6 = int_to_ptr.vmem [resolvable:$false] %s10438_s6 }
 0x9a8   : > { %p10436_p2 = pnand %p10435_p1, %p10641_p5  ;;  %s10440_s22 = scalar_lea.vmem %s10439_s6, 512 }
 0x9a9   : > { %p10441_p4 = scmp.lt.s32.totalorder %s13415_s30, %s10439_s6  ;;  %p10442_p7 = scmp.lt.s32.totalorder %s10440_s22, %s10434_s1 }
 0x9aa   : > { %p10437_p3 = pneg %p10436_p2 }
 0x9ab   : > { %p10443_p8 = por %p10442_p7, %p10441_p4 }
 0x9ad   : > { %p10444_p9 = pnand %p10443_p8, %p10437_p3 }
 0x9af   : > { %10447 = shalt.err (!%p10444_p9)
}
 0x9b0   : > { %s10448_s19 = scalar_lea.hbm %s13413_s2, 256  ;;  %s10452_s20 = scalar_lea.hbm %s13482_s14, 512 }
 0x9b1   : > { %p10449_p10 = scmp.ne.s32.totalorder %s13413_s2, %s10448_s19  ;;  %p10453_p13 = scmp.lt.u32.totalorder %s13413_s2, %s13482_s14 }
 0x9b2   : > { %p10454_p0 = scmp.lt.u32.totalorder %s10452_s20, %s10448_s19  ;;  %p10456_p2 = scmp.lt.u32.totalorder %s10448_s19, %s13413_s2 }
 0x9b3   : > { %p10450_p11 = pnand %p10449_p10, %p10641_p5 }
 0x9b4   : > { %p10455_p1 = por %p10454_p0, %p10453_p13 }
 0x9b5   : > { %p10451_p12 = pneg %p10450_p11 }
 0x9b6   : > { %p10457_p3 = por %p10456_p2, %p10455_p1 }
 0x9b8   : > { %p10458_p4 = pnand %p10457_p3, %p10451_p12 }
 0x9ba   : > { %10461 = shalt.err (!%p10458_p4)
}
 0x9bb   : > { %9974 = dma.vmem_to_hbm [thread:$0]  (%p10641_p5), %s13415_s30, 256, %s13413_s2, %s6767_s12, %s10521_s27, %s10521_s27, %s13532_s17   ;;  %vm6754_vm2 = vcmask 125952  }
 0x9bc   : > { %v7377_v43 = vld [vmem:[%s13479_s11] ss:$0 sm:$0xff]  ;;  %s6958_s3 = sshll.u32 %s10665_s24, 2 }
 0x9bd   : > { %s525_s28 = scalar_lea.vmem %s13483_s15, %s6958_s3 }
 0xa68   : > { %v6747_v55 = vpop.f32.mrb[156].mxu0 }
 0xa69   : > { %v6748_v21 = vadd.f32 %v7377_v43, %v6747_v55  ;;  %v6749_v48 = vpop.f32.mrb[157].mxu0 }
 0xa6b   : > { %vm6751_vm0 = vcmp.ge.f32.partialorder %v6748_v21, 0.0  ;;  %v6752_v28 = vmul.f32 0.01, %v6748_v21 }
 0xa6d   : > { %v6753_v33 = vsel %vm6751_vm0, %v6748_v21, %v6752_v28 }
 0xa6e   : > { %6755 = vst.msk [vmem:[%s525_s28] sm:$0xf] %vm6754_vm2, %v6753_v33 }
 0xa6f PF: > { %p9984_p5 = scmp.ge.s32.totalorder %s10500_s21, 2  ;;  %s6829_s17 = sand.u32 1, %s10488_s18  }
 0xa70   : > { %s6830_s24 = scalar_lea.sflag [#allocation3], %s6829_s17 }
 0xa71   : > { %p9978_p7 = pnand %p9984_p5, %p10645_p6 }
 0xa73   : > { %10479 = dma.done.wait (!%p9978_p7), %s6830_s24, 1024  }
 0xa74   : > { %10481 = vsyncadd (!%p9978_p7), %s6830_s24, 4294966272  ;;  %s6839_s0 = scalar_lea.sflag [#allocation5], %s6829_s17 }
 0xa75   : > { %10483 = dma.done.wait (!%p9978_p7), %s6839_s0, 256  }
 0xa76   : > { %10485 = vsyncadd (!%p9978_p7), %s6839_s0, 4294967040  ;;  %s13547_s21 = sld [smem:[#allocation10_spill]]  ;;  %s13548_s18 = sld [smem:[#allocation8_spill]] }
 0xa77   : > { %s13549_s19 = sld [smem:[#allocation9_spill]]  ;;  %s13550_s20 = sld [smem:[#allocation11_spill]] }
 0xa7c   : > { %p29_p8 = scmp.ge.s32.totalorder %s13547_s21, 4  }
 0xa7e   :  { %31 = sbr.rel (!%p29_p8) target bundleno = 15 (0xf), region = 183 }
 0xa85   :  { %6851 = vsyncpa [#allocation3], 1 }
 0xa86   :  { %6853 = vsyncpa [#allocation3 + $0x1], 1 }
 0xa87   :  { %6854 = vsyncpa [#allocation5], 1 }
 0xa88   :  { %6856 = vsyncpa [#allocation5 + $0x1], 1 }

</bundles_post_ra>
